<compile_context>
chip_gen: v5e
topology: v5e:2x2
jax: 0.10.0
libtpu: 0.0.40
codegen_flags: <defaults>
</compile_context>

<pallas_src>
import functools
import math

import jax
import jax.numpy as jnp
from jax import lax, random
from jax.experimental import pallas as pl
from jax.experimental.pallas import tpu as pltpu


# ---------------- fused Pallas kernel ----------------

def _decoder_fused_kernel(
    tgt_ref, src_ref, pe_ref,
    diw1_ref, dib1_ref, diw2_ref, dib2_ref,
    sa_wqkv_ref, sa_bqkv_ref, sa_wo_ref, sa_bo_ref,
    ca_wqkv_ref, ca_bqkv_ref, ca_wo_ref, ca_bo_ref,
    ffw1_ref, ffb1_ref, ffw2_ref, ffb2_ref,
    lng_ref, lnb_ref,
    mw1_ref, mb1_ref, mw2_ref, mb2_ref,
    out_ref,
    *, n_layers, n_heads,
):
    f32 = jnp.float32
    tgt = tgt_ref[...].astype(f32)          # (St, Fin)   -- one batch element (grid axis 0)
    src = src_ref[...].astype(f32)          # (Ss, D)     -- decoder memory
    St = tgt.shape[0]
    D = src.shape[1]
    H = n_heads
    Dh = D // H
    scale = 1.0 / math.sqrt(Dh)

    def layer_norm(x, g, b):
        # torch.nn.LayerNorm: biased variance, eps=1e-5
        mean = jnp.mean(x, axis=-1, keepdims=True)
        xc = x - mean
        var = jnp.mean(xc * xc, axis=-1, keepdims=True)
        return xc * lax.rsqrt(var + 1e-5) * g + b

    def attention(xq, xkv, wqkv, bqkv, wo, bo, mask, is_self):
        """torch.nn.MultiheadAttention (batch_first, eval) for a single batch element.

        xq: (Sq, D), xkv: (Sk, D); wqkv: (D, 3D) packed [q|k|v]; bqkv: (1, 3D);
        wo: (D, D); bo: (1, D). mask: bool (Sq, Sk), True = masked, or None.
        """
        Sq = xq.shape[0]
        if is_self:
            qkv = jnp.dot(xq, wqkv, preferred_element_type=f32) + bqkv        # (Sq, 3D)
            q = qkv[:, :D]
            k = qkv[:, D:2 * D]
            v = qkv[:, 2 * D:]
        else:
            q = jnp.dot(xq, wqkv[:, :D], preferred_element_type=f32) + bqkv[:, :D]   # (Sq, D)
            kv = jnp.dot(xkv, wqkv[:, D:], preferred_element_type=f32) + bqkv[:, D:]  # (Sk, 2D)
            k = kv[:, :D]
            v = kv[:, D:]

        acc = jnp.zeros((Sq, D), f32)
        for h in range(H):
            sl = slice(h * Dh, (h + 1) * Dh)
            qh, kh, vh = q[:, sl], k[:, sl], v[:, sl]                          # (S, Dh)
            # q @ k^T without an explicit transpose (contract last dims).
            s = lax.dot_general(qh, kh, (((1,), (1,)), ((), ())),
                                preferred_element_type=f32) * scale           # (Sq, Sk)
            if mask is not None:
                s = jnp.where(mask, -1e30, s)
            s = s - jnp.max(s, axis=-1, keepdims=True)
            p = jnp.exp(s)
            l = jnp.sum(p, axis=-1, keepdims=True)
            o = jnp.dot(p, vh, preferred_element_type=f32) * pl.reciprocal(l, approx=True)
            # concat-of-heads @ Wo  ==  sum_h (o_h @ Wo[h*Dh:(h+1)*Dh, :])
            acc = acc + jnp.dot(o, wo[sl, :], preferred_element_type=f32)
        return acc + bo

    # ---- decoder_input_layer: Linear(Fin, D) -> Tanh -> Linear(D, D) ----
    x = jnp.tanh(jnp.dot(tgt, diw1_ref[...], preferred_element_type=f32) + dib1_ref[...])
    x = jnp.dot(x, diw2_ref[...], preferred_element_type=f32) + dib2_ref[...]   # (St, D)

    # ---- positional encoding (dropout_pos_enc = identity in eval) ----
    x = x + pe_ref[...].astype(f32)

    # ---- causal mask (generate_square_subsequent_mask), built in-kernel ----
    row = lax.broadcasted_iota(jnp.int32, (St, St), 0)
    col = lax.broadcasted_iota(jnp.int32, (St, St), 1)
    causal = col > row                                                          # True = masked

    # ---- nn.TransformerDecoder: post-norm layers, relu FFN, batch_first ----
    for layer in range(n_layers):
        sa_wqkv = sa_wqkv_ref[layer]
        sa_bqkv = sa_bqkv_ref[layer]
        sa_wo = sa_wo_ref[layer]
        sa_bo = sa_bo_ref[layer]
        ca_wqkv = ca_wqkv_ref[layer]
        ca_bqkv = ca_bqkv_ref[layer]
        ca_wo = ca_wo_ref[layer]
        ca_bo = ca_bo_ref[layer]
        ffw1 = ffw1_ref[layer]
        ffb1 = ffb1_ref[layer]
        ffw2 = ffw2_ref[layer]
        ffb2 = ffb2_ref[layer]
        lng = lng_ref[layer]                                                    # (3, D)
        lnb = lnb_ref[layer]                                                    # (3, D)

        sa = attention(x, x, sa_wqkv, sa_bqkv, sa_wo, sa_bo, causal, is_self=True)
        x = layer_norm(x + sa, lng[0:1, :], lnb[0:1, :])

        ca = attention(x, src, ca_wqkv, ca_bqkv, ca_wo, ca_bo, None, is_self=False)
        x = layer_norm(x + ca, lng[1:2, :], lnb[1:2, :])

        h1 = jnp.maximum(jnp.dot(x, ffw1, preferred_element_type=f32) + ffb1, 0.0)
        h2 = jnp.dot(h1, ffw2, preferred_element_type=f32) + ffb2
        x = layer_norm(x + h2, lng[2:3, :], lnb[2:3, :])

    # ---- linear_mapping: Linear(D, D) -> Tanh -> Linear(D, Fin) ----
    y = jnp.tanh(jnp.dot(x, mw1_ref[...], preferred_element_type=f32) + mb1_ref[...])
    y = jnp.dot(y, mw2_ref[...], preferred_element_type=f32) + mb2_ref[...]     # (St, Fin)

    out_ref[...] = y.astype(out_ref.dtype)


def _replicated_spec(shape):
    """Whole-array block, broadcast to every grid step (weights / PE table)."""
    ndim = len(shape)

    def index_map(b):
        return (0,) * ndim

    return pl.BlockSpec(shape, index_map)


_WEIGHT_ORDER = (
    "dec_in_w1", "dec_in_b1", "dec_in_w2", "dec_in_b2",
    "sa_wqkv", "sa_bqkv", "sa_wo", "sa_bo",
    "ca_wqkv", "ca_bqkv", "ca_wo", "ca_bo",
    "ff_w1", "ff_b1", "ff_w2", "ff_b2",
    "ln_g", "ln_b",
    "map_w1", "map_b1", "map_w2", "map_b2",
)


def transformer_decoder_forward(params, src, tgt, var, cfg):
    """Matches Transformer_decoder.forward: src is used directly as decoder memory,
    var is unused, encoder / projector branches are never exercised by forward."""
    del var  # unused in the reference forward
    B, St, Fin = tgt.shape
    _, Ss, D = src.shape
    assert St == cfg["out_seq_len"], "tgt seq length must equal out_seq_len (as in torch)"
    assert D == cfg["dim_val"]

    pe = params["pe"][:St]                                      # (St, D) static slice
    weights = [params[name] for name in _WEIGHT_ORDER]

    in_specs = (
        [
            pl.BlockSpec((None, St, Fin), lambda b: (b, 0, 0)),   # tgt: one batch row per step
            pl.BlockSpec((None, Ss, D), lambda b: (b, 0, 0)),     # src (memory)
            _replicated_spec(pe.shape),
        ]
        + [_replicated_spec(w.shape) for w in weights]
    )

    kernel = functools.partial(
        _decoder_fused_kernel,
        n_layers=cfg["n_decoder_layers"],
        n_heads=cfg["n_heads"],
    )
    return pl.pallas_call(
        kernel,
        out_shape=jax.ShapeDtypeStruct((B, St, Fin), tgt.dtype),
        grid=(B,),
        in_specs=in_specs,
        out_specs=pl.BlockSpec((None, St, Fin), lambda b: (b, 0, 0)),
        compiler_params=pltpu.CompilerParams(dimension_semantics=("parallel",)),
    )(tgt, src, pe, *weights)


# ---------------- parameter construction (plain JAX, init-time only) ----------------

def positional_encoding(max_len, d_model):
    pos = jnp.arange(max_len, dtype=jnp.float32)[:, None]
    div = jnp.exp(jnp.arange(0, d_model, 2, dtype=jnp.float32) * (-math.log(10000.0) / d_model))
    pe = jnp.zeros((max_len, d_model), jnp.float32)
    pe = pe.at[:, 0::2].set(jnp.sin(pos * div))
    pe = pe.at[:, 1::2].set(jnp.cos(pos * div))
    return pe


def init_params(key, cfg):
    D = cfg["dim_val"]
    Fin = cfg["input_size"]
    Dff = cfg["dim_feedforward_decoder"]
    L = cfg["n_decoder_layers"]
    keys = iter(random.split(key, 512))

    def lin(din, dout):
        bound = 1.0 / math.sqrt(din)
        w = random.uniform(next(keys), (din, dout), jnp.float32, -bound, bound)
        b = random.uniform(next(keys), (1, dout), jnp.float32, -bound, bound)
        return w, b

    def stacked(make):
        ws, bs = zip(*[make() for _ in range(L)])
        return jnp.stack(ws), jnp.stack(bs)

    p = {}
    # decoder_input_layer: Linear(Fin, D) -> Tanh -> Linear(D, D)
    p["dec_in_w1"], p["dec_in_b1"] = lin(Fin, D)
    p["dec_in_w2"], p["dec_in_b2"] = lin(D, D)
    # linear_mapping: Linear(D, D) -> Tanh -> Linear(D, Fin)
    p["map_w1"], p["map_b1"] = lin(D, D)
    p["map_w2"], p["map_b2"] = lin(D, Fin)
    p["pe"] = positional_encoding(cfg["max_seq_len"], D)

    # per-layer weights, stacked with a leading layer axis; qkv packed as (D, 3D)
    p["sa_wqkv"], p["sa_bqkv"] = stacked(lambda: lin(D, 3 * D))
    p["sa_wo"], p["sa_bo"] = stacked(lambda: lin(D, D))
    p["ca_wqkv"], p["ca_bqkv"] = stacked(lambda: lin(D, 3 * D))
    p["ca_wo"], p["ca_bo"] = stacked(lambda: lin(D, D))
    p["ff_w1"], p["ff_b1"] = stacked(lambda: lin(D, Dff))
    p["ff_w2"], p["ff_b2"] = stacked(lambda: lin(Dff, D))
    # LayerNorm 1/2/3 gains & biases stacked as (L, 3, D)
    p["ln_g"] = jnp.ones((L, 3, D), jnp.float32)
    p["ln_b"] = jnp.zeros((L, 3, D), jnp.float32)
    return p


if __name__ == "__main__":
    cfg = dict(
        input_size=4,
        dec_seq_len=8,
        max_seq_len=64,
        out_seq_len=8,
        dim_val=32,
        n_decoder_layers=2,
        n_heads=4,
        dim_feedforward_decoder=64,
    )
    key = random.PRNGKey(0)
    kp, ks, kt, kv = random.split(key, 4)
    params = init_params(kp, cfg)

    B = 2
    src = random.normal(ks, (B, 8, cfg["dim_val"]), jnp.float32)                 # memory (already d_model)
    tgt = random.normal(kt, (B, cfg["out_seq_len"], cfg["input_size"]), jnp.float32)
    var = random.normal(kv, (B, 3), jnp.float32)                                  # unused by forward

    fwd = jax.jit(functools.partial(transformer_decoder_forward, cfg=cfg))
    out = fwd(params, src, tgt, var)
    out = jax.block_until_ready(out)
    assert out.shape == (B, cfg["out_seq_len"], cfg["input_size"])
    assert jnp.all(jnp.isfinite(out))
    print("KERNEL_OK")
</pallas_src>

<mosaic_0001>
module attributes {stable_mosaic.version = 11 : i64} {
  func.func @_decoder_fused_kernel(%arg0: i32, %arg1: memref<1x8x4xf32, #tpu.memory_space<vmem>>, %arg2: memref<1x8x32xf32, #tpu.memory_space<vmem>>, %arg3: memref<8x32xf32, #tpu.memory_space<vmem>>, %arg4: memref<4x32xf32, #tpu.memory_space<vmem>>, %arg5: memref<1x32xf32, #tpu.memory_space<vmem>>, %arg6: memref<32x32xf32, #tpu.memory_space<vmem>>, %arg7: memref<1x32xf32, #tpu.memory_space<vmem>>, %arg8: memref<2x32x96xf32, #tpu.memory_space<vmem>>, %arg9: memref<2x1x96xf32, #tpu.memory_space<vmem>>, %arg10: memref<2x32x32xf32, #tpu.memory_space<vmem>>, %arg11: memref<2x1x32xf32, #tpu.memory_space<vmem>>, %arg12: memref<2x32x96xf32, #tpu.memory_space<vmem>>, %arg13: memref<2x1x96xf32, #tpu.memory_space<vmem>>, %arg14: memref<2x32x32xf32, #tpu.memory_space<vmem>>, %arg15: memref<2x1x32xf32, #tpu.memory_space<vmem>>, %arg16: memref<2x32x64xf32, #tpu.memory_space<vmem>>, %arg17: memref<2x1x64xf32, #tpu.memory_space<vmem>>, %arg18: memref<2x64x32xf32, #tpu.memory_space<vmem>>, %arg19: memref<2x1x32xf32, #tpu.memory_space<vmem>>, %arg20: memref<2x3x32xf32, #tpu.memory_space<vmem>>, %arg21: memref<2x3x32xf32, #tpu.memory_space<vmem>>, %arg22: memref<32x32xf32, #tpu.memory_space<vmem>>, %arg23: memref<1x32xf32, #tpu.memory_space<vmem>>, %arg24: memref<32x4xf32, #tpu.memory_space<vmem>>, %arg25: memref<1x4xf32, #tpu.memory_space<vmem>>, %arg26: memref<1x8x4xf32, #tpu.memory_space<vmem>>) attributes {dimension_semantics = [#tpu.dimension_semantics<parallel>], iteration_bounds = array<i64: 2>, scalar_prefetch = 0 : i64, scratch_operands = 0 : i64, tpu.core_type = #tpu.core_type<tc>, window_params = [{transform_indices = @transform_0, window_bounds = array<i64: 1, 8, 4>}, {transform_indices = @transform_1, window_bounds = array<i64: 1, 8, 32>}, {pipeline_mode = #tpu.pipeline_mode<synchronous>, transform_indices = @transform_2, window_bounds = array<i64: 8, 32>}, {pipeline_mode = #tpu.pipeline_mode<synchronous>, transform_indices = @transform_3, window_bounds = array<i64: 4, 32>}, {pipeline_mode = #tpu.pipeline_mode<synchronous>, transform_indices = @transform_4, window_bounds = array<i64: 1, 32>}, {pipeline_mode = #tpu.pipeline_mode<synchronous>, transform_indices = @transform_5, window_bounds = array<i64: 32, 32>}, {pipeline_mode = #tpu.pipeline_mode<synchronous>, transform_indices = @transform_6, window_bounds = array<i64: 1, 32>}, {pipeline_mode = #tpu.pipeline_mode<synchronous>, transform_indices = @transform_7, window_bounds = array<i64: 2, 32, 96>}, {pipeline_mode = #tpu.pipeline_mode<synchronous>, transform_indices = @transform_8, window_bounds = array<i64: 2, 1, 96>}, {pipeline_mode = #tpu.pipeline_mode<synchronous>, transform_indices = @transform_9, window_bounds = array<i64: 2, 32, 32>}, {pipeline_mode = #tpu.pipeline_mode<synchronous>, transform_indices = @transform_10, window_bounds = array<i64: 2, 1, 32>}, {pipeline_mode = #tpu.pipeline_mode<synchronous>, transform_indices = @transform_11, window_bounds = array<i64: 2, 32, 96>}, {pipeline_mode = #tpu.pipeline_mode<synchronous>, transform_indices = @transform_12, window_bounds = array<i64: 2, 1, 96>}, {pipeline_mode = #tpu.pipeline_mode<synchronous>, transform_indices = @transform_13, window_bounds = array<i64: 2, 32, 32>}, {pipeline_mode = #tpu.pipeline_mode<synchronous>, transform_indices = @transform_14, window_bounds = array<i64: 2, 1, 32>}, {pipeline_mode = #tpu.pipeline_mode<synchronous>, transform_indices = @transform_15, window_bounds = array<i64: 2, 32, 64>}, {pipeline_mode = #tpu.pipeline_mode<synchronous>, transform_indices = @transform_16, window_bounds = array<i64: 2, 1, 64>}, {pipeline_mode = #tpu.pipeline_mode<synchronous>, transform_indices = @transform_17, window_bounds = array<i64: 2, 64, 32>}, {pipeline_mode = #tpu.pipeline_mode<synchronous>, transform_indices = @transform_18, window_bounds = array<i64: 2, 1, 32>}, {pipeline_mode = #tpu.pipeline_mode<synchronous>, transform_indices = @transform_19, window_bounds = array<i64: 2, 3, 32>}, {pipeline_mode = #tpu.pipeline_mode<synchronous>, transform_indices = @transform_20, window_bounds = array<i64: 2, 3, 32>}, {pipeline_mode = #tpu.pipeline_mode<synchronous>, transform_indices = @transform_21, window_bounds = array<i64: 32, 32>}, {pipeline_mode = #tpu.pipeline_mode<synchronous>, transform_indices = @transform_22, window_bounds = array<i64: 1, 32>}, {pipeline_mode = #tpu.pipeline_mode<synchronous>, transform_indices = @transform_23, window_bounds = array<i64: 32, 4>}, {pipeline_mode = #tpu.pipeline_mode<synchronous>, transform_indices = @transform_24, window_bounds = array<i64: 1, 4>}, {transform_indices = @transform_25, window_bounds = array<i64: 1, 8, 4>}]} {
    %c0 = arith.constant 0 : index
    %c0_0 = arith.constant 0 : index
    %c0_1 = arith.constant 0 : index
    %0 = vector.load %arg1[%c0, %c0_0, %c0_1] : memref<1x8x4xf32, #tpu.memory_space<vmem>>, vector<1x8x4xf32>
    %1 = vector.shape_cast %0 : vector<1x8x4xf32> to vector<8x4xf32>
    %c0_2 = arith.constant 0 : index
    %c0_3 = arith.constant 0 : index
    %c0_4 = arith.constant 0 : index
    %2 = vector.load %arg2[%c0_2, %c0_3, %c0_4] : memref<1x8x32xf32, #tpu.memory_space<vmem>>, vector<1x8x32xf32>
    %3 = vector.shape_cast %2 : vector<1x8x32xf32> to vector<8x32xf32>
    %c0_5 = arith.constant 0 : index
    %c0_6 = arith.constant 0 : index
    %4 = vector.load %arg4[%c0_5, %c0_6] : memref<4x32xf32, #tpu.memory_space<vmem>>, vector<4x32xf32>
    %cst = arith.constant dense<0.000000e+00> : vector<8x32xf32>
    %5 = tpu.matmul %1, %4, %cst {dimension_numbers = #tpu.dot_dimension_numbers<[1], [0], [0], [1], [0, 0, 1, 1], [], []>} : vector<8x4xf32>, vector<4x32xf32>, vector<8x32xf32> -> vector<8x32xf32>
    %c0_7 = arith.constant 0 : index
    %c0_8 = arith.constant 0 : index
    %6 = vector.load %arg5[%c0_7, %c0_8] : memref<1x32xf32, #tpu.memory_space<vmem>>, vector<1x32xf32>
    %7 = vector.broadcast %6 : vector<1x32xf32> to vector<8x32xf32>
    %8 = arith.addf %5, %7 : vector<8x32xf32>
    %9 = math.tanh %8 : vector<8x32xf32>
    %c0_9 = arith.constant 0 : index
    %c0_10 = arith.constant 0 : index
    %10 = vector.load %arg6[%c0_9, %c0_10] : memref<32x32xf32, #tpu.memory_space<vmem>>, vector<32x32xf32>
    %cst_11 = arith.constant dense<0.000000e+00> : vector<8x32xf32>
    %11 = tpu.matmul %9, %10, %cst_11 {dimension_numbers = #tpu.dot_dimension_numbers<[1], [0], [0], [1], [0, 0, 1, 1], [], []>} : vector<8x32xf32>, vector<32x32xf32>, vector<8x32xf32> -> vector<8x32xf32>
    %c0_12 = arith.constant 0 : index
    %c0_13 = arith.constant 0 : index
    %12 = vector.load %arg7[%c0_12, %c0_13] : memref<1x32xf32, #tpu.memory_space<vmem>>, vector<1x32xf32>
    %13 = vector.broadcast %12 : vector<1x32xf32> to vector<8x32xf32>
    %14 = arith.addf %11, %13 : vector<8x32xf32>
    %c0_14 = arith.constant 0 : index
    %c0_15 = arith.constant 0 : index
    %15 = vector.load %arg3[%c0_14, %c0_15] : memref<8x32xf32, #tpu.memory_space<vmem>>, vector<8x32xf32>
    %16 = arith.addf %14, %15 : vector<8x32xf32>
    %17 = tpu.iota {dimensions = array<i32: 0>} : vector<8x8xi32>
    %18 = tpu.iota {dimensions = array<i32: 1>} : vector<8x8xi32>
    %19 = arith.cmpi sgt, %18, %17 : vector<8x8xi32>
    %c0_16 = arith.constant 0 : index
    %c0_17 = arith.constant 0 : index
    %c0_18 = arith.constant 0 : index
    %20 = vector.load %arg8[%c0_16, %c0_17, %c0_18] : memref<2x32x96xf32, #tpu.memory_space<vmem>>, vector<1x32x96xf32>
    %21 = vector.shape_cast %20 : vector<1x32x96xf32> to vector<32x96xf32>
    %c0_19 = arith.constant 0 : index
    %c0_20 = arith.constant 0 : index
    %c0_21 = arith.constant 0 : index
    %22 = vector.load %arg9[%c0_19, %c0_20, %c0_21] : memref<2x1x96xf32, #tpu.memory_space<vmem>>, vector<1x1x96xf32>
    %23 = vector.shape_cast %22 : vector<1x1x96xf32> to vector<1x96xf32>
    %c0_22 = arith.constant 0 : index
    %c0_23 = arith.constant 0 : index
    %c0_24 = arith.constant 0 : index
    %24 = vector.load %arg10[%c0_22, %c0_23, %c0_24] : memref<2x32x32xf32, #tpu.memory_space<vmem>>, vector<1x32x32xf32>
    %25 = vector.shape_cast %24 : vector<1x32x32xf32> to vector<32x32xf32>
    %c0_25 = arith.constant 0 : index
    %c0_26 = arith.constant 0 : index
    %c0_27 = arith.constant 0 : index
    %26 = vector.load %arg11[%c0_25, %c0_26, %c0_27] : memref<2x1x32xf32, #tpu.memory_space<vmem>>, vector<1x1x32xf32>
    %27 = vector.shape_cast %26 : vector<1x1x32xf32> to vector<1x32xf32>
    %c0_28 = arith.constant 0 : index
    %c0_29 = arith.constant 0 : index
    %c0_30 = arith.constant 0 : index
    %28 = vector.load %arg12[%c0_28, %c0_29, %c0_30] : memref<2x32x96xf32, #tpu.memory_space<vmem>>, vector<1x32x96xf32>
    %29 = vector.shape_cast %28 : vector<1x32x96xf32> to vector<32x96xf32>
    %c0_31 = arith.constant 0 : index
    %c0_32 = arith.constant 0 : index
    %c0_33 = arith.constant 0 : index
    %30 = vector.load %arg13[%c0_31, %c0_32, %c0_33] : memref<2x1x96xf32, #tpu.memory_space<vmem>>, vector<1x1x96xf32>
    %31 = vector.shape_cast %30 : vector<1x1x96xf32> to vector<1x96xf32>
    %c0_34 = arith.constant 0 : index
    %c0_35 = arith.constant 0 : index
    %c0_36 = arith.constant 0 : index
    %32 = vector.load %arg14[%c0_34, %c0_35, %c0_36] : memref<2x32x32xf32, #tpu.memory_space<vmem>>, vector<1x32x32xf32>
    %33 = vector.shape_cast %32 : vector<1x32x32xf32> to vector<32x32xf32>
    %c0_37 = arith.constant 0 : index
    %c0_38 = arith.constant 0 : index
    %c0_39 = arith.constant 0 : index
    %34 = vector.load %arg15[%c0_37, %c0_38, %c0_39] : memref<2x1x32xf32, #tpu.memory_space<vmem>>, vector<1x1x32xf32>
    %35 = vector.shape_cast %34 : vector<1x1x32xf32> to vector<1x32xf32>
    %c0_40 = arith.constant 0 : index
    %c0_41 = arith.constant 0 : index
    %c0_42 = arith.constant 0 : index
    %36 = vector.load %arg16[%c0_40, %c0_41, %c0_42] : memref<2x32x64xf32, #tpu.memory_space<vmem>>, vector<1x32x64xf32>
    %37 = vector.shape_cast %36 : vector<1x32x64xf32> to vector<32x64xf32>
    %c0_43 = arith.constant 0 : index
    %c0_44 = arith.constant 0 : index
    %c0_45 = arith.constant 0 : index
    %38 = vector.load %arg17[%c0_43, %c0_44, %c0_45] : memref<2x1x64xf32, #tpu.memory_space<vmem>>, vector<1x1x64xf32>
    %39 = vector.shape_cast %38 : vector<1x1x64xf32> to vector<1x64xf32>
    %c0_46 = arith.constant 0 : index
    %c0_47 = arith.constant 0 : index
    %c0_48 = arith.constant 0 : index
    %40 = vector.load %arg18[%c0_46, %c0_47, %c0_48] : memref<2x64x32xf32, #tpu.memory_space<vmem>>, vector<1x64x32xf32>
    %41 = vector.shape_cast %40 : vector<1x64x32xf32> to vector<64x32xf32>
    %c0_49 = arith.constant 0 : index
    %c0_50 = arith.constant 0 : index
    %c0_51 = arith.constant 0 : index
    %42 = vector.load %arg19[%c0_49, %c0_50, %c0_51] : memref<2x1x32xf32, #tpu.memory_space<vmem>>, vector<1x1x32xf32>
    %43 = vector.shape_cast %42 : vector<1x1x32xf32> to vector<1x32xf32>
    %c0_52 = arith.constant 0 : index
    %c0_53 = arith.constant 0 : index
    %c0_54 = arith.constant 0 : index
    %44 = vector.load %arg20[%c0_52, %c0_53, %c0_54] : memref<2x3x32xf32, #tpu.memory_space<vmem>>, vector<1x3x32xf32>
    %45 = vector.shape_cast %44 : vector<1x3x32xf32> to vector<3x32xf32>
    %c0_55 = arith.constant 0 : index
    %c0_56 = arith.constant 0 : index
    %c0_57 = arith.constant 0 : index
    %46 = vector.load %arg21[%c0_55, %c0_56, %c0_57] : memref<2x3x32xf32, #tpu.memory_space<vmem>>, vector<1x3x32xf32>
    %47 = vector.shape_cast %46 : vector<1x3x32xf32> to vector<3x32xf32>
    %cst_58 = arith.constant dense<0.000000e+00> : vector<8x96xf32>
    %48 = tpu.matmul %16, %21, %cst_58 {dimension_numbers = #tpu.dot_dimension_numbers<[1], [0], [0], [1], [0, 0, 1, 1], [], []>} : vector<8x32xf32>, vector<32x96xf32>, vector<8x96xf32> -> vector<8x96xf32>
    %49 = vector.broadcast %23 : vector<1x96xf32> to vector<8x96xf32>
    %50 = arith.addf %48, %49 : vector<8x96xf32>
    %51 = vector.extract_strided_slice %50 {offsets = [0, 0], sizes = [8, 32], strides = [1, 1]} : vector<8x96xf32> to vector<8x32xf32>
    %52 = vector.extract_strided_slice %50 {offsets = [0, 32], sizes = [8, 32], strides = [1, 1]} : vector<8x96xf32> to vector<8x32xf32>
    %53 = vector.extract_strided_slice %50 {offsets = [0, 64], sizes = [8, 32], strides = [1, 1]} : vector<8x96xf32> to vector<8x32xf32>
    %cst_59 = arith.constant 0.000000e+00 : f32
    %54 = vector.broadcast %cst_59 : f32 to vector<8x32xf32>
    %55 = vector.extract_strided_slice %51 {offsets = [0, 0], sizes = [8, 8], strides = [1, 1]} : vector<8x32xf32> to vector<8x8xf32>
    %56 = vector.extract_strided_slice %52 {offsets = [0, 0], sizes = [8, 8], strides = [1, 1]} : vector<8x32xf32> to vector<8x8xf32>
    %57 = vector.extract_strided_slice %53 {offsets = [0, 0], sizes = [8, 8], strides = [1, 1]} : vector<8x32xf32> to vector<8x8xf32>
    %cst_60 = arith.constant dense<0.000000e+00> : vector<8x8xf32>
    %58 = tpu.matmul %55, %56, %cst_60 {dimension_numbers = #tpu.dot_dimension_numbers<[1], [1], [0], [0], [0, 0, 1, 0], [], []>} : vector<8x8xf32>, vector<8x8xf32>, vector<8x8xf32> -> vector<8x8xf32>
    %cst_61 = arith.constant 0.353553385 : f32
    %59 = vector.broadcast %cst_61 : f32 to vector<8x8xf32>
    %60 = arith.mulf %58, %59 : vector<8x8xf32>
    %cst_62 = arith.constant -1.000000e+30 : f32
    %61 = vector.broadcast %cst_62 : f32 to vector<8x8xf32>
    %62 = arith.select %19, %61, %60 : vector<8x8xi1>, vector<8x8xf32>
    %cst_63 = arith.constant dense<0xFF800000> : vector<8xf32>
    %63 = vector.multi_reduction <maximumf>, %62, %cst_63 [1] : vector<8x8xf32> to vector<8xf32>
    %64 = vector.shape_cast %63 : vector<8xf32> to vector<8x1xf32>
    %65 = vector.broadcast %64 : vector<8x1xf32> to vector<8x8xf32>
    %66 = arith.subf %62, %65 : vector<8x8xf32>
    %67 = math.exp %66 : vector<8x8xf32>
    %cst_64 = arith.constant dense<0.000000e+00> : vector<8xf32>
    %68 = vector.multi_reduction <add>, %67, %cst_64 [1] : vector<8x8xf32> to vector<8xf32>
    %69 = vector.shape_cast %68 : vector<8xf32> to vector<8x1xf32>
    %cst_65 = arith.constant dense<0.000000e+00> : vector<8x8xf32>
    %70 = tpu.matmul %67, %57, %cst_65 {dimension_numbers = #tpu.dot_dimension_numbers<[1], [0], [0], [1], [0, 0, 1, 1], [], []>} : vector<8x8xf32>, vector<8x8xf32>, vector<8x8xf32> -> vector<8x8xf32>
    %71 = tpu.reciprocal %69 {approx = true} : vector<8x1xf32> -> vector<8x1xf32>
    %72 = vector.broadcast %71 : vector<8x1xf32> to vector<8x8xf32>
    %73 = arith.mulf %70, %72 : vector<8x8xf32>
    %74 = vector.extract_strided_slice %25 {offsets = [0, 0], sizes = [8, 32], strides = [1, 1]} : vector<32x32xf32> to vector<8x32xf32>
    %cst_66 = arith.constant dense<0.000000e+00> : vector<8x32xf32>
    %75 = tpu.matmul %73, %74, %cst_66 {dimension_numbers = #tpu.dot_dimension_numbers<[1], [0], [0], [1], [0, 0, 1, 1], [], []>} : vector<8x8xf32>, vector<8x32xf32>, vector<8x32xf32> -> vector<8x32xf32>
    %76 = arith.addf %54, %75 : vector<8x32xf32>
    %77 = vector.extract_strided_slice %51 {offsets = [0, 8], sizes = [8, 8], strides = [1, 1]} : vector<8x32xf32> to vector<8x8xf32>
    %78 = vector.extract_strided_slice %52 {offsets = [0, 8], sizes = [8, 8], strides = [1, 1]} : vector<8x32xf32> to vector<8x8xf32>
    %79 = vector.extract_strided_slice %53 {offsets = [0, 8], sizes = [8, 8], strides = [1, 1]} : vector<8x32xf32> to vector<8x8xf32>
    %cst_67 = arith.constant dense<0.000000e+00> : vector<8x8xf32>
    %80 = tpu.matmul %77, %78, %cst_67 {dimension_numbers = #tpu.dot_dimension_numbers<[1], [1], [0], [0], [0, 0, 1, 0], [], []>} : vector<8x8xf32>, vector<8x8xf32>, vector<8x8xf32> -> vector<8x8xf32>
    %cst_68 = arith.constant 0.353553385 : f32
    %81 = vector.broadcast %cst_68 : f32 to vector<8x8xf32>
    %82 = arith.mulf %80, %81 : vector<8x8xf32>
    %cst_69 = arith.constant -1.000000e+30 : f32
    %83 = vector.broadcast %cst_69 : f32 to vector<8x8xf32>
    %84 = arith.select %19, %83, %82 : vector<8x8xi1>, vector<8x8xf32>
    %cst_70 = arith.constant dense<0xFF800000> : vector<8xf32>
    %85 = vector.multi_reduction <maximumf>, %84, %cst_70 [1] : vector<8x8xf32> to vector<8xf32>
    %86 = vector.shape_cast %85 : vector<8xf32> to vector<8x1xf32>
    %87 = vector.broadcast %86 : vector<8x1xf32> to vector<8x8xf32>
    %88 = arith.subf %84, %87 : vector<8x8xf32>
    %89 = math.exp %88 : vector<8x8xf32>
    %cst_71 = arith.constant dense<0.000000e+00> : vector<8xf32>
    %90 = vector.multi_reduction <add>, %89, %cst_71 [1] : vector<8x8xf32> to vector<8xf32>
    %91 = vector.shape_cast %90 : vector<8xf32> to vector<8x1xf32>
    %cst_72 = arith.constant dense<0.000000e+00> : vector<8x8xf32>
    %92 = tpu.matmul %89, %79, %cst_72 {dimension_numbers = #tpu.dot_dimension_numbers<[1], [0], [0], [1], [0, 0, 1, 1], [], []>} : vector<8x8xf32>, vector<8x8xf32>, vector<8x8xf32> -> vector<8x8xf32>
    %93 = tpu.reciprocal %91 {approx = true} : vector<8x1xf32> -> vector<8x1xf32>
    %94 = vector.broadcast %93 : vector<8x1xf32> to vector<8x8xf32>
    %95 = arith.mulf %92, %94 : vector<8x8xf32>
    %96 = vector.extract_strided_slice %25 {offsets = [8, 0], sizes = [8, 32], strides = [1, 1]} : vector<32x32xf32> to vector<8x32xf32>
    %cst_73 = arith.constant dense<0.000000e+00> : vector<8x32xf32>
    %97 = tpu.matmul %95, %96, %cst_73 {dimension_numbers = #tpu.dot_dimension_numbers<[1], [0], [0], [1], [0, 0, 1, 1], [], []>} : vector<8x8xf32>, vector<8x32xf32>, vector<8x32xf32> -> vector<8x32xf32>
    %98 = arith.addf %76, %97 : vector<8x32xf32>
    %99 = vector.extract_strided_slice %51 {offsets = [0, 16], sizes = [8, 8], strides = [1, 1]} : vector<8x32xf32> to vector<8x8xf32>
    %100 = vector.extract_strided_slice %52 {offsets = [0, 16], sizes = [8, 8], strides = [1, 1]} : vector<8x32xf32> to vector<8x8xf32>
    %101 = vector.extract_strided_slice %53 {offsets = [0, 16], sizes = [8, 8], strides = [1, 1]} : vector<8x32xf32> to vector<8x8xf32>
    %cst_74 = arith.constant dense<0.000000e+00> : vector<8x8xf32>
    %102 = tpu.matmul %99, %100, %cst_74 {dimension_numbers = #tpu.dot_dimension_numbers<[1], [1], [0], [0], [0, 0, 1, 0], [], []>} : vector<8x8xf32>, vector<8x8xf32>, vector<8x8xf32> -> vector<8x8xf32>
    %cst_75 = arith.constant 0.353553385 : f32
    %103 = vector.broadcast %cst_75 : f32 to vector<8x8xf32>
    %104 = arith.mulf %102, %103 : vector<8x8xf32>
    %cst_76 = arith.constant -1.000000e+30 : f32
    %105 = vector.broadcast %cst_76 : f32 to vector<8x8xf32>
    %106 = arith.select %19, %105, %104 : vector<8x8xi1>, vector<8x8xf32>
    %cst_77 = arith.constant dense<0xFF800000> : vector<8xf32>
    %107 = vector.multi_reduction <maximumf>, %106, %cst_77 [1] : vector<8x8xf32> to vector<8xf32>
    %108 = vector.shape_cast %107 : vector<8xf32> to vector<8x1xf32>
    %109 = vector.broadcast %108 : vector<8x1xf32> to vector<8x8xf32>
    %110 = arith.subf %106, %109 : vector<8x8xf32>
    %111 = math.exp %110 : vector<8x8xf32>
    %cst_78 = arith.constant dense<0.000000e+00> : vector<8xf32>
    %112 = vector.multi_reduction <add>, %111, %cst_78 [1] : vector<8x8xf32> to vector<8xf32>
    %113 = vector.shape_cast %112 : vector<8xf32> to vector<8x1xf32>
    %cst_79 = arith.constant dense<0.000000e+00> : vector<8x8xf32>
    %114 = tpu.matmul %111, %101, %cst_79 {dimension_numbers = #tpu.dot_dimension_numbers<[1], [0], [0], [1], [0, 0, 1, 1], [], []>} : vector<8x8xf32>, vector<8x8xf32>, vector<8x8xf32> -> vector<8x8xf32>
    %115 = tpu.reciprocal %113 {approx = true} : vector<8x1xf32> -> vector<8x1xf32>
    %116 = vector.broadcast %115 : vector<8x1xf32> to vector<8x8xf32>
    %117 = arith.mulf %114, %116 : vector<8x8xf32>
    %118 = vector.extract_strided_slice %25 {offsets = [16, 0], sizes = [8, 32], strides = [1, 1]} : vector<32x32xf32> to vector<8x32xf32>
    %cst_80 = arith.constant dense<0.000000e+00> : vector<8x32xf32>
    %119 = tpu.matmul %117, %118, %cst_80 {dimension_numbers = #tpu.dot_dimension_numbers<[1], [0], [0], [1], [0, 0, 1, 1], [], []>} : vector<8x8xf32>, vector<8x32xf32>, vector<8x32xf32> -> vector<8x32xf32>
    %120 = arith.addf %98, %119 : vector<8x32xf32>
    %121 = vector.extract_strided_slice %51 {offsets = [0, 24], sizes = [8, 8], strides = [1, 1]} : vector<8x32xf32> to vector<8x8xf32>
    %122 = vector.extract_strided_slice %52 {offsets = [0, 24], sizes = [8, 8], strides = [1, 1]} : vector<8x32xf32> to vector<8x8xf32>
    %123 = vector.extract_strided_slice %53 {offsets = [0, 24], sizes = [8, 8], strides = [1, 1]} : vector<8x32xf32> to vector<8x8xf32>
    %cst_81 = arith.constant dense<0.000000e+00> : vector<8x8xf32>
    %124 = tpu.matmul %121, %122, %cst_81 {dimension_numbers = #tpu.dot_dimension_numbers<[1], [1], [0], [0], [0, 0, 1, 0], [], []>} : vector<8x8xf32>, vector<8x8xf32>, vector<8x8xf32> -> vector<8x8xf32>
    %cst_82 = arith.constant 0.353553385 : f32
    %125 = vector.broadcast %cst_82 : f32 to vector<8x8xf32>
    %126 = arith.mulf %124, %125 : vector<8x8xf32>
    %cst_83 = arith.constant -1.000000e+30 : f32
    %127 = vector.broadcast %cst_83 : f32 to vector<8x8xf32>
    %128 = arith.select %19, %127, %126 : vector<8x8xi1>, vector<8x8xf32>
    %cst_84 = arith.constant dense<0xFF800000> : vector<8xf32>
    %129 = vector.multi_reduction <maximumf>, %128, %cst_84 [1] : vector<8x8xf32> to vector<8xf32>
    %130 = vector.shape_cast %129 : vector<8xf32> to vector<8x1xf32>
    %131 = vector.broadcast %130 : vector<8x1xf32> to vector<8x8xf32>
    %132 = arith.subf %128, %131 : vector<8x8xf32>
    %133 = math.exp %132 : vector<8x8xf32>
    %cst_85 = arith.constant dense<0.000000e+00> : vector<8xf32>
    %134 = vector.multi_reduction <add>, %133, %cst_85 [1] : vector<8x8xf32> to vector<8xf32>
    %135 = vector.shape_cast %134 : vector<8xf32> to vector<8x1xf32>
    %cst_86 = arith.constant dense<0.000000e+00> : vector<8x8xf32>
    %136 = tpu.matmul %133, %123, %cst_86 {dimension_numbers = #tpu.dot_dimension_numbers<[1], [0], [0], [1], [0, 0, 1, 1], [], []>} : vector<8x8xf32>, vector<8x8xf32>, vector<8x8xf32> -> vector<8x8xf32>
    %137 = tpu.reciprocal %135 {approx = true} : vector<8x1xf32> -> vector<8x1xf32>
    %138 = vector.broadcast %137 : vector<8x1xf32> to vector<8x8xf32>
    %139 = arith.mulf %136, %138 : vector<8x8xf32>
    %140 = vector.extract_strided_slice %25 {offsets = [24, 0], sizes = [8, 32], strides = [1, 1]} : vector<32x32xf32> to vector<8x32xf32>
    %cst_87 = arith.constant dense<0.000000e+00> : vector<8x32xf32>
    %141 = tpu.matmul %139, %140, %cst_87 {dimension_numbers = #tpu.dot_dimension_numbers<[1], [0], [0], [1], [0, 0, 1, 1], [], []>} : vector<8x8xf32>, vector<8x32xf32>, vector<8x32xf32> -> vector<8x32xf32>
    %142 = arith.addf %120, %141 : vector<8x32xf32>
    %143 = vector.broadcast %27 : vector<1x32xf32> to vector<8x32xf32>
    %144 = arith.addf %142, %143 : vector<8x32xf32>
    %145 = arith.addf %16, %144 : vector<8x32xf32>
    %146 = vector.extract_strided_slice %45 {offsets = [0, 0], sizes = [1, 32], strides = [1, 1]} : vector<3x32xf32> to vector<1x32xf32>
    %147 = vector.extract_strided_slice %47 {offsets = [0, 0], sizes = [1, 32], strides = [1, 1]} : vector<3x32xf32> to vector<1x32xf32>
    %cst_88 = arith.constant dense<0.000000e+00> : vector<8xf32>
    %148 = vector.multi_reduction <add>, %145, %cst_88 [1] : vector<8x32xf32> to vector<8xf32>
    %149 = vector.shape_cast %148 : vector<8xf32> to vector<8x1xf32>
    %cst_89 = arith.constant 3.200000e+01 : f32
    %150 = vector.broadcast %cst_89 : f32 to vector<8x1xf32>
    %151 = arith.divf %149, %150 : vector<8x1xf32>
    %152 = vector.broadcast %151 : vector<8x1xf32> to vector<8x32xf32>
    %153 = arith.subf %145, %152 : vector<8x32xf32>
    %154 = arith.mulf %153, %153 : vector<8x32xf32>
    %cst_90 = arith.constant dense<0.000000e+00> : vector<8xf32>
    %155 = vector.multi_reduction <add>, %154, %cst_90 [1] : vector<8x32xf32> to vector<8xf32>
    %156 = vector.shape_cast %155 : vector<8xf32> to vector<8x1xf32>
    %cst_91 = arith.constant 3.200000e+01 : f32
    %157 = vector.broadcast %cst_91 : f32 to vector<8x1xf32>
    %158 = arith.divf %156, %157 : vector<8x1xf32>
    %cst_92 = arith.constant 9.99999974E-6 : f32
    %159 = vector.broadcast %cst_92 : f32 to vector<8x1xf32>
    %160 = arith.addf %158, %159 : vector<8x1xf32>
    %161 = math.rsqrt %160 : vector<8x1xf32>
    %162 = vector.broadcast %161 : vector<8x1xf32> to vector<8x32xf32>
    %163 = arith.mulf %153, %162 : vector<8x32xf32>
    %164 = vector.broadcast %146 : vector<1x32xf32> to vector<8x32xf32>
    %165 = arith.mulf %163, %164 : vector<8x32xf32>
    %166 = vector.broadcast %147 : vector<1x32xf32> to vector<8x32xf32>
    %167 = arith.addf %165, %166 : vector<8x32xf32>
    %168 = vector.extract_strided_slice %29 {offsets = [0, 0], sizes = [32, 32], strides = [1, 1]} : vector<32x96xf32> to vector<32x32xf32>
    %cst_93 = arith.constant dense<0.000000e+00> : vector<8x32xf32>
    %169 = tpu.matmul %167, %168, %cst_93 {dimension_numbers = #tpu.dot_dimension_numbers<[1], [0], [0], [1], [0, 0, 1, 1], [], []>} : vector<8x32xf32>, vector<32x32xf32>, vector<8x32xf32> -> vector<8x32xf32>
    %170 = vector.extract_strided_slice %31 {offsets = [0, 0], sizes = [1, 32], strides = [1, 1]} : vector<1x96xf32> to vector<1x32xf32>
    %171 = vector.broadcast %170 : vector<1x32xf32> to vector<8x32xf32>
    %172 = arith.addf %169, %171 : vector<8x32xf32>
    %173 = vector.extract_strided_slice %29 {offsets = [0, 32], sizes = [32, 64], strides = [1, 1]} : vector<32x96xf32> to vector<32x64xf32>
    %cst_94 = arith.constant dense<0.000000e+00> : vector<8x64xf32>
    %174 = tpu.matmul %3, %173, %cst_94 {dimension_numbers = #tpu.dot_dimension_numbers<[1], [0], [0], [1], [0, 0, 1, 1], [], []>} : vector<8x32xf32>, vector<32x64xf32>, vector<8x64xf32> -> vector<8x64xf32>
    %175 = vector.extract_strided_slice %31 {offsets = [0, 32], sizes = [1, 64], strides = [1, 1]} : vector<1x96xf32> to vector<1x64xf32>
    %176 = vector.broadcast %175 : vector<1x64xf32> to vector<8x64xf32>
    %177 = arith.addf %174, %176 : vector<8x64xf32>
    %178 = vector.extract_strided_slice %177 {offsets = [0, 0], sizes = [8, 32], strides = [1, 1]} : vector<8x64xf32> to vector<8x32xf32>
    %179 = vector.extract_strided_slice %177 {offsets = [0, 32], sizes = [8, 32], strides = [1, 1]} : vector<8x64xf32> to vector<8x32xf32>
    %cst_95 = arith.constant 0.000000e+00 : f32
    %180 = vector.broadcast %cst_95 : f32 to vector<8x32xf32>
    %181 = vector.extract_strided_slice %172 {offsets = [0, 0], sizes = [8, 8], strides = [1, 1]} : vector<8x32xf32> to vector<8x8xf32>
    %182 = vector.extract_strided_slice %178 {offsets = [0, 0], sizes = [8, 8], strides = [1, 1]} : vector<8x32xf32> to vector<8x8xf32>
    %183 = vector.extract_strided_slice %179 {offsets = [0, 0], sizes = [8, 8], strides = [1, 1]} : vector<8x32xf32> to vector<8x8xf32>
    %cst_96 = arith.constant dense<0.000000e+00> : vector<8x8xf32>
    %184 = tpu.matmul %181, %182, %cst_96 {dimension_numbers = #tpu.dot_dimension_numbers<[1], [1], [0], [0], [0, 0, 1, 0], [], []>} : vector<8x8xf32>, vector<8x8xf32>, vector<8x8xf32> -> vector<8x8xf32>
    %cst_97 = arith.constant 0.353553385 : f32
    %185 = vector.broadcast %cst_97 : f32 to vector<8x8xf32>
    %186 = arith.mulf %184, %185 : vector<8x8xf32>
    %cst_98 = arith.constant dense<0xFF800000> : vector<8xf32>
    %187 = vector.multi_reduction <maximumf>, %186, %cst_98 [1] : vector<8x8xf32> to vector<8xf32>
    %188 = vector.shape_cast %187 : vector<8xf32> to vector<8x1xf32>
    %189 = vector.broadcast %188 : vector<8x1xf32> to vector<8x8xf32>
    %190 = arith.subf %186, %189 : vector<8x8xf32>
    %191 = math.exp %190 : vector<8x8xf32>
    %cst_99 = arith.constant dense<0.000000e+00> : vector<8xf32>
    %192 = vector.multi_reduction <add>, %191, %cst_99 [1] : vector<8x8xf32> to vector<8xf32>
    %193 = vector.shape_cast %192 : vector<8xf32> to vector<8x1xf32>
    %cst_100 = arith.constant dense<0.000000e+00> : vector<8x8xf32>
    %194 = tpu.matmul %191, %183, %cst_100 {dimension_numbers = #tpu.dot_dimension_numbers<[1], [0], [0], [1], [0, 0, 1, 1], [], []>} : vector<8x8xf32>, vector<8x8xf32>, vector<8x8xf32> -> vector<8x8xf32>
    %195 = tpu.reciprocal %193 {approx = true} : vector<8x1xf32> -> vector<8x1xf32>
    %196 = vector.broadcast %195 : vector<8x1xf32> to vector<8x8xf32>
    %197 = arith.mulf %194, %196 : vector<8x8xf32>
    %198 = vector.extract_strided_slice %33 {offsets = [0, 0], sizes = [8, 32], strides = [1, 1]} : vector<32x32xf32> to vector<8x32xf32>
    %cst_101 = arith.constant dense<0.000000e+00> : vector<8x32xf32>
    %199 = tpu.matmul %197, %198, %cst_101 {dimension_numbers = #tpu.dot_dimension_numbers<[1], [0], [0], [1], [0, 0, 1, 1], [], []>} : vector<8x8xf32>, vector<8x32xf32>, vector<8x32xf32> -> vector<8x32xf32>
    %200 = arith.addf %180, %199 : vector<8x32xf32>
    %201 = vector.extract_strided_slice %172 {offsets = [0, 8], sizes = [8, 8], strides = [1, 1]} : vector<8x32xf32> to vector<8x8xf32>
    %202 = vector.extract_strided_slice %178 {offsets = [0, 8], sizes = [8, 8], strides = [1, 1]} : vector<8x32xf32> to vector<8x8xf32>
    %203 = vector.extract_strided_slice %179 {offsets = [0, 8], sizes = [8, 8], strides = [1, 1]} : vector<8x32xf32> to vector<8x8xf32>
    %cst_102 = arith.constant dense<0.000000e+00> : vector<8x8xf32>
    %204 = tpu.matmul %201, %202, %cst_102 {dimension_numbers = #tpu.dot_dimension_numbers<[1], [1], [0], [0], [0, 0, 1, 0], [], []>} : vector<8x8xf32>, vector<8x8xf32>, vector<8x8xf32> -> vector<8x8xf32>
    %cst_103 = arith.constant 0.353553385 : f32
    %205 = vector.broadcast %cst_103 : f32 to vector<8x8xf32>
    %206 = arith.mulf %204, %205 : vector<8x8xf32>
    %cst_104 = arith.constant dense<0xFF800000> : vector<8xf32>
    %207 = vector.multi_reduction <maximumf>, %206, %cst_104 [1] : vector<8x8xf32> to vector<8xf32>
    %208 = vector.shape_cast %207 : vector<8xf32> to vector<8x1xf32>
    %209 = vector.broadcast %208 : vector<8x1xf32> to vector<8x8xf32>
    %210 = arith.subf %206, %209 : vector<8x8xf32>
    %211 = math.exp %210 : vector<8x8xf32>
    %cst_105 = arith.constant dense<0.000000e+00> : vector<8xf32>
    %212 = vector.multi_reduction <add>, %211, %cst_105 [1] : vector<8x8xf32> to vector<8xf32>
    %213 = vector.shape_cast %212 : vector<8xf32> to vector<8x1xf32>
    %cst_106 = arith.constant dense<0.000000e+00> : vector<8x8xf32>
    %214 = tpu.matmul %211, %203, %cst_106 {dimension_numbers = #tpu.dot_dimension_numbers<[1], [0], [0], [1], [0, 0, 1, 1], [], []>} : vector<8x8xf32>, vector<8x8xf32>, vector<8x8xf32> -> vector<8x8xf32>
    %215 = tpu.reciprocal %213 {approx = true} : vector<8x1xf32> -> vector<8x1xf32>
    %216 = vector.broadcast %215 : vector<8x1xf32> to vector<8x8xf32>
    %217 = arith.mulf %214, %216 : vector<8x8xf32>
    %218 = vector.extract_strided_slice %33 {offsets = [8, 0], sizes = [8, 32], strides = [1, 1]} : vector<32x32xf32> to vector<8x32xf32>
    %cst_107 = arith.constant dense<0.000000e+00> : vector<8x32xf32>
    %219 = tpu.matmul %217, %218, %cst_107 {dimension_numbers = #tpu.dot_dimension_numbers<[1], [0], [0], [1], [0, 0, 1, 1], [], []>} : vector<8x8xf32>, vector<8x32xf32>, vector<8x32xf32> -> vector<8x32xf32>
    %220 = arith.addf %200, %219 : vector<8x32xf32>
    %221 = vector.extract_strided_slice %172 {offsets = [0, 16], sizes = [8, 8], strides = [1, 1]} : vector<8x32xf32> to vector<8x8xf32>
    %222 = vector.extract_strided_slice %178 {offsets = [0, 16], sizes = [8, 8], strides = [1, 1]} : vector<8x32xf32> to vector<8x8xf32>
    %223 = vector.extract_strided_slice %179 {offsets = [0, 16], sizes = [8, 8], strides = [1, 1]} : vector<8x32xf32> to vector<8x8xf32>
    %cst_108 = arith.constant dense<0.000000e+00> : vector<8x8xf32>
    %224 = tpu.matmul %221, %222, %cst_108 {dimension_numbers = #tpu.dot_dimension_numbers<[1], [1], [0], [0], [0, 0, 1, 0], [], []>} : vector<8x8xf32>, vector<8x8xf32>, vector<8x8xf32> -> vector<8x8xf32>
    %cst_109 = arith.constant 0.353553385 : f32
    %225 = vector.broadcast %cst_109 : f32 to vector<8x8xf32>
    %226 = arith.mulf %224, %225 : vector<8x8xf32>
    %cst_110 = arith.constant dense<0xFF800000> : vector<8xf32>
    %227 = vector.multi_reduction <maximumf>, %226, %cst_110 [1] : vector<8x8xf32> to vector<8xf32>
    %228 = vector.shape_cast %227 : vector<8xf32> to vector<8x1xf32>
    %229 = vector.broadcast %228 : vector<8x1xf32> to vector<8x8xf32>
    %230 = arith.subf %226, %229 : vector<8x8xf32>
    %231 = math.exp %230 : vector<8x8xf32>
    %cst_111 = arith.constant dense<0.000000e+00> : vector<8xf32>
    %232 = vector.multi_reduction <add>, %231, %cst_111 [1] : vector<8x8xf32> to vector<8xf32>
    %233 = vector.shape_cast %232 : vector<8xf32> to vector<8x1xf32>
    %cst_112 = arith.constant dense<0.000000e+00> : vector<8x8xf32>
    %234 = tpu.matmul %231, %223, %cst_112 {dimension_numbers = #tpu.dot_dimension_numbers<[1], [0], [0], [1], [0, 0, 1, 1], [], []>} : vector<8x8xf32>, vector<8x8xf32>, vector<8x8xf32> -> vector<8x8xf32>
    %235 = tpu.reciprocal %233 {approx = true} : vector<8x1xf32> -> vector<8x1xf32>
    %236 = vector.broadcast %235 : vector<8x1xf32> to vector<8x8xf32>
    %237 = arith.mulf %234, %236 : vector<8x8xf32>
    %238 = vector.extract_strided_slice %33 {offsets = [16, 0], sizes = [8, 32], strides = [1, 1]} : vector<32x32xf32> to vector<8x32xf32>
    %cst_113 = arith.constant dense<0.000000e+00> : vector<8x32xf32>
    %239 = tpu.matmul %237, %238, %cst_113 {dimension_numbers = #tpu.dot_dimension_numbers<[1], [0], [0], [1], [0, 0, 1, 1], [], []>} : vector<8x8xf32>, vector<8x32xf32>, vector<8x32xf32> -> vector<8x32xf32>
    %240 = arith.addf %220, %239 : vector<8x32xf32>
    %241 = vector.extract_strided_slice %172 {offsets = [0, 24], sizes = [8, 8], strides = [1, 1]} : vector<8x32xf32> to vector<8x8xf32>
    %242 = vector.extract_strided_slice %178 {offsets = [0, 24], sizes = [8, 8], strides = [1, 1]} : vector<8x32xf32> to vector<8x8xf32>
    %243 = vector.extract_strided_slice %179 {offsets = [0, 24], sizes = [8, 8], strides = [1, 1]} : vector<8x32xf32> to vector<8x8xf32>
    %cst_114 = arith.constant dense<0.000000e+00> : vector<8x8xf32>
    %244 = tpu.matmul %241, %242, %cst_114 {dimension_numbers = #tpu.dot_dimension_numbers<[1], [1], [0], [0], [0, 0, 1, 0], [], []>} : vector<8x8xf32>, vector<8x8xf32>, vector<8x8xf32> -> vector<8x8xf32>
    %cst_115 = arith.constant 0.353553385 : f32
    %245 = vector.broadcast %cst_115 : f32 to vector<8x8xf32>
    %246 = arith.mulf %244, %245 : vector<8x8xf32>
    %cst_116 = arith.constant dense<0xFF800000> : vector<8xf32>
    %247 = vector.multi_reduction <maximumf>, %246, %cst_116 [1] : vector<8x8xf32> to vector<8xf32>
    %248 = vector.shape_cast %247 : vector<8xf32> to vector<8x1xf32>
    %249 = vector.broadcast %248 : vector<8x1xf32> to vector<8x8xf32>
    %250 = arith.subf %246, %249 : vector<8x8xf32>
    %251 = math.exp %250 : vector<8x8xf32>
    %cst_117 = arith.constant dense<0.000000e+00> : vector<8xf32>
    %252 = vector.multi_reduction <add>, %251, %cst_117 [1] : vector<8x8xf32> to vector<8xf32>
    %253 = vector.shape_cast %252 : vector<8xf32> to vector<8x1xf32>
    %cst_118 = arith.constant dense<0.000000e+00> : vector<8x8xf32>
    %254 = tpu.matmul %251, %243, %cst_118 {dimension_numbers = #tpu.dot_dimension_numbers<[1], [0], [0], [1], [0, 0, 1, 1], [], []>} : vector<8x8xf32>, vector<8x8xf32>, vector<8x8xf32> -> vector<8x8xf32>
    %255 = tpu.reciprocal %253 {approx = true} : vector<8x1xf32> -> vector<8x1xf32>
    %256 = vector.broadcast %255 : vector<8x1xf32> to vector<8x8xf32>
    %257 = arith.mulf %254, %256 : vector<8x8xf32>
    %258 = vector.extract_strided_slice %33 {offsets = [24, 0], sizes = [8, 32], strides = [1, 1]} : vector<32x32xf32> to vector<8x32xf32>
    %cst_119 = arith.constant dense<0.000000e+00> : vector<8x32xf32>
    %259 = tpu.matmul %257, %258, %cst_119 {dimension_numbers = #tpu.dot_dimension_numbers<[1], [0], [0], [1], [0, 0, 1, 1], [], []>} : vector<8x8xf32>, vector<8x32xf32>, vector<8x32xf32> -> vector<8x32xf32>
    %260 = arith.addf %240, %259 : vector<8x32xf32>
    %261 = vector.broadcast %35 : vector<1x32xf32> to vector<8x32xf32>
    %262 = arith.addf %260, %261 : vector<8x32xf32>
    %263 = arith.addf %167, %262 : vector<8x32xf32>
    %264 = vector.extract_strided_slice %45 {offsets = [1, 0], sizes = [1, 32], strides = [1, 1]} : vector<3x32xf32> to vector<1x32xf32>
    %265 = vector.extract_strided_slice %47 {offsets = [1, 0], sizes = [1, 32], strides = [1, 1]} : vector<3x32xf32> to vector<1x32xf32>
    %cst_120 = arith.constant dense<0.000000e+00> : vector<8xf32>
    %266 = vector.multi_reduction <add>, %263, %cst_120 [1] : vector<8x32xf32> to vector<8xf32>
    %267 = vector.shape_cast %266 : vector<8xf32> to vector<8x1xf32>
    %cst_121 = arith.constant 3.200000e+01 : f32
    %268 = vector.broadcast %cst_121 : f32 to vector<8x1xf32>
    %269 = arith.divf %267, %268 : vector<8x1xf32>
    %270 = vector.broadcast %269 : vector<8x1xf32> to vector<8x32xf32>
    %271 = arith.subf %263, %270 : vector<8x32xf32>
    %272 = arith.mulf %271, %271 : vector<8x32xf32>
    %cst_122 = arith.constant dense<0.000000e+00> : vector<8xf32>
    %273 = vector.multi_reduction <add>, %272, %cst_122 [1] : vector<8x32xf32> to vector<8xf32>
    %274 = vector.shape_cast %273 : vector<8xf32> to vector<8x1xf32>
    %cst_123 = arith.constant 3.200000e+01 : f32
    %275 = vector.broadcast %cst_123 : f32 to vector<8x1xf32>
    %276 = arith.divf %274, %275 : vector<8x1xf32>
    %cst_124 = arith.constant 9.99999974E-6 : f32
    %277 = vector.broadcast %cst_124 : f32 to vector<8x1xf32>
    %278 = arith.addf %276, %277 : vector<8x1xf32>
    %279 = math.rsqrt %278 : vector<8x1xf32>
    %280 = vector.broadcast %279 : vector<8x1xf32> to vector<8x32xf32>
    %281 = arith.mulf %271, %280 : vector<8x32xf32>
    %282 = vector.broadcast %264 : vector<1x32xf32> to vector<8x32xf32>
    %283 = arith.mulf %281, %282 : vector<8x32xf32>
    %284 = vector.broadcast %265 : vector<1x32xf32> to vector<8x32xf32>
    %285 = arith.addf %283, %284 : vector<8x32xf32>
    %cst_125 = arith.constant dense<0.000000e+00> : vector<8x64xf32>
    %286 = tpu.matmul %285, %37, %cst_125 {dimension_numbers = #tpu.dot_dimension_numbers<[1], [0], [0], [1], [0, 0, 1, 1], [], []>} : vector<8x32xf32>, vector<32x64xf32>, vector<8x64xf32> -> vector<8x64xf32>
    %287 = vector.broadcast %39 : vector<1x64xf32> to vector<8x64xf32>
    %288 = arith.addf %286, %287 : vector<8x64xf32>
    %cst_126 = arith.constant 0.000000e+00 : f32
    %289 = vector.broadcast %cst_126 : f32 to vector<8x64xf32>
    %290 = arith.maximumf %288, %289 : vector<8x64xf32>
    %cst_127 = arith.constant dense<0.000000e+00> : vector<8x32xf32>
    %291 = tpu.matmul %290, %41, %cst_127 {dimension_numbers = #tpu.dot_dimension_numbers<[1], [0], [0], [1], [0, 0, 1, 1], [], []>} : vector<8x64xf32>, vector<64x32xf32>, vector<8x32xf32> -> vector<8x32xf32>
    %292 = vector.broadcast %43 : vector<1x32xf32> to vector<8x32xf32>
    %293 = arith.addf %291, %292 : vector<8x32xf32>
    %294 = arith.addf %285, %293 : vector<8x32xf32>
    %295 = vector.extract_strided_slice %45 {offsets = [2, 0], sizes = [1, 32], strides = [1, 1]} : vector<3x32xf32> to vector<1x32xf32>
    %296 = vector.extract_strided_slice %47 {offsets = [2, 0], sizes = [1, 32], strides = [1, 1]} : vector<3x32xf32> to vector<1x32xf32>
    %cst_128 = arith.constant dense<0.000000e+00> : vector<8xf32>
    %297 = vector.multi_reduction <add>, %294, %cst_128 [1] : vector<8x32xf32> to vector<8xf32>
    %298 = vector.shape_cast %297 : vector<8xf32> to vector<8x1xf32>
    %cst_129 = arith.constant 3.200000e+01 : f32
    %299 = vector.broadcast %cst_129 : f32 to vector<8x1xf32>
    %300 = arith.divf %298, %299 : vector<8x1xf32>
    %301 = vector.broadcast %300 : vector<8x1xf32> to vector<8x32xf32>
    %302 = arith.subf %294, %301 : vector<8x32xf32>
    %303 = arith.mulf %302, %302 : vector<8x32xf32>
    %cst_130 = arith.constant dense<0.000000e+00> : vector<8xf32>
    %304 = vector.multi_reduction <add>, %303, %cst_130 [1] : vector<8x32xf32> to vector<8xf32>
    %305 = vector.shape_cast %304 : vector<8xf32> to vector<8x1xf32>
    %cst_131 = arith.constant 3.200000e+01 : f32
    %306 = vector.broadcast %cst_131 : f32 to vector<8x1xf32>
    %307 = arith.divf %305, %306 : vector<8x1xf32>
    %cst_132 = arith.constant 9.99999974E-6 : f32
    %308 = vector.broadcast %cst_132 : f32 to vector<8x1xf32>
    %309 = arith.addf %307, %308 : vector<8x1xf32>
    %310 = math.rsqrt %309 : vector<8x1xf32>
    %311 = vector.broadcast %310 : vector<8x1xf32> to vector<8x32xf32>
    %312 = arith.mulf %302, %311 : vector<8x32xf32>
    %313 = vector.broadcast %295 : vector<1x32xf32> to vector<8x32xf32>
    %314 = arith.mulf %312, %313 : vector<8x32xf32>
    %315 = vector.broadcast %296 : vector<1x32xf32> to vector<8x32xf32>
    %316 = arith.addf %314, %315 : vector<8x32xf32>
    %c1 = arith.constant 1 : index
    %c0_133 = arith.constant 0 : index
    %c0_134 = arith.constant 0 : index
    %317 = vector.load %arg8[%c1, %c0_133, %c0_134] : memref<2x32x96xf32, #tpu.memory_space<vmem>>, vector<1x32x96xf32>
    %318 = vector.shape_cast %317 : vector<1x32x96xf32> to vector<32x96xf32>
    %c1_135 = arith.constant 1 : index
    %c0_136 = arith.constant 0 : index
    %c0_137 = arith.constant 0 : index
    %319 = vector.load %arg9[%c1_135, %c0_136, %c0_137] : memref<2x1x96xf32, #tpu.memory_space<vmem>>, vector<1x1x96xf32>
    %320 = vector.shape_cast %319 : vector<1x1x96xf32> to vector<1x96xf32>
    %c1_138 = arith.constant 1 : index
    %c0_139 = arith.constant 0 : index
    %c0_140 = arith.constant 0 : index
    %321 = vector.load %arg10[%c1_138, %c0_139, %c0_140] : memref<2x32x32xf32, #tpu.memory_space<vmem>>, vector<1x32x32xf32>
    %322 = vector.shape_cast %321 : vector<1x32x32xf32> to vector<32x32xf32>
    %c1_141 = arith.constant 1 : index
    %c0_142 = arith.constant 0 : index
    %c0_143 = arith.constant 0 : index
    %323 = vector.load %arg11[%c1_141, %c0_142, %c0_143] : memref<2x1x32xf32, #tpu.memory_space<vmem>>, vector<1x1x32xf32>
    %324 = vector.shape_cast %323 : vector<1x1x32xf32> to vector<1x32xf32>
    %c1_144 = arith.constant 1 : index
    %c0_145 = arith.constant 0 : index
    %c0_146 = arith.constant 0 : index
    %325 = vector.load %arg12[%c1_144, %c0_145, %c0_146] : memref<2x32x96xf32, #tpu.memory_space<vmem>>, vector<1x32x96xf32>
    %326 = vector.shape_cast %325 : vector<1x32x96xf32> to vector<32x96xf32>
    %c1_147 = arith.constant 1 : index
    %c0_148 = arith.constant 0 : index
    %c0_149 = arith.constant 0 : index
    %327 = vector.load %arg13[%c1_147, %c0_148, %c0_149] : memref<2x1x96xf32, #tpu.memory_space<vmem>>, vector<1x1x96xf32>
    %328 = vector.shape_cast %327 : vector<1x1x96xf32> to vector<1x96xf32>
    %c1_150 = arith.constant 1 : index
    %c0_151 = arith.constant 0 : index
    %c0_152 = arith.constant 0 : index
    %329 = vector.load %arg14[%c1_150, %c0_151, %c0_152] : memref<2x32x32xf32, #tpu.memory_space<vmem>>, vector<1x32x32xf32>
    %330 = vector.shape_cast %329 : vector<1x32x32xf32> to vector<32x32xf32>
    %c1_153 = arith.constant 1 : index
    %c0_154 = arith.constant 0 : index
    %c0_155 = arith.constant 0 : index
    %331 = vector.load %arg15[%c1_153, %c0_154, %c0_155] : memref<2x1x32xf32, #tpu.memory_space<vmem>>, vector<1x1x32xf32>
    %332 = vector.shape_cast %331 : vector<1x1x32xf32> to vector<1x32xf32>
    %c1_156 = arith.constant 1 : index
    %c0_157 = arith.constant 0 : index
    %c0_158 = arith.constant 0 : index
    %333 = vector.load %arg16[%c1_156, %c0_157, %c0_158] : memref<2x32x64xf32, #tpu.memory_space<vmem>>, vector<1x32x64xf32>
    %334 = vector.shape_cast %333 : vector<1x32x64xf32> to vector<32x64xf32>
    %c1_159 = arith.constant 1 : index
    %c0_160 = arith.constant 0 : index
    %c0_161 = arith.constant 0 : index
    %335 = vector.load %arg17[%c1_159, %c0_160, %c0_161] : memref<2x1x64xf32, #tpu.memory_space<vmem>>, vector<1x1x64xf32>
    %336 = vector.shape_cast %335 : vector<1x1x64xf32> to vector<1x64xf32>
    %c1_162 = arith.constant 1 : index
    %c0_163 = arith.constant 0 : index
    %c0_164 = arith.constant 0 : index
    %337 = vector.load %arg18[%c1_162, %c0_163, %c0_164] : memref<2x64x32xf32, #tpu.memory_space<vmem>>, vector<1x64x32xf32>
    %338 = vector.shape_cast %337 : vector<1x64x32xf32> to vector<64x32xf32>
    %c1_165 = arith.constant 1 : index
    %c0_166 = arith.constant 0 : index
    %c0_167 = arith.constant 0 : index
    %339 = vector.load %arg19[%c1_165, %c0_166, %c0_167] : memref<2x1x32xf32, #tpu.memory_space<vmem>>, vector<1x1x32xf32>
    %340 = vector.shape_cast %339 : vector<1x1x32xf32> to vector<1x32xf32>
    %c1_168 = arith.constant 1 : index
    %c0_169 = arith.constant 0 : index
    %c0_170 = arith.constant 0 : index
    %341 = vector.load %arg20[%c1_168, %c0_169, %c0_170] : memref<2x3x32xf32, #tpu.memory_space<vmem>>, vector<1x3x32xf32>
    %342 = vector.shape_cast %341 : vector<1x3x32xf32> to vector<3x32xf32>
    %c1_171 = arith.constant 1 : index
    %c0_172 = arith.constant 0 : index
    %c0_173 = arith.constant 0 : index
    %343 = vector.load %arg21[%c1_171, %c0_172, %c0_173] : memref<2x3x32xf32, #tpu.memory_space<vmem>>, vector<1x3x32xf32>
    %344 = vector.shape_cast %343 : vector<1x3x32xf32> to vector<3x32xf32>
    %cst_174 = arith.constant dense<0.000000e+00> : vector<8x96xf32>
    %345 = tpu.matmul %316, %318, %cst_174 {dimension_numbers = #tpu.dot_dimension_numbers<[1], [0], [0], [1], [0, 0, 1, 1], [], []>} : vector<8x32xf32>, vector<32x96xf32>, vector<8x96xf32> -> vector<8x96xf32>
    %346 = vector.broadcast %320 : vector<1x96xf32> to vector<8x96xf32>
    %347 = arith.addf %345, %346 : vector<8x96xf32>
    %348 = vector.extract_strided_slice %347 {offsets = [0, 0], sizes = [8, 32], strides = [1, 1]} : vector<8x96xf32> to vector<8x32xf32>
    %349 = vector.extract_strided_slice %347 {offsets = [0, 32], sizes = [8, 32], strides = [1, 1]} : vector<8x96xf32> to vector<8x32xf32>
    %350 = vector.extract_strided_slice %347 {offsets = [0, 64], sizes = [8, 32], strides = [1, 1]} : vector<8x96xf32> to vector<8x32xf32>
    %cst_175 = arith.constant 0.000000e+00 : f32
    %351 = vector.broadcast %cst_175 : f32 to vector<8x32xf32>
    %352 = vector.extract_strided_slice %348 {offsets = [0, 0], sizes = [8, 8], strides = [1, 1]} : vector<8x32xf32> to vector<8x8xf32>
    %353 = vector.extract_strided_slice %349 {offsets = [0, 0], sizes = [8, 8], strides = [1, 1]} : vector<8x32xf32> to vector<8x8xf32>
    %354 = vector.extract_strided_slice %350 {offsets = [0, 0], sizes = [8, 8], strides = [1, 1]} : vector<8x32xf32> to vector<8x8xf32>
    %cst_176 = arith.constant dense<0.000000e+00> : vector<8x8xf32>
    %355 = tpu.matmul %352, %353, %cst_176 {dimension_numbers = #tpu.dot_dimension_numbers<[1], [1], [0], [0], [0, 0, 1, 0], [], []>} : vector<8x8xf32>, vector<8x8xf32>, vector<8x8xf32> -> vector<8x8xf32>
    %cst_177 = arith.constant 0.353553385 : f32
    %356 = vector.broadcast %cst_177 : f32 to vector<8x8xf32>
    %357 = arith.mulf %355, %356 : vector<8x8xf32>
    %cst_178 = arith.constant -1.000000e+30 : f32
    %358 = vector.broadcast %cst_178 : f32 to vector<8x8xf32>
    %359 = arith.select %19, %358, %357 : vector<8x8xi1>, vector<8x8xf32>
    %cst_179 = arith.constant dense<0xFF800000> : vector<8xf32>
    %360 = vector.multi_reduction <maximumf>, %359, %cst_179 [1] : vector<8x8xf32> to vector<8xf32>
    %361 = vector.shape_cast %360 : vector<8xf32> to vector<8x1xf32>
    %362 = vector.broadcast %361 : vector<8x1xf32> to vector<8x8xf32>
    %363 = arith.subf %359, %362 : vector<8x8xf32>
    %364 = math.exp %363 : vector<8x8xf32>
    %cst_180 = arith.constant dense<0.000000e+00> : vector<8xf32>
    %365 = vector.multi_reduction <add>, %364, %cst_180 [1] : vector<8x8xf32> to vector<8xf32>
    %366 = vector.shape_cast %365 : vector<8xf32> to vector<8x1xf32>
    %cst_181 = arith.constant dense<0.000000e+00> : vector<8x8xf32>
    %367 = tpu.matmul %364, %354, %cst_181 {dimension_numbers = #tpu.dot_dimension_numbers<[1], [0], [0], [1], [0, 0, 1, 1], [], []>} : vector<8x8xf32>, vector<8x8xf32>, vector<8x8xf32> -> vector<8x8xf32>
    %368 = tpu.reciprocal %366 {approx = true} : vector<8x1xf32> -> vector<8x1xf32>
    %369 = vector.broadcast %368 : vector<8x1xf32> to vector<8x8xf32>
    %370 = arith.mulf %367, %369 : vector<8x8xf32>
    %371 = vector.extract_strided_slice %322 {offsets = [0, 0], sizes = [8, 32], strides = [1, 1]} : vector<32x32xf32> to vector<8x32xf32>
    %cst_182 = arith.constant dense<0.000000e+00> : vector<8x32xf32>
    %372 = tpu.matmul %370, %371, %cst_182 {dimension_numbers = #tpu.dot_dimension_numbers<[1], [0], [0], [1], [0, 0, 1, 1], [], []>} : vector<8x8xf32>, vector<8x32xf32>, vector<8x32xf32> -> vector<8x32xf32>
    %373 = arith.addf %351, %372 : vector<8x32xf32>
    %374 = vector.extract_strided_slice %348 {offsets = [0, 8], sizes = [8, 8], strides = [1, 1]} : vector<8x32xf32> to vector<8x8xf32>
    %375 = vector.extract_strided_slice %349 {offsets = [0, 8], sizes = [8, 8], strides = [1, 1]} : vector<8x32xf32> to vector<8x8xf32>
    %376 = vector.extract_strided_slice %350 {offsets = [0, 8], sizes = [8, 8], strides = [1, 1]} : vector<8x32xf32> to vector<8x8xf32>
    %cst_183 = arith.constant dense<0.000000e+00> : vector<8x8xf32>
    %377 = tpu.matmul %374, %375, %cst_183 {dimension_numbers = #tpu.dot_dimension_numbers<[1], [1], [0], [0], [0, 0, 1, 0], [], []>} : vector<8x8xf32>, vector<8x8xf32>, vector<8x8xf32> -> vector<8x8xf32>
    %cst_184 = arith.constant 0.353553385 : f32
    %378 = vector.broadcast %cst_184 : f32 to vector<8x8xf32>
    %379 = arith.mulf %377, %378 : vector<8x8xf32>
    %cst_185 = arith.constant -1.000000e+30 : f32
    %380 = vector.broadcast %cst_185 : f32 to vector<8x8xf32>
    %381 = arith.select %19, %380, %379 : vector<8x8xi1>, vector<8x8xf32>
    %cst_186 = arith.constant dense<0xFF800000> : vector<8xf32>
    %382 = vector.multi_reduction <maximumf>, %381, %cst_186 [1] : vector<8x8xf32> to vector<8xf32>
    %383 = vector.shape_cast %382 : vector<8xf32> to vector<8x1xf32>
    %384 = vector.broadcast %383 : vector<8x1xf32> to vector<8x8xf32>
    %385 = arith.subf %381, %384 : vector<8x8xf32>
    %386 = math.exp %385 : vector<8x8xf32>
    %cst_187 = arith.constant dense<0.000000e+00> : vector<8xf32>
    %387 = vector.multi_reduction <add>, %386, %cst_187 [1] : vector<8x8xf32> to vector<8xf32>
    %388 = vector.shape_cast %387 : vector<8xf32> to vector<8x1xf32>
    %cst_188 = arith.constant dense<0.000000e+00> : vector<8x8xf32>
    %389 = tpu.matmul %386, %376, %cst_188 {dimension_numbers = #tpu.dot_dimension_numbers<[1], [0], [0], [1], [0, 0, 1, 1], [], []>} : vector<8x8xf32>, vector<8x8xf32>, vector<8x8xf32> -> vector<8x8xf32>
    %390 = tpu.reciprocal %388 {approx = true} : vector<8x1xf32> -> vector<8x1xf32>
    %391 = vector.broadcast %390 : vector<8x1xf32> to vector<8x8xf32>
    %392 = arith.mulf %389, %391 : vector<8x8xf32>
    %393 = vector.extract_strided_slice %322 {offsets = [8, 0], sizes = [8, 32], strides = [1, 1]} : vector<32x32xf32> to vector<8x32xf32>
    %cst_189 = arith.constant dense<0.000000e+00> : vector<8x32xf32>
    %394 = tpu.matmul %392, %393, %cst_189 {dimension_numbers = #tpu.dot_dimension_numbers<[1], [0], [0], [1], [0, 0, 1, 1], [], []>} : vector<8x8xf32>, vector<8x32xf32>, vector<8x32xf32> -> vector<8x32xf32>
    %395 = arith.addf %373, %394 : vector<8x32xf32>
    %396 = vector.extract_strided_slice %348 {offsets = [0, 16], sizes = [8, 8], strides = [1, 1]} : vector<8x32xf32> to vector<8x8xf32>
    %397 = vector.extract_strided_slice %349 {offsets = [0, 16], sizes = [8, 8], strides = [1, 1]} : vector<8x32xf32> to vector<8x8xf32>
    %398 = vector.extract_strided_slice %350 {offsets = [0, 16], sizes = [8, 8], strides = [1, 1]} : vector<8x32xf32> to vector<8x8xf32>
    %cst_190 = arith.constant dense<0.000000e+00> : vector<8x8xf32>
    %399 = tpu.matmul %396, %397, %cst_190 {dimension_numbers = #tpu.dot_dimension_numbers<[1], [1], [0], [0], [0, 0, 1, 0], [], []>} : vector<8x8xf32>, vector<8x8xf32>, vector<8x8xf32> -> vector<8x8xf32>
    %cst_191 = arith.constant 0.353553385 : f32
    %400 = vector.broadcast %cst_191 : f32 to vector<8x8xf32>
    %401 = arith.mulf %399, %400 : vector<8x8xf32>
    %cst_192 = arith.constant -1.000000e+30 : f32
    %402 = vector.broadcast %cst_192 : f32 to vector<8x8xf32>
    %403 = arith.select %19, %402, %401 : vector<8x8xi1>, vector<8x8xf32>
    %cst_193 = arith.constant dense<0xFF800000> : vector<8xf32>
    %404 = vector.multi_reduction <maximumf>, %403, %cst_193 [1] : vector<8x8xf32> to vector<8xf32>
    %405 = vector.shape_cast %404 : vector<8xf32> to vector<8x1xf32>
    %406 = vector.broadcast %405 : vector<8x1xf32> to vector<8x8xf32>
    %407 = arith.subf %403, %406 : vector<8x8xf32>
    %408 = math.exp %407 : vector<8x8xf32>
    %cst_194 = arith.constant dense<0.000000e+00> : vector<8xf32>
    %409 = vector.multi_reduction <add>, %408, %cst_194 [1] : vector<8x8xf32> to vector<8xf32>
    %410 = vector.shape_cast %409 : vector<8xf32> to vector<8x1xf32>
    %cst_195 = arith.constant dense<0.000000e+00> : vector<8x8xf32>
    %411 = tpu.matmul %408, %398, %cst_195 {dimension_numbers = #tpu.dot_dimension_numbers<[1], [0], [0], [1], [0, 0, 1, 1], [], []>} : vector<8x8xf32>, vector<8x8xf32>, vector<8x8xf32> -> vector<8x8xf32>
    %412 = tpu.reciprocal %410 {approx = true} : vector<8x1xf32> -> vector<8x1xf32>
    %413 = vector.broadcast %412 : vector<8x1xf32> to vector<8x8xf32>
    %414 = arith.mulf %411, %413 : vector<8x8xf32>
    %415 = vector.extract_strided_slice %322 {offsets = [16, 0], sizes = [8, 32], strides = [1, 1]} : vector<32x32xf32> to vector<8x32xf32>
    %cst_196 = arith.constant dense<0.000000e+00> : vector<8x32xf32>
    %416 = tpu.matmul %414, %415, %cst_196 {dimension_numbers = #tpu.dot_dimension_numbers<[1], [0], [0], [1], [0, 0, 1, 1], [], []>} : vector<8x8xf32>, vector<8x32xf32>, vector<8x32xf32> -> vector<8x32xf32>
    %417 = arith.addf %395, %416 : vector<8x32xf32>
    %418 = vector.extract_strided_slice %348 {offsets = [0, 24], sizes = [8, 8], strides = [1, 1]} : vector<8x32xf32> to vector<8x8xf32>
    %419 = vector.extract_strided_slice %349 {offsets = [0, 24], sizes = [8, 8], strides = [1, 1]} : vector<8x32xf32> to vector<8x8xf32>
    %420 = vector.extract_strided_slice %350 {offsets = [0, 24], sizes = [8, 8], strides = [1, 1]} : vector<8x32xf32> to vector<8x8xf32>
    %cst_197 = arith.constant dense<0.000000e+00> : vector<8x8xf32>
    %421 = tpu.matmul %418, %419, %cst_197 {dimension_numbers = #tpu.dot_dimension_numbers<[1], [1], [0], [0], [0, 0, 1, 0], [], []>} : vector<8x8xf32>, vector<8x8xf32>, vector<8x8xf32> -> vector<8x8xf32>
    %cst_198 = arith.constant 0.353553385 : f32
    %422 = vector.broadcast %cst_198 : f32 to vector<8x8xf32>
    %423 = arith.mulf %421, %422 : vector<8x8xf32>
    %cst_199 = arith.constant -1.000000e+30 : f32
    %424 = vector.broadcast %cst_199 : f32 to vector<8x8xf32>
    %425 = arith.select %19, %424, %423 : vector<8x8xi1>, vector<8x8xf32>
    %cst_200 = arith.constant dense<0xFF800000> : vector<8xf32>
    %426 = vector.multi_reduction <maximumf>, %425, %cst_200 [1] : vector<8x8xf32> to vector<8xf32>
    %427 = vector.shape_cast %426 : vector<8xf32> to vector<8x1xf32>
    %428 = vector.broadcast %427 : vector<8x1xf32> to vector<8x8xf32>
    %429 = arith.subf %425, %428 : vector<8x8xf32>
    %430 = math.exp %429 : vector<8x8xf32>
    %cst_201 = arith.constant dense<0.000000e+00> : vector<8xf32>
    %431 = vector.multi_reduction <add>, %430, %cst_201 [1] : vector<8x8xf32> to vector<8xf32>
    %432 = vector.shape_cast %431 : vector<8xf32> to vector<8x1xf32>
    %cst_202 = arith.constant dense<0.000000e+00> : vector<8x8xf32>
    %433 = tpu.matmul %430, %420, %cst_202 {dimension_numbers = #tpu.dot_dimension_numbers<[1], [0], [0], [1], [0, 0, 1, 1], [], []>} : vector<8x8xf32>, vector<8x8xf32>, vector<8x8xf32> -> vector<8x8xf32>
    %434 = tpu.reciprocal %432 {approx = true} : vector<8x1xf32> -> vector<8x1xf32>
    %435 = vector.broadcast %434 : vector<8x1xf32> to vector<8x8xf32>
    %436 = arith.mulf %433, %435 : vector<8x8xf32>
    %437 = vector.extract_strided_slice %322 {offsets = [24, 0], sizes = [8, 32], strides = [1, 1]} : vector<32x32xf32> to vector<8x32xf32>
    %cst_203 = arith.constant dense<0.000000e+00> : vector<8x32xf32>
    %438 = tpu.matmul %436, %437, %cst_203 {dimension_numbers = #tpu.dot_dimension_numbers<[1], [0], [0], [1], [0, 0, 1, 1], [], []>} : vector<8x8xf32>, vector<8x32xf32>, vector<8x32xf32> -> vector<8x32xf32>
    %439 = arith.addf %417, %438 : vector<8x32xf32>
    %440 = vector.broadcast %324 : vector<1x32xf32> to vector<8x32xf32>
    %441 = arith.addf %439, %440 : vector<8x32xf32>
    %442 = arith.addf %316, %441 : vector<8x32xf32>
    %443 = vector.extract_strided_slice %342 {offsets = [0, 0], sizes = [1, 32], strides = [1, 1]} : vector<3x32xf32> to vector<1x32xf32>
    %444 = vector.extract_strided_slice %344 {offsets = [0, 0], sizes = [1, 32], strides = [1, 1]} : vector<3x32xf32> to vector<1x32xf32>
    %cst_204 = arith.constant dense<0.000000e+00> : vector<8xf32>
    %445 = vector.multi_reduction <add>, %442, %cst_204 [1] : vector<8x32xf32> to vector<8xf32>
    %446 = vector.shape_cast %445 : vector<8xf32> to vector<8x1xf32>
    %cst_205 = arith.constant 3.200000e+01 : f32
    %447 = vector.broadcast %cst_205 : f32 to vector<8x1xf32>
    %448 = arith.divf %446, %447 : vector<8x1xf32>
    %449 = vector.broadcast %448 : vector<8x1xf32> to vector<8x32xf32>
    %450 = arith.subf %442, %449 : vector<8x32xf32>
    %451 = arith.mulf %450, %450 : vector<8x32xf32>
    %cst_206 = arith.constant dense<0.000000e+00> : vector<8xf32>
    %452 = vector.multi_reduction <add>, %451, %cst_206 [1] : vector<8x32xf32> to vector<8xf32>
    %453 = vector.shape_cast %452 : vector<8xf32> to vector<8x1xf32>
    %cst_207 = arith.constant 3.200000e+01 : f32
    %454 = vector.broadcast %cst_207 : f32 to vector<8x1xf32>
    %455 = arith.divf %453, %454 : vector<8x1xf32>
    %cst_208 = arith.constant 9.99999974E-6 : f32
    %456 = vector.broadcast %cst_208 : f32 to vector<8x1xf32>
    %457 = arith.addf %455, %456 : vector<8x1xf32>
    %458 = math.rsqrt %457 : vector<8x1xf32>
    %459 = vector.broadcast %458 : vector<8x1xf32> to vector<8x32xf32>
    %460 = arith.mulf %450, %459 : vector<8x32xf32>
    %461 = vector.broadcast %443 : vector<1x32xf32> to vector<8x32xf32>
    %462 = arith.mulf %460, %461 : vector<8x32xf32>
    %463 = vector.broadcast %444 : vector<1x32xf32> to vector<8x32xf32>
    %464 = arith.addf %462, %463 : vector<8x32xf32>
    %465 = vector.extract_strided_slice %326 {offsets = [0, 0], sizes = [32, 32], strides = [1, 1]} : vector<32x96xf32> to vector<32x32xf32>
    %cst_209 = arith.constant dense<0.000000e+00> : vector<8x32xf32>
    %466 = tpu.matmul %464, %465, %cst_209 {dimension_numbers = #tpu.dot_dimension_numbers<[1], [0], [0], [1], [0, 0, 1, 1], [], []>} : vector<8x32xf32>, vector<32x32xf32>, vector<8x32xf32> -> vector<8x32xf32>
    %467 = vector.extract_strided_slice %328 {offsets = [0, 0], sizes = [1, 32], strides = [1, 1]} : vector<1x96xf32> to vector<1x32xf32>
    %468 = vector.broadcast %467 : vector<1x32xf32> to vector<8x32xf32>
    %469 = arith.addf %466, %468 : vector<8x32xf32>
    %470 = vector.extract_strided_slice %326 {offsets = [0, 32], sizes = [32, 64], strides = [1, 1]} : vector<32x96xf32> to vector<32x64xf32>
    %cst_210 = arith.constant dense<0.000000e+00> : vector<8x64xf32>
    %471 = tpu.matmul %3, %470, %cst_210 {dimension_numbers = #tpu.dot_dimension_numbers<[1], [0], [0], [1], [0, 0, 1, 1], [], []>} : vector<8x32xf32>, vector<32x64xf32>, vector<8x64xf32> -> vector<8x64xf32>
    %472 = vector.extract_strided_slice %328 {offsets = [0, 32], sizes = [1, 64], strides = [1, 1]} : vector<1x96xf32> to vector<1x64xf32>
    %473 = vector.broadcast %472 : vector<1x64xf32> to vector<8x64xf32>
    %474 = arith.addf %471, %473 : vector<8x64xf32>
    %475 = vector.extract_strided_slice %474 {offsets = [0, 0], sizes = [8, 32], strides = [1, 1]} : vector<8x64xf32> to vector<8x32xf32>
    %476 = vector.extract_strided_slice %474 {offsets = [0, 32], sizes = [8, 32], strides = [1, 1]} : vector<8x64xf32> to vector<8x32xf32>
    %cst_211 = arith.constant 0.000000e+00 : f32
    %477 = vector.broadcast %cst_211 : f32 to vector<8x32xf32>
    %478 = vector.extract_strided_slice %469 {offsets = [0, 0], sizes = [8, 8], strides = [1, 1]} : vector<8x32xf32> to vector<8x8xf32>
    %479 = vector.extract_strided_slice %475 {offsets = [0, 0], sizes = [8, 8], strides = [1, 1]} : vector<8x32xf32> to vector<8x8xf32>
    %480 = vector.extract_strided_slice %476 {offsets = [0, 0], sizes = [8, 8], strides = [1, 1]} : vector<8x32xf32> to vector<8x8xf32>
    %cst_212 = arith.constant dense<0.000000e+00> : vector<8x8xf32>
    %481 = tpu.matmul %478, %479, %cst_212 {dimension_numbers = #tpu.dot_dimension_numbers<[1], [1], [0], [0], [0, 0, 1, 0], [], []>} : vector<8x8xf32>, vector<8x8xf32>, vector<8x8xf32> -> vector<8x8xf32>
    %cst_213 = arith.constant 0.353553385 : f32
    %482 = vector.broadcast %cst_213 : f32 to vector<8x8xf32>
    %483 = arith.mulf %481, %482 : vector<8x8xf32>
    %cst_214 = arith.constant dense<0xFF800000> : vector<8xf32>
    %484 = vector.multi_reduction <maximumf>, %483, %cst_214 [1] : vector<8x8xf32> to vector<8xf32>
    %485 = vector.shape_cast %484 : vector<8xf32> to vector<8x1xf32>
    %486 = vector.broadcast %485 : vector<8x1xf32> to vector<8x8xf32>
    %487 = arith.subf %483, %486 : vector<8x8xf32>
    %488 = math.exp %487 : vector<8x8xf32>
    %cst_215 = arith.constant dense<0.000000e+00> : vector<8xf32>
    %489 = vector.multi_reduction <add>, %488, %cst_215 [1] : vector<8x8xf32> to vector<8xf32>
    %490 = vector.shape_cast %489 : vector<8xf32> to vector<8x1xf32>
    %cst_216 = arith.constant dense<0.000000e+00> : vector<8x8xf32>
    %491 = tpu.matmul %488, %480, %cst_216 {dimension_numbers = #tpu.dot_dimension_numbers<[1], [0], [0], [1], [0, 0, 1, 1], [], []>} : vector<8x8xf32>, vector<8x8xf32>, vector<8x8xf32> -> vector<8x8xf32>
    %492 = tpu.reciprocal %490 {approx = true} : vector<8x1xf32> -> vector<8x1xf32>
    %493 = vector.broadcast %492 : vector<8x1xf32> to vector<8x8xf32>
    %494 = arith.mulf %491, %493 : vector<8x8xf32>
    %495 = vector.extract_strided_slice %330 {offsets = [0, 0], sizes = [8, 32], strides = [1, 1]} : vector<32x32xf32> to vector<8x32xf32>
    %cst_217 = arith.constant dense<0.000000e+00> : vector<8x32xf32>
    %496 = tpu.matmul %494, %495, %cst_217 {dimension_numbers = #tpu.dot_dimension_numbers<[1], [0], [0], [1], [0, 0, 1, 1], [], []>} : vector<8x8xf32>, vector<8x32xf32>, vector<8x32xf32> -> vector<8x32xf32>
    %497 = arith.addf %477, %496 : vector<8x32xf32>
    %498 = vector.extract_strided_slice %469 {offsets = [0, 8], sizes = [8, 8], strides = [1, 1]} : vector<8x32xf32> to vector<8x8xf32>
    %499 = vector.extract_strided_slice %475 {offsets = [0, 8], sizes = [8, 8], strides = [1, 1]} : vector<8x32xf32> to vector<8x8xf32>
    %500 = vector.extract_strided_slice %476 {offsets = [0, 8], sizes = [8, 8], strides = [1, 1]} : vector<8x32xf32> to vector<8x8xf32>
    %cst_218 = arith.constant dense<0.000000e+00> : vector<8x8xf32>
    %501 = tpu.matmul %498, %499, %cst_218 {dimension_numbers = #tpu.dot_dimension_numbers<[1], [1], [0], [0], [0, 0, 1, 0], [], []>} : vector<8x8xf32>, vector<8x8xf32>, vector<8x8xf32> -> vector<8x8xf32>
    %cst_219 = arith.constant 0.353553385 : f32
    %502 = vector.broadcast %cst_219 : f32 to vector<8x8xf32>
    %503 = arith.mulf %501, %502 : vector<8x8xf32>
    %cst_220 = arith.constant dense<0xFF800000> : vector<8xf32>
    %504 = vector.multi_reduction <maximumf>, %503, %cst_220 [1] : vector<8x8xf32> to vector<8xf32>
    %505 = vector.shape_cast %504 : vector<8xf32> to vector<8x1xf32>
    %506 = vector.broadcast %505 : vector<8x1xf32> to vector<8x8xf32>
    %507 = arith.subf %503, %506 : vector<8x8xf32>
    %508 = math.exp %507 : vector<8x8xf32>
    %cst_221 = arith.constant dense<0.000000e+00> : vector<8xf32>
    %509 = vector.multi_reduction <add>, %508, %cst_221 [1] : vector<8x8xf32> to vector<8xf32>
    %510 = vector.shape_cast %509 : vector<8xf32> to vector<8x1xf32>
    %cst_222 = arith.constant dense<0.000000e+00> : vector<8x8xf32>
    %511 = tpu.matmul %508, %500, %cst_222 {dimension_numbers = #tpu.dot_dimension_numbers<[1], [0], [0], [1], [0, 0, 1, 1], [], []>} : vector<8x8xf32>, vector<8x8xf32>, vector<8x8xf32> -> vector<8x8xf32>
    %512 = tpu.reciprocal %510 {approx = true} : vector<8x1xf32> -> vector<8x1xf32>
    %513 = vector.broadcast %512 : vector<8x1xf32> to vector<8x8xf32>
    %514 = arith.mulf %511, %513 : vector<8x8xf32>
    %515 = vector.extract_strided_slice %330 {offsets = [8, 0], sizes = [8, 32], strides = [1, 1]} : vector<32x32xf32> to vector<8x32xf32>
    %cst_223 = arith.constant dense<0.000000e+00> : vector<8x32xf32>
    %516 = tpu.matmul %514, %515, %cst_223 {dimension_numbers = #tpu.dot_dimension_numbers<[1], [0], [0], [1], [0, 0, 1, 1], [], []>} : vector<8x8xf32>, vector<8x32xf32>, vector<8x32xf32> -> vector<8x32xf32>
    %517 = arith.addf %497, %516 : vector<8x32xf32>
    %518 = vector.extract_strided_slice %469 {offsets = [0, 16], sizes = [8, 8], strides = [1, 1]} : vector<8x32xf32> to vector<8x8xf32>
    %519 = vector.extract_strided_slice %475 {offsets = [0, 16], sizes = [8, 8], strides = [1, 1]} : vector<8x32xf32> to vector<8x8xf32>
    %520 = vector.extract_strided_slice %476 {offsets = [0, 16], sizes = [8, 8], strides = [1, 1]} : vector<8x32xf32> to vector<8x8xf32>
    %cst_224 = arith.constant dense<0.000000e+00> : vector<8x8xf32>
    %521 = tpu.matmul %518, %519, %cst_224 {dimension_numbers = #tpu.dot_dimension_numbers<[1], [1], [0], [0], [0, 0, 1, 0], [], []>} : vector<8x8xf32>, vector<8x8xf32>, vector<8x8xf32> -> vector<8x8xf32>
    %cst_225 = arith.constant 0.353553385 : f32
    %522 = vector.broadcast %cst_225 : f32 to vector<8x8xf32>
    %523 = arith.mulf %521, %522 : vector<8x8xf32>
    %cst_226 = arith.constant dense<0xFF800000> : vector<8xf32>
    %524 = vector.multi_reduction <maximumf>, %523, %cst_226 [1] : vector<8x8xf32> to vector<8xf32>
    %525 = vector.shape_cast %524 : vector<8xf32> to vector<8x1xf32>
    %526 = vector.broadcast %525 : vector<8x1xf32> to vector<8x8xf32>
    %527 = arith.subf %523, %526 : vector<8x8xf32>
    %528 = math.exp %527 : vector<8x8xf32>
    %cst_227 = arith.constant dense<0.000000e+00> : vector<8xf32>
    %529 = vector.multi_reduction <add>, %528, %cst_227 [1] : vector<8x8xf32> to vector<8xf32>
    %530 = vector.shape_cast %529 : vector<8xf32> to vector<8x1xf32>
    %cst_228 = arith.constant dense<0.000000e+00> : vector<8x8xf32>
    %531 = tpu.matmul %528, %520, %cst_228 {dimension_numbers = #tpu.dot_dimension_numbers<[1], [0], [0], [1], [0, 0, 1, 1], [], []>} : vector<8x8xf32>, vector<8x8xf32>, vector<8x8xf32> -> vector<8x8xf32>
    %532 = tpu.reciprocal %530 {approx = true} : vector<8x1xf32> -> vector<8x1xf32>
    %533 = vector.broadcast %532 : vector<8x1xf32> to vector<8x8xf32>
    %534 = arith.mulf %531, %533 : vector<8x8xf32>
    %535 = vector.extract_strided_slice %330 {offsets = [16, 0], sizes = [8, 32], strides = [1, 1]} : vector<32x32xf32> to vector<8x32xf32>
    %cst_229 = arith.constant dense<0.000000e+00> : vector<8x32xf32>
    %536 = tpu.matmul %534, %535, %cst_229 {dimension_numbers = #tpu.dot_dimension_numbers<[1], [0], [0], [1], [0, 0, 1, 1], [], []>} : vector<8x8xf32>, vector<8x32xf32>, vector<8x32xf32> -> vector<8x32xf32>
    %537 = arith.addf %517, %536 : vector<8x32xf32>
    %538 = vector.extract_strided_slice %469 {offsets = [0, 24], sizes = [8, 8], strides = [1, 1]} : vector<8x32xf32> to vector<8x8xf32>
    %539 = vector.extract_strided_slice %475 {offsets = [0, 24], sizes = [8, 8], strides = [1, 1]} : vector<8x32xf32> to vector<8x8xf32>
    %540 = vector.extract_strided_slice %476 {offsets = [0, 24], sizes = [8, 8], strides = [1, 1]} : vector<8x32xf32> to vector<8x8xf32>
    %cst_230 = arith.constant dense<0.000000e+00> : vector<8x8xf32>
    %541 = tpu.matmul %538, %539, %cst_230 {dimension_numbers = #tpu.dot_dimension_numbers<[1], [1], [0], [0], [0, 0, 1, 0], [], []>} : vector<8x8xf32>, vector<8x8xf32>, vector<8x8xf32> -> vector<8x8xf32>
    %cst_231 = arith.constant 0.353553385 : f32
    %542 = vector.broadcast %cst_231 : f32 to vector<8x8xf32>
    %543 = arith.mulf %541, %542 : vector<8x8xf32>
    %cst_232 = arith.constant dense<0xFF800000> : vector<8xf32>
    %544 = vector.multi_reduction <maximumf>, %543, %cst_232 [1] : vector<8x8xf32> to vector<8xf32>
    %545 = vector.shape_cast %544 : vector<8xf32> to vector<8x1xf32>
    %546 = vector.broadcast %545 : vector<8x1xf32> to vector<8x8xf32>
    %547 = arith.subf %543, %546 : vector<8x8xf32>
    %548 = math.exp %547 : vector<8x8xf32>
    %cst_233 = arith.constant dense<0.000000e+00> : vector<8xf32>
    %549 = vector.multi_reduction <add>, %548, %cst_233 [1] : vector<8x8xf32> to vector<8xf32>
    %550 = vector.shape_cast %549 : vector<8xf32> to vector<8x1xf32>
    %cst_234 = arith.constant dense<0.000000e+00> : vector<8x8xf32>
    %551 = tpu.matmul %548, %540, %cst_234 {dimension_numbers = #tpu.dot_dimension_numbers<[1], [0], [0], [1], [0, 0, 1, 1], [], []>} : vector<8x8xf32>, vector<8x8xf32>, vector<8x8xf32> -> vector<8x8xf32>
    %552 = tpu.reciprocal %550 {approx = true} : vector<8x1xf32> -> vector<8x1xf32>
    %553 = vector.broadcast %552 : vector<8x1xf32> to vector<8x8xf32>
    %554 = arith.mulf %551, %553 : vector<8x8xf32>
    %555 = vector.extract_strided_slice %330 {offsets = [24, 0], sizes = [8, 32], strides = [1, 1]} : vector<32x32xf32> to vector<8x32xf32>
    %cst_235 = arith.constant dense<0.000000e+00> : vector<8x32xf32>
    %556 = tpu.matmul %554, %555, %cst_235 {dimension_numbers = #tpu.dot_dimension_numbers<[1], [0], [0], [1], [0, 0, 1, 1], [], []>} : vector<8x8xf32>, vector<8x32xf32>, vector<8x32xf32> -> vector<8x32xf32>
    %557 = arith.addf %537, %556 : vector<8x32xf32>
    %558 = vector.broadcast %332 : vector<1x32xf32> to vector<8x32xf32>
    %559 = arith.addf %557, %558 : vector<8x32xf32>
    %560 = arith.addf %464, %559 : vector<8x32xf32>
    %561 = vector.extract_strided_slice %342 {offsets = [1, 0], sizes = [1, 32], strides = [1, 1]} : vector<3x32xf32> to vector<1x32xf32>
    %562 = vector.extract_strided_slice %344 {offsets = [1, 0], sizes = [1, 32], strides = [1, 1]} : vector<3x32xf32> to vector<1x32xf32>
    %cst_236 = arith.constant dense<0.000000e+00> : vector<8xf32>
    %563 = vector.multi_reduction <add>, %560, %cst_236 [1] : vector<8x32xf32> to vector<8xf32>
    %564 = vector.shape_cast %563 : vector<8xf32> to vector<8x1xf32>
    %cst_237 = arith.constant 3.200000e+01 : f32
    %565 = vector.broadcast %cst_237 : f32 to vector<8x1xf32>
    %566 = arith.divf %564, %565 : vector<8x1xf32>
    %567 = vector.broadcast %566 : vector<8x1xf32> to vector<8x32xf32>
    %568 = arith.subf %560, %567 : vector<8x32xf32>
    %569 = arith.mulf %568, %568 : vector<8x32xf32>
    %cst_238 = arith.constant dense<0.000000e+00> : vector<8xf32>
    %570 = vector.multi_reduction <add>, %569, %cst_238 [1] : vector<8x32xf32> to vector<8xf32>
    %571 = vector.shape_cast %570 : vector<8xf32> to vector<8x1xf32>
    %cst_239 = arith.constant 3.200000e+01 : f32
    %572 = vector.broadcast %cst_239 : f32 to vector<8x1xf32>
    %573 = arith.divf %571, %572 : vector<8x1xf32>
    %cst_240 = arith.constant 9.99999974E-6 : f32
    %574 = vector.broadcast %cst_240 : f32 to vector<8x1xf32>
    %575 = arith.addf %573, %574 : vector<8x1xf32>
    %576 = math.rsqrt %575 : vector<8x1xf32>
    %577 = vector.broadcast %576 : vector<8x1xf32> to vector<8x32xf32>
    %578 = arith.mulf %568, %577 : vector<8x32xf32>
    %579 = vector.broadcast %561 : vector<1x32xf32> to vector<8x32xf32>
    %580 = arith.mulf %578, %579 : vector<8x32xf32>
    %581 = vector.broadcast %562 : vector<1x32xf32> to vector<8x32xf32>
    %582 = arith.addf %580, %581 : vector<8x32xf32>
    %cst_241 = arith.constant dense<0.000000e+00> : vector<8x64xf32>
    %583 = tpu.matmul %582, %334, %cst_241 {dimension_numbers = #tpu.dot_dimension_numbers<[1], [0], [0], [1], [0, 0, 1, 1], [], []>} : vector<8x32xf32>, vector<32x64xf32>, vector<8x64xf32> -> vector<8x64xf32>
    %584 = vector.broadcast %336 : vector<1x64xf32> to vector<8x64xf32>
    %585 = arith.addf %583, %584 : vector<8x64xf32>
    %cst_242 = arith.constant 0.000000e+00 : f32
    %586 = vector.broadcast %cst_242 : f32 to vector<8x64xf32>
    %587 = arith.maximumf %585, %586 : vector<8x64xf32>
    %cst_243 = arith.constant dense<0.000000e+00> : vector<8x32xf32>
    %588 = tpu.matmul %587, %338, %cst_243 {dimension_numbers = #tpu.dot_dimension_numbers<[1], [0], [0], [1], [0, 0, 1, 1], [], []>} : vector<8x64xf32>, vector<64x32xf32>, vector<8x32xf32> -> vector<8x32xf32>
    %589 = vector.broadcast %340 : vector<1x32xf32> to vector<8x32xf32>
    %590 = arith.addf %588, %589 : vector<8x32xf32>
    %591 = arith.addf %582, %590 : vector<8x32xf32>
    %592 = vector.extract_strided_slice %342 {offsets = [2, 0], sizes = [1, 32], strides = [1, 1]} : vector<3x32xf32> to vector<1x32xf32>
    %593 = vector.extract_strided_slice %344 {offsets = [2, 0], sizes = [1, 32], strides = [1, 1]} : vector<3x32xf32> to vector<1x32xf32>
    %cst_244 = arith.constant dense<0.000000e+00> : vector<8xf32>
    %594 = vector.multi_reduction <add>, %591, %cst_244 [1] : vector<8x32xf32> to vector<8xf32>
    %595 = vector.shape_cast %594 : vector<8xf32> to vector<8x1xf32>
    %cst_245 = arith.constant 3.200000e+01 : f32
    %596 = vector.broadcast %cst_245 : f32 to vector<8x1xf32>
    %597 = arith.divf %595, %596 : vector<8x1xf32>
    %598 = vector.broadcast %597 : vector<8x1xf32> to vector<8x32xf32>
    %599 = arith.subf %591, %598 : vector<8x32xf32>
    %600 = arith.mulf %599, %599 : vector<8x32xf32>
    %cst_246 = arith.constant dense<0.000000e+00> : vector<8xf32>
    %601 = vector.multi_reduction <add>, %600, %cst_246 [1] : vector<8x32xf32> to vector<8xf32>
    %602 = vector.shape_cast %601 : vector<8xf32> to vector<8x1xf32>
    %cst_247 = arith.constant 3.200000e+01 : f32
    %603 = vector.broadcast %cst_247 : f32 to vector<8x1xf32>
    %604 = arith.divf %602, %603 : vector<8x1xf32>
    %cst_248 = arith.constant 9.99999974E-6 : f32
    %605 = vector.broadcast %cst_248 : f32 to vector<8x1xf32>
    %606 = arith.addf %604, %605 : vector<8x1xf32>
    %607 = math.rsqrt %606 : vector<8x1xf32>
    %608 = vector.broadcast %607 : vector<8x1xf32> to vector<8x32xf32>
    %609 = arith.mulf %599, %608 : vector<8x32xf32>
    %610 = vector.broadcast %592 : vector<1x32xf32> to vector<8x32xf32>
    %611 = arith.mulf %609, %610 : vector<8x32xf32>
    %612 = vector.broadcast %593 : vector<1x32xf32> to vector<8x32xf32>
    %613 = arith.addf %611, %612 : vector<8x32xf32>
    %c0_249 = arith.constant 0 : index
    %c0_250 = arith.constant 0 : index
    %614 = vector.load %arg22[%c0_249, %c0_250] : memref<32x32xf32, #tpu.memory_space<vmem>>, vector<32x32xf32>
    %cst_251 = arith.constant dense<0.000000e+00> : vector<8x32xf32>
    %615 = tpu.matmul %613, %614, %cst_251 {dimension_numbers = #tpu.dot_dimension_numbers<[1], [0], [0], [1], [0, 0, 1, 1], [], []>} : vector<8x32xf32>, vector<32x32xf32>, vector<8x32xf32> -> vector<8x32xf32>
    %c0_252 = arith.constant 0 : index
    %c0_253 = arith.constant 0 : index
    %616 = vector.load %arg23[%c0_252, %c0_253] : memref<1x32xf32, #tpu.memory_space<vmem>>, vector<1x32xf32>
    %617 = vector.broadcast %616 : vector<1x32xf32> to vector<8x32xf32>
    %618 = arith.addf %615, %617 : vector<8x32xf32>
    %619 = math.tanh %618 : vector<8x32xf32>
    %c0_254 = arith.constant 0 : index
    %c0_255 = arith.constant 0 : index
    %620 = vector.load %arg24[%c0_254, %c0_255] : memref<32x4xf32, #tpu.memory_space<vmem>>, vector<32x4xf32>
    %cst_256 = arith.constant dense<0.000000e+00> : vector<8x4xf32>
    %621 = tpu.matmul %619, %620, %cst_256 {dimension_numbers = #tpu.dot_dimension_numbers<[1], [0], [0], [1], [0, 0, 1, 1], [], []>} : vector<8x32xf32>, vector<32x4xf32>, vector<8x4xf32> -> vector<8x4xf32>
    %c0_257 = arith.constant 0 : index
    %c0_258 = arith.constant 0 : index
    %622 = vector.load %arg25[%c0_257, %c0_258] : memref<1x4xf32, #tpu.memory_space<vmem>>, vector<1x4xf32>
    %623 = vector.broadcast %622 : vector<1x4xf32> to vector<8x4xf32>
    %624 = arith.addf %621, %623 : vector<8x4xf32>
    %c0_259 = arith.constant 0 : index
    %c0_260 = arith.constant 0 : index
    %c0_261 = arith.constant 0 : index
    %625 = vector.load %arg26[%c0_259, %c0_260, %c0_261] : memref<1x8x4xf32, #tpu.memory_space<vmem>>, vector<1x8x4xf32>
    %626 = vector.shape_cast %625 : vector<1x8x4xf32> to vector<8x4xf32>
    %627 = vector.shape_cast %624 : vector<8x4xf32> to vector<1x8x4xf32>
    tpu.vector_store %arg26[%c0_259, %c0_260, %c0_261], %627 {strides = array<i32>} : memref<1x8x4xf32, #tpu.memory_space<vmem>>, vector<1x8x4xf32>,
    return
  }
  func.func @transform_0(%arg0: i32) -> (i32, i32, i32) {
    %c0_i32 = arith.constant 0 : i32
    %c0_i32_0 = arith.constant 0 : i32
    %c0_i32_1 = arith.constant 0 : i32
    return %arg0, %c0_i32, %c0_i32_0 : i32, i32, i32
  }
  func.func @transform_1(%arg0: i32) -> (i32, i32, i32) {
    %c0_i32 = arith.constant 0 : i32
    %c0_i32_0 = arith.constant 0 : i32
    %c0_i32_1 = arith.constant 0 : i32
    return %arg0, %c0_i32, %c0_i32_0 : i32, i32, i32
  }
  func.func @transform_2(%arg0: i32) -> (i32, i32) {
    %c0_i32 = arith.constant 0 : i32
    %c0_i32_0 = arith.constant 0 : i32
    %c0_i32_1 = arith.constant 0 : i32
    return %c0_i32, %c0_i32_0 : i32, i32
  }
  func.func @transform_3(%arg0: i32) -> (i32, i32) {
    %c0_i32 = arith.constant 0 : i32
    %c0_i32_0 = arith.constant 0 : i32
    %c0_i32_1 = arith.constant 0 : i32
    return %c0_i32, %c0_i32_0 : i32, i32
  }
  func.func @transform_4(%arg0: i32) -> (i32, i32) {
    %c0_i32 = arith.constant 0 : i32
    %c0_i32_0 = arith.constant 0 : i32
    %c0_i32_1 = arith.constant 0 : i32
    return %c0_i32, %c0_i32_0 : i32, i32
  }
  func.func @transform_5(%arg0: i32) -> (i32, i32) {
    %c0_i32 = arith.constant 0 : i32
    %c0_i32_0 = arith.constant 0 : i32
    %c0_i32_1 = arith.constant 0 : i32
    return %c0_i32, %c0_i32_0 : i32, i32
  }
  func.func @transform_6(%arg0: i32) -> (i32, i32) {
    %c0_i32 = arith.constant 0 : i32
    %c0_i32_0 = arith.constant 0 : i32
    %c0_i32_1 = arith.constant 0 : i32
    return %c0_i32, %c0_i32_0 : i32, i32
  }
  func.func @transform_7(%arg0: i32) -> (i32, i32, i32) {
    %c0_i32 = arith.constant 0 : i32
    %c0_i32_0 = arith.constant 0 : i32
    %c0_i32_1 = arith.constant 0 : i32
    %c0_i32_2 = arith.constant 0 : i32
    return %c0_i32, %c0_i32_0, %c0_i32_1 : i32, i32, i32
  }
  func.func @transform_8(%arg0: i32) -> (i32, i32, i32) {
    %c0_i32 = arith.constant 0 : i32
    %c0_i32_0 = arith.constant 0 : i32
    %c0_i32_1 = arith.constant 0 : i32
    %c0_i32_2 = arith.constant 0 : i32
    return %c0_i32, %c0_i32_0, %c0_i32_1 : i32, i32, i32
  }
  func.func @transform_9(%arg0: i32) -> (i32, i32, i32) {
    %c0_i32 = arith.constant 0 : i32
    %c0_i32_0 = arith.constant 0 : i32
    %c0_i32_1 = arith.constant 0 : i32
    %c0_i32_2 = arith.constant 0 : i32
    return %c0_i32, %c0_i32_0, %c0_i32_1 : i32, i32, i32
  }
  func.func @transform_10(%arg0: i32) -> (i32, i32, i32) {
    %c0_i32 = arith.constant 0 : i32
    %c0_i32_0 = arith.constant 0 : i32
    %c0_i32_1 = arith.constant 0 : i32
    %c0_i32_2 = arith.constant 0 : i32
    return %c0_i32, %c0_i32_0, %c0_i32_1 : i32, i32, i32
  }
  func.func @transform_11(%arg0: i32) -> (i32, i32, i32) {
    %c0_i32 = arith.constant 0 : i32
    %c0_i32_0 = arith.constant 0 : i32
    %c0_i32_1 = arith.constant 0 : i32
    %c0_i32_2 = arith.constant 0 : i32
    return %c0_i32, %c0_i32_0, %c0_i32_1 : i32, i32, i32
  }
  func.func @transform_12(%arg0: i32) -> (i32, i32, i32) {
    %c0_i32 = arith.constant 0 : i32
    %c0_i32_0 = arith.constant 0 : i32
    %c0_i32_1 = arith.constant 0 : i32
    %c0_i32_2 = arith.constant 0 : i32
    return %c0_i32, %c0_i32_0, %c0_i32_1 : i32, i32, i32
  }
  func.func @transform_13(%arg0: i32) -> (i32, i32, i32) {
    %c0_i32 = arith.constant 0 : i32
    %c0_i32_0 = arith.constant 0 : i32
    %c0_i32_1 = arith.constant 0 : i32
    %c0_i32_2 = arith.constant 0 : i32
    return %c0_i32, %c0_i32_0, %c0_i32_1 : i32, i32, i32
  }
  func.func @transform_14(%arg0: i32) -> (i32, i32, i32) {
    %c0_i32 = arith.constant 0 : i32
    %c0_i32_0 = arith.constant 0 : i32
    %c0_i32_1 = arith.constant 0 : i32
    %c0_i32_2 = arith.constant 0 : i32
    return %c0_i32, %c0_i32_0, %c0_i32_1 : i32, i32, i32
  }
  func.func @transform_15(%arg0: i32) -> (i32, i32, i32) {
    %c0_i32 = arith.constant 0 : i32
    %c0_i32_0 = arith.constant 0 : i32
    %c0_i32_1 = arith.constant 0 : i32
    %c0_i32_2 = arith.constant 0 : i32
    return %c0_i32, %c0_i32_0, %c0_i32_1 : i32, i32, i32
  }
  func.func @transform_16(%arg0: i32) -> (i32, i32, i32) {
    %c0_i32 = arith.constant 0 : i32
    %c0_i32_0 = arith.constant 0 : i32
    %c0_i32_1 = arith.constant 0 : i32
    %c0_i32_2 = arith.constant 0 : i32
    return %c0_i32, %c0_i32_0, %c0_i32_1 : i32, i32, i32
  }
  func.func @transform_17(%arg0: i32) -> (i32, i32, i32) {
    %c0_i32 = arith.constant 0 : i32
    %c0_i32_0 = arith.constant 0 : i32
    %c0_i32_1 = arith.constant 0 : i32
    %c0_i32_2 = arith.constant 0 : i32
    return %c0_i32, %c0_i32_0, %c0_i32_1 : i32, i32, i32
  }
  func.func @transform_18(%arg0: i32) -> (i32, i32, i32) {
    %c0_i32 = arith.constant 0 : i32
    %c0_i32_0 = arith.constant 0 : i32
    %c0_i32_1 = arith.constant 0 : i32
    %c0_i32_2 = arith.constant 0 : i32
    return %c0_i32, %c0_i32_0, %c0_i32_1 : i32, i32, i32
  }
  func.func @transform_19(%arg0: i32) -> (i32, i32, i32) {
    %c0_i32 = arith.constant 0 : i32
    %c0_i32_0 = arith.constant 0 : i32
    %c0_i32_1 = arith.constant 0 : i32
    %c0_i32_2 = arith.constant 0 : i32
    return %c0_i32, %c0_i32_0, %c0_i32_1 : i32, i32, i32
  }
  func.func @transform_20(%arg0: i32) -> (i32, i32, i32) {
    %c0_i32 = arith.constant 0 : i32
    %c0_i32_0 = arith.constant 0 : i32
    %c0_i32_1 = arith.constant 0 : i32
    %c0_i32_2 = arith.constant 0 : i32
    return %c0_i32, %c0_i32_0, %c0_i32_1 : i32, i32, i32
  }
  func.func @transform_21(%arg0: i32) -> (i32, i32) {
    %c0_i32 = arith.constant 0 : i32
    %c0_i32_0 = arith.constant 0 : i32
    %c0_i32_1 = arith.constant 0 : i32
    return %c0_i32, %c0_i32_0 : i32, i32
  }
  func.func @transform_22(%arg0: i32) -> (i32, i32) {
    %c0_i32 = arith.constant 0 : i32
    %c0_i32_0 = arith.constant 0 : i32
    %c0_i32_1 = arith.constant 0 : i32
    return %c0_i32, %c0_i32_0 : i32, i32
  }
  func.func @transform_23(%arg0: i32) -> (i32, i32) {
    %c0_i32 = arith.constant 0 : i32
    %c0_i32_0 = arith.constant 0 : i32
    %c0_i32_1 = arith.constant 0 : i32
    return %c0_i32, %c0_i32_0 : i32, i32
  }
  func.func @transform_24(%arg0: i32) -> (i32, i32) {
    %c0_i32 = arith.constant 0 : i32
    %c0_i32_0 = arith.constant 0 : i32
    %c0_i32_1 = arith.constant 0 : i32
    return %c0_i32, %c0_i32_0 : i32, i32
  }
  func.func @transform_25(%arg0: i32) -> (i32, i32, i32) {
    %c0_i32 = arith.constant 0 : i32
    %c0_i32_0 = arith.constant 0 : i32
    %c0_i32_1 = arith.constant 0 : i32
    return %arg0, %c0_i32, %c0_i32_0 : i32, i32, i32
  }
}

</mosaic_0001>

<bundles_post_ra>
// kernel: transformer_decoder_forward.1
= control target key start
LH: loop header
LB: loop body
LE: loop exit
PB: predicated region body
PF: predicated region fallthrough
CT: control target
= control target key end

     0   :  { %s5033_s0 = inlined_call_operand.vmem [shape: f32[2,8,4], index: 0, kind: input, shape index: {}]   ;;  %s5034_s1 = inlined_call_operand.hbm [shape: f32[2,8,32], index: 1, kind: input, shape index: {}]   ;;  %s5035_s2 = inlined_call_operand.vmem [shape: f32[8,32], index: 2, kind: input, shape index: {}]   ;;  %s5036_s3 = inlined_call_operand.vmem [shape: f32[4,32], index: 3, kind: input, shape index: {}]   ;;  %s5037_s4 = inlined_call_operand.hbm [shape: f32[1,32], index: 4, kind: input, shape index: {}]   ;;  %s5038_s5 = inlined_call_operand.vmem [shape: f32[32,32], index: 5, kind: input, shape index: {}]   ;;  %s5039_s6 = inlined_call_operand.hbm [shape: f32[1,32], index: 6, kind: input, shape index: {}]   ;;  %s5040_s7 = inlined_call_operand.vmem [shape: f32[2,32,96], index: 7, kind: input, shape index: {}]   ;;  %s5041_s8 = inlined_call_operand.vmem [shape: f32[2,1,96], index: 8, kind: input, shape index: {}]   ;;  %s5042_s9 = inlined_call_operand.vmem [shape: f32[2,32,32], index: 9, kind: input, shape index: {}]   ;;  %s5043_s10 = inlined_call_operand.hbm [shape: f32[2,1,32], index: 10, kind: input, shape index: {}]   ;;  %s5044_s11 = inlined_call_operand.vmem [shape: f32[2,32,96], index: 11, kind: input, shape index: {}]   ;;  %s5045_s12 = inlined_call_operand.hbm [shape: f32[2,1,96], index: 12, kind: input, shape index: {}]   ;;  %s5046_s13 = inlined_call_operand.hbm [shape: f32[2,32,32], index: 13, kind: input, shape index: {}]   ;;  %s5047_s14 = inlined_call_operand.hbm [shape: f32[2,1,32], index: 14, kind: input, shape index: {}]   ;;  %s5048_s15 = inlined_call_operand.hbm [shape: f32[2,32,64], index: 15, kind: input, shape index: {}]   ;;  %s5049_s16 = inlined_call_operand.hbm [shape: f32[2,1,64], index: 16, kind: input, shape index: {}]   ;;  %s5050_s17 = inlined_call_operand.vmem [shape: f32[2,64,32], index: 17, kind: input, shape index: {}]   ;;  %s5051_s18 = inlined_call_operand.hbm [shape: f32[2,1,32], index: 18, kind: input, shape index: {}]   ;;  %s5052_s19 = inlined_call_operand.vmem [shape: f32[2,3,32], index: 19, kind: input, shape index: {}]   ;;  %s5053_s20 = inlined_call_operand.vmem [shape: f32[2,3,32], index: 20, kind: input, shape index: {}]   ;;  %s5054_s21 = inlined_call_operand.hbm [shape: f32[32,32], index: 21, kind: input, shape index: {}]   ;;  %s5055_s22 = inlined_call_operand.hbm [shape: f32[1,32], index: 22, kind: input, shape index: {}]   ;;  %s5056_s23 = inlined_call_operand.vmem [shape: f32[32,4], index: 23, kind: input, shape index: {}]   ;;  %s5057_s24 = inlined_call_operand.hbm [shape: f32[1,4], index: 24, kind: input, shape index: {}]   ;;  %s5058_s25 = inlined_call_operand.vmem [shape: f32[2,8,4], index: 25, kind: output, shape index: {}]  }
   0x1   :  { %5092 = sst [smem:[#allocation29_spill]] %s5033_s0 }
   0x2   :  { %5093 = sst [smem:[#allocation30_spill]] %s5034_s1 }
   0x3   :  { %5094 = sst [smem:[#allocation31_spill]] %s5035_s2 }
   0x4   :  { %5095 = sst [smem:[#allocation32_spill]] %s5036_s3 }
   0x5   :  { %5096 = sst [smem:[#allocation33_spill]] %s5037_s4 }
   0x6   :  { %5097 = sst [smem:[#allocation34_spill]] %s5038_s5 }
   0x7   :  { %5098 = sst [smem:[#allocation35_spill]] %s5039_s6 }
   0x8   :  { %5099 = sst [smem:[#allocation36_spill]] %s5040_s7 }
   0x9   :  { %5100 = sst [smem:[#allocation37_spill]] %s5041_s8 }
   0xa   :  { %5101 = sst [smem:[#allocation38_spill]] %s5042_s9 }
   0xb   :  { %5102 = sst [smem:[#allocation39_spill]] %s5043_s10 }
   0xc   :  { %5103 = sst [smem:[#allocation40_spill]] %s5045_s12 }
   0xd   :  { %5104 = sst [smem:[#allocation41_spill]] %s5046_s13 }
   0xe   :  { %5105 = sst [smem:[#allocation42_spill]] %s5047_s14 }
   0xf   :  { %5106 = sst [smem:[#allocation43_spill]] %s5048_s15 }
  0x10   :  { %5107 = sst [smem:[#allocation44_spill]] %s5050_s17 }
  0x11   :  { %5108 = sst [smem:[#allocation45_spill]] %s5051_s18 }
  0x12   :  { %5109 = sst [smem:[#allocation46_spill]] %s5052_s19 }
  0x13   :  { %5110 = sst [smem:[#allocation47_spill]] %s5053_s20 }
  0x14   :  { %5111 = sst [smem:[#allocation48_spill]] %s5056_s23 }
  0x15   :  { %5112 = sst [smem:[#allocation49_spill]] %s5058_s25 }
  0x16   :  { %30 = vsyncpa [#allocation3], 0 }
  0x17   :  { %32 = vsyncpa [#allocation3 + $0x1], 0 }
  0x18   :  { %33 = vsyncpa [#allocation5], 0 }
  0x19   :  { %34 = vsyncpa [#allocation8], 0 }
  0x1a   :  { %35 = vsyncpa [#allocation11], 0 }
  0x1b   :  { %36 = vsyncpa [#allocation14], 0 }
  0x1c   :  { %37 = vsyncpa [#allocation17], 0 }
  0x1d   :  { %38 = vsyncpa [#allocation20], 0  ;;  %s4356_s29 = smov 0   ;;  %s4358_s2 = smov 0  }
  0x1e   :  { %s4360_s6 = smov 0   ;;  %s4362_s30 = smov 0  }
  0x1f LB: > { %s5113_s26 = sld [smem:[#allocation33_spill]]  ;;  %s4380_s8 = sadd.s32 4294967295, %s4196_s30   ;;  %s4196_s30 = sphi %s4362_s30, %s5157_s30   ;;  %s4192_s6 = sphi %s4360_s6, %s5156_s6   ;;  %s4188_s2 = sphi %s4358_s2, %s5155_s2   ;;  %s4184_s29 = sphi %s4356_s29, %s5154_s29  }
  0x20   : > { %p3318_p0 = scmp.ge.s32.totalorder %s4196_s30, 1  ;;  %p91_p1 = scmp.eq.s32.totalorder %s4380_s8, 0 }
  0x21   : > { %p610_p2 = scmp.lt.s32.totalorder %s4196_s30, 3  ;;  %s4198_s4 = smov [#allocation4]  }
  0x22   : > { %s630_s28 = sshll.u32 %s4198_s4, 4  ;;  %s5115_s10 = sld [smem:[#allocation39_spill]]  ;;  %s631_s28 = int_to_ptr.vmem [resolvable:$true] %s630_s28 }
  0x23   : > { %p4385_p3 = pnand %p3318_p0, %p610_p2  ;;  %s4199_s3 = smov [#allocation7]  }
  0x24   : > { %s5068_s4 = smov 16   ;;  %s4201_s25 = smov 1  }
  0x25   : > { %s628_s1 = sshll.u32 %s5113_s26, 4  ;;  %p3504_p4 = pneg %p4385_p3  ;;  %s629_s1 = int_to_ptr.hbm [resolvable:$true] %s628_s1 }
  0x26   : > { %s665_s26 = sshll.u32 %s4199_s3, 4  ;;  %s5117_s13 = sld [smem:[#allocation41_spill]]  ;;  %s666_s26 = int_to_ptr.vmem [resolvable:$true] %s665_s26 }
  0x27   : > { %p4396_p5 = pnand %p3504_p4, %p91_p1  ;;  %s4202_s23 = smov [#allocation10]  }
  0x28   : > { %s663_s0 = sshll.u32 %s5115_s10, 4  ;;  %s696_s17 = sshll.u32 %s4202_s23, 4  ;;  %s664_s0 = int_to_ptr.hbm [resolvable:$true] %s663_s0  ;;  %s697_s17 = int_to_ptr.vmem [resolvable:$true] %s696_s17 }
  0x29   : > { %3507 = dma.hbm_to_vmem [thread:$0]  (!%p4396_p5), %s629_s1, 16, %s631_s28, [#allocation5]  }
  0x2a   : > { %3513 = dma.hbm_to_vmem [thread:$0]  (!%p4396_p5), %s664_s0, 32, %s666_s26, [#allocation8], %s5068_s4, %s5068_s4, %s4201_s25  }
  0x2b   : > { %s5118_s15 = sld [smem:[#allocation43_spill]]  ;;  %s5070_s28 = smov 128  }
  0x2c   : > { %s694_s10 = sshll.u32 %s5117_s13, 4  ;;  %s4204_s19 = smov 8   ;;  %s695_s10 = int_to_ptr.hbm [resolvable:$true] %s694_s10 }
  0x2d   : > { %3519 = dma.hbm_to_vmem [thread:$0]  (!%p4396_p5), %s695_s10, 1024, %s697_s17, [#allocation11], %s5070_s28, %s5070_s28, %s4204_s19  }
  0x2e   : > { %s4205_s0 = smov [#allocation13]   ;;  %s5119_s18 = sld [smem:[#allocation45_spill]] }
  0x2f   : > { %s724_s26 = sshll.u32 %s4205_s0, 4  ;;  %s788_s4 = sshll.u32 %s5055_s22, 4  ;;  %s725_s26 = int_to_ptr.vmem [resolvable:$true] %s724_s26  ;;  %s789_s4 = int_to_ptr.hbm [resolvable:$true] %s788_s4 }
  0x30   : > { %s4206_s10 = smov [#allocation16]   ;;  %s5120_s0 = smov 16  }
  0x31   : > { %s722_s1 = sshll.u32 %s5118_s15, 4  ;;  %s755_s17 = sshll.u32 %s4206_s10, 4  ;;  %s723_s1 = int_to_ptr.hbm [resolvable:$true] %s722_s1  ;;  %s756_s17 = int_to_ptr.vmem [resolvable:$true] %s755_s17 }
  0x32   : > { %3525 = dma.hbm_to_vmem [thread:$0]  (!%p4396_p5), %s723_s1, 1024, %s725_s26, [#allocation14], %s5070_s28, %s5070_s28, %s4204_s19  }
  0x33   : > { %s4207_s9 = smov [#allocation19]   ;;  %s5122_s12 = sld [smem:[#allocation40_spill]] }
  0x34   : > { %s753_s23 = sshll.u32 %s5119_s18, 4  ;;  %s790_s5 = sshll.u32 %s4207_s9, 4  ;;  %s754_s23 = int_to_ptr.hbm [resolvable:$true] %s753_s23  ;;  %s791_s5 = int_to_ptr.vmem [resolvable:$true] %s790_s5 }
  0x35   : > { %3531 = dma.hbm_to_vmem [thread:$0]  (!%p4396_p5), %s754_s23, 32, %s756_s17, [#allocation17], %s5120_s0, %s5120_s0, %s4201_s25  }
  0x36   : > { %s5121_s18 = sld [smem:[#allocation35_spill]]  ;;  %s4208_s10 = smov [#allocation6]  }
  0x37   : > { %3537 = dma.hbm_to_vmem [thread:$0]  (!%p4396_p5), %s789_s4, 16, %s791_s5, [#allocation20]  }
  0x38   : > { %s645_s28 = sshll.u32 %s4208_s10, 4  ;;  %s4209_s23 = smov [#allocation9]   ;;  %s646_s28 = int_to_ptr.vmem [resolvable:$true] %s645_s28 }
  0x39   : > { %s680_s3 = sshll.u32 %s5122_s12, 4  ;;  %s682_s17 = sshll.u32 %s4209_s23, 4  ;;  %s681_s3 = int_to_ptr.hbm [resolvable:$true] %s680_s3  ;;  %s683_s17 = int_to_ptr.vmem [resolvable:$true] %s682_s17 }
  0x3a   : > { %s5123_s14 = sld [smem:[#allocation42_spill]]  ;;  %s736_s5 = sshll.u32 %s5049_s16, 4  ;;  %s737_s5 = int_to_ptr.hbm [resolvable:$true] %s736_s5 }
  0x3b   : > { %3516 = dma.hbm_to_vmem [thread:$0]  (!%p4396_p5), %s681_s3, 32, %s683_s17, [#allocation8], %s5120_s0, %s5120_s0, %s4201_s25  }
  0x3c   : > { %s643_s1 = sshll.u32 %s5121_s18, 4  ;;  %s4210_s26 = smov [#allocation12]   ;;  %s644_s1 = int_to_ptr.hbm [resolvable:$true] %s643_s1 }
  0x3d   : > { %3510 = dma.hbm_to_vmem [thread:$0]  (!%p4396_p5), %s644_s1, 16, %s646_s28, [#allocation5]  }
  0x3e   : > { %s710_s28 = sshll.u32 %s4210_s26, 4  ;;  %s4211_s1 = smov [#allocation15]   ;;  %s711_s28 = int_to_ptr.vmem [resolvable:$true] %s710_s28 }
  0x3f   : > { %s738_s20 = sshll.u32 %s4211_s1, 4  ;;  %s773_s23 = sshll.u32 %s5054_s21, 4  ;;  %s739_s20 = int_to_ptr.vmem [resolvable:$true] %s738_s20  ;;  %s774_s23 = int_to_ptr.hbm [resolvable:$true] %s773_s23 }
  0x40   : > { %s708_s18 = sshll.u32 %s5123_s14, 4  ;;  %s803_s15 = sshll.u32 %s5057_s24, 4  ;;  %s709_s18 = int_to_ptr.hbm [resolvable:$true] %s708_s18  ;;  %s804_s15 = int_to_ptr.hbm [resolvable:$true] %s803_s15 }
  0x41   : > { %3522 = dma.hbm_to_vmem [thread:$0]  (!%p4396_p5), %s709_s18, 32, %s711_s28, [#allocation11], %s5120_s0, %s5120_s0, %s4201_s25  }
  0x42   : > { %3528 = dma.hbm_to_vmem [thread:$0]  (!%p4396_p5), %s737_s5, 32, %s739_s20, [#allocation14], %s5120_s0, %s5120_s0, %s4201_s25  }
  0x43   : > { %s4212_s18 = smov [#allocation18]   ;;  %s5124_s9 = smov 128  }
  0x44   : > { %s775_s4 = sshll.u32 %s4212_s18, 4  ;;  %s4213_s25 = smov [#allocation21]   ;;  %s776_s4 = int_to_ptr.vmem [resolvable:$true] %s775_s4 }
  0x45   : > { %3534 = dma.hbm_to_vmem [thread:$0]  (!%p4396_p5), %s774_s23, 512, %s776_s4, [#allocation17], %s5124_s9, %s5124_s9, %s4204_s19  }
  0x46   : > { %s805_s0 = sshll.u32 %s4213_s25, 4  ;;  %s4479_s5 = sadd.s32 1, %s4196_s30   ;;  %s806_s0 = int_to_ptr.vmem [resolvable:$true] %s805_s0 }
  0x47   : > { %3540 = dma.hbm_to_vmem [thread:$0]  (!%p4396_p5), %s804_s15, 16, %s806_s0, [#allocation20]  }
  0x48   : > { %s74_s26 = ssub.s32 %s4196_s30, %s4479_s5  ;;  %s77_s28 = sadd.s32 1, %s4192_s6 }
  0x49   : > { %p75_p6 = scmp.eq.s32.totalorder %s74_s26, 0  ;;  %p84_p7 = scmp.ne.s32.totalorder %s4192_s6, %s4188_s2 }
  0x4a   : > { %p85_p8 = scmp.eq.s32.totalorder %s4196_s30, 0  ;;  %p90_p9 = scmp.ne.s32.totalorder %s4188_s2, %s4184_s29 }
  0x4b   : > { %s4490_s1 = scalar_select %p75_p6, %s4192_s6, %s77_s28  }
  0x4c   : > { %p4494_p10 = por %p91_p1, %p90_p9  ;;  %p3557_p11 = scmp.lt.s32.totalorder %s4196_s30, 2 }
  0x4d   : > { %s823_s20 = sand.u32 1, %s4192_s6   ;;  %s3333_s7 = sshll.u32 %s4196_s30, 3 }
  0x4e   : > { %p86_p12 = por %p85_p8, %p84_p7  ;;  %s3332_s10 = sshll.u32 %s823_s20, 3 }
  0x4f   : > { %s5126_s17 = sld [smem:[#allocation30_spill]]  ;;  %s827_s18 = scalar_lea.vmem [#allocation2], %s3332_s10 }
  0x50   : > { %s835_s4 = sshll.u32 %s827_s18, 4  ;;  %p4504_p13 = pnand %p3557_p11, %p86_p12  ;;  %s836_s4 = int_to_ptr.vmem [resolvable:$true] %s835_s4 }
  0x51   : > { %s824_s9 = scalar_lea.sflag [#allocation3], %s823_s20 }
  0x52   : > { %p4112_p2 = pneg %p4504_p13 }
  0x55   : > { %s831_s13 = scalar_lea.hbm %s5126_s17, %s3333_s7  ;;  %s4115_s28 = scalar_lea.hbm %s5126_s17, 16 }
  0x56   : > { %s833_s15 = sshll.u32 %s831_s13, 4  ;;  %s834_s15 = int_to_ptr.hbm [resolvable:$true] %s833_s15 }
  0x57   : > { %s4108_s25 = sshra.s32 %s834_s15, 4  ;;  %s4109_s25 = int_to_ptr.hbm [resolvable:$true] %s4108_s25 }
  0x58   : > { %s4110_s30 = scalar_lea.hbm %s4109_s25, 8  ;;  %p4116_p6 = scmp.lt.s32.totalorder %s4109_s25, %s5126_s17 }
  0x59   : > { %p4111_p0 = scmp.ne.s32.totalorder %s4109_s25, %s4110_s30  ;;  %p4117_p7 = scmp.lt.s32.totalorder %s4115_s28, %s4110_s30 }
  0x5b   : > { %p4113_p4 = pnand %p4112_p2, %p4111_p0  ;;  %p4118_p8 = por %p4117_p7, %p4116_p6 }
  0x5d   : > { %p4114_p5 = pneg %p4113_p4 }
  0x5f   : > { %p4119_p9 = pnand %p4118_p8, %p4114_p5 }
  0x61   : > { %4122 = shalt.err (!%p4119_p9)
}
  0x62   : > { %3544 = dma.hbm_to_vmem [thread:$0]  (!%p4504_p13), %s834_s15, 128, %s836_s4, %s824_s9  }
  0x63   : > { %844 = sbr.rel (%p4385_p3) target bundleno = 7305 (0x1c89), region = 120  ;;  %s846_s20 = sand.u32 (!%p4385_p3), 1, %s4188_s2  }
  0x64   : > { %s4521_s3 = sshll.u32 (!%p4385_p3), %s846_s20, 3  ;;  %s847_s23 = scalar_lea.sflag (!%p4385_p3), [#allocation3], %s846_s20 }
  0x65   : > { %s850_s13 = scalar_lea.vmem (!%p4385_p3), [#allocation2], %s4521_s3 }
  0x68   : > { %4155 = dma.done.wait (%p4494_p10), %s847_s23, 128  }
  0x69   : > { %4157 = vsyncadd (%p4494_p10), %s847_s23, 4294967168 }
  0x6a   : > { %4159 = dma.done.wait (%p91_p1), [#allocation5], 32  }
  0x6b   : > { %4161 = vsyncadd (%p91_p1), [#allocation5], 4294967264 }
  0x6c   : > { %4163 = dma.done.wait (%p91_p1), [#allocation8], 64  }
  0x6d   : > { %4165 = vsyncadd (%p91_p1), [#allocation8], 4294967232 }
  0x6e   : > { %4167 = dma.done.wait (%p91_p1), [#allocation11], 1056  }
  0x6f   : > { %4169 = vsyncadd (%p91_p1), [#allocation11], 4294966240 }
  0x70   : > { %4171 = dma.done.wait (%p91_p1), [#allocation14], 1056  }
  0x71   : > { %4173 = vsyncadd (%p91_p1), [#allocation14], 4294966240 }
  0x72   : > { %4175 = dma.done.wait (%p91_p1), [#allocation17], 544  }
  0x73   : > { %4177 = vsyncadd (%p91_p1), [#allocation17], 4294966752 }
  0x74   : > { %4179 = dma.done.wait (%p91_p1), [#allocation20], 32  }
  0x75   : > { %4181 = vsyncadd (%p91_p1), [#allocation20], 4294967264  ;;  %p981_p3 = scmp.lt.s32.totalorder %s4380_s8, 1  ;;  %vm1000_vm0 = vcmask 1043456   ;;  %s5128_s18 = sld [smem:[#allocation29_spill]]  ;;  %vm996_vm1 = vcmask 31744   ;;  %v1059_v28 = vlaneseq }
  0x76   : > { %s5129_s25 = sld [smem:[#allocation32_spill]]  ;;  %v3650_v7 = vld [vmem:[#allocation4] ss:$0 sm:$0xff]  ;;  %vm1033_vm2 = vcmask 261120   ;;  %v3651_v14 = vld [vmem:[#allocation6] ss:$0 sm:$0xff] }
  0x77   : > { %s5159_s8 = smov (!%p981_p3, %s4380_s8), 1  ;;  %s5130_s26 = sld [smem:[#allocation34_spill]]  ;;  %vm1129_vm3 = vcmask 64512   ;;  %v1060_v29 = vshrl.u32 %v1059_v28, 7  ;;  %v1062_v30 = vand.u32 127, %v1059_v28  ;;  %vm2011_vm12 = vcmask 523264  }
  0x78   : > { %s5071_s27 = sshll.u32 %s5159_s8, 3  ;;  %s5132_s20 = sld [smem:[#allocation31_spill]] }
  0x79   : > { %s5133_s15 = sld [smem:[#allocation37_spill]]  ;;  %s5075_s29 = smov 64   ;;  %vm4624_vm4 = vcmp.gt.s32.totalorder %v1062_v30, %v1060_v29 }
  0x7a   : > { %s5088_s9 = smov 96   ;;  %s5076_s30 = smov 80  }
  0x7b   : > { %s984_s4 = scalar_lea.vmem %s5128_s18, %s5071_s27  ;;  %s5086_s18 = smov 120  }
  0x7c   : > { %v991_v0 = vld [vmem:[%s5129_s25] sm:$0xf]  ;;  %s5080_s25 = smov 88   ;;  %s5084_s0 = smov 112  }
  0x7d   : > { %v989_v1 = vld [vmem:[%s984_s4] sm:$0xff]  ;;  %3350 = vmatpush.msk.msra.mxu2 %vm1000_vm0, %v991_v0  ;;  %v1028_v2 = vld [vmem:[%s5130_s26 + $0x18] sm:$0xff]  ;;  %v1027_v3 = vld [vmem:[%s5130_s26 + $0x10] sm:$0xff]  ;;  %s5131_s4 = sld [smem:[#allocation36_spill]]  ;;  %s5078_s28 = smov 72  }
  0x7e   : > { %3351 = vmatmul.msk.f32.vlgmr.msra.gmra.mxu2 %vm996_vm1, %v989_v1  ;;  %1049 = vmatpush.msra.mxu1 %v1028_v2  ;;  %v1026_v4 = vld [vmem:[%s5130_s26 + $0x8] sm:$0xff]  ;;  %v1025_v5 = vld [vmem:[%s5130_s26] sm:$0xff]  ;;  %s5072_s7 = smov 56   ;;  %s5136_s23 = sld [smem:[#allocation38_spill]] }
  0x7f   : > { %v1057_v16 = vld [vmem:[%s5132_s20] sm:$0xff]  ;;  %s5082_s19 = smov 104   ;;  %s5073_s10 = smov 40  }
  0x80   : > { %1050 = vmatpush.msra.mxu1 %v1027_v3  ;;  %v3652_v19 = vld [vmem:[%s5133_s15] ss:$0 sm:$0xff]  ;;  %s5074_s27 = smov 48   ;;  %s5137_s3 = sld [smem:[#allocation46_spill]] }
  0x81   : > { %s5147_s20 = smov 104   ;;  %s5153_s12 = sld [smem:[#allocation49_spill]] }
  0x82   : > { %1051 = vmatpush.msra.mxu1 %v1026_v4 }
  0x83   : > { %v1067_v6 = vld [vmem:[%s5131_s4 + $0x18] sm:$0xff]  ;;  %v1066_v11 = vld [vmem:[%s5131_s4 + $0x10] sm:$0xff]  ;;  %v1065_v12 = vld [vmem:[%s5131_s4 + $0x8] sm:$0xff] }
  0x84   : > { %1052 = vmatpush.msra.mxu1 %v1025_v5  ;;  %1118 = vmatpush.msrb.mxu2 %v1067_v6  ;;  %v1064_v13 = vld [vmem:[%s5131_s4] sm:$0xff]  ;;  %v1070_v57 = vld [vmem:[%s5136_s23 + $0x8] sm:$0xff] }
  0x85   : > { %v1069_v40 = vld [vmem:[%s5136_s23] sm:$0xff] }
  0x86   : > { %1119 = vmatpush.msrb.mxu2 %v1066_v11 }
  0x88   : > { %1120 = vmatpush.msrb.mxu2 %v1065_v12 }
  0x8a   : > { %1121 = vmatpush.msrb.mxu2 %v1064_v13 }
  0x8c   : > { %1278 = vmatpush.msra.mxu2 %v1070_v57 }
 0x101   : > { %v1021_v8 = vpop.f32.mrf.mxu2 }
 0x102   : > { %v1022_v9 = vadd.f32 %v3650_v7, %v1021_v8 }
 0x104   : > { %3666 = vtanh.f32 %v1022_v9 }
 0x10a   : > { %v3667_v10 = vpop.eup %3666 }
 0x10b   : > { %3352 = vmatmul.msk.f32.vlgmr.msra.gmra.mxu1 %vm1033_vm2, %v3667_v10 }
 0x188   : > { %v1054_v15 = vpop.f32.mrf.mxu1 }
 0x189   : > { %v1055_v17 = vadd.f32 %v3651_v14, %v1054_v15 }
 0x18b   : > { %v4594_v18 = vadd.f32 %v1057_v16, %v1055_v17 }
 0x18d   : > { %3353 = vmatmul.msk.f32.vlgmr.msrb.gmra.mxu2 %vm1033_vm2, %v4594_v18 }
 0x210   : > { %v1123_v20 = vpop.f32.mrf.mxu2 }
 0x211   : > { %v4601_v21 = vadd.f32 %v3652_v19, %v1123_v20 }
 0x213   : > { %1193 = vrot.lane.b32.xlu2 %v4601_v21, %s5086_s18  ;;  %1165 = vrot.lane.b32.xlu1 %v4601_v21, %s5075_s29  ;;  %s5148_s29 = smov 48  }
 0x214   : > { %1127 = vrot.lane.b32.xlu0 %v4601_v21, %s5088_s9 }
 0x21b   : > { %1195 = vrot.lane.b32.xlu1 %v4601_v21, %s5080_s25  ;;  %s5142_s25 = sld [smem:[#allocation44_spill]] }
 0x223   : > { %1308 = vrot.lane.b32.xlu1 %v4601_v21, %s5076_s30  ;;  %s5146_s30 = smov 112  }
 0x22b   : > { %1306 = vrot.lane.b32.xlu1 %v4601_v21, %s5084_s0 }
 0x233   : > { %1399 = vrot.lane.b32.xlu1 %v4601_v21, %s5078_s28  ;;  %s5138_s28 = sld [smem:[#allocation47_spill]] }
 0x26d   : > { %v1194_v25 = vpop.permute.xlu2 %1193 }
 0x285   : > { %v1166_v22 = vpop.permute.xlu1 %1165 }
 0x286   : > { %v1128_v23 = vpop.permute.xlu0 %1127  ;;  %1186 = vmatpush.msra.mxu0 %v1166_v22  ;;  %v1071_v22 = vld [vmem:[%s5136_s23 + $0x10] sm:$0xff] }
 0x287   : > { %3354 = vmatpush.xpose.msk.msra.mxu3 %vm1129_vm3, %v1128_v23  ;;  %1391 = vmatpush.msrb.mxu2 %v1071_v22 }
 0x288   : > { %1301 = vmatpush.msrb.mxu0 %v1069_v40 }
 0x28a   : > { %3355 = vmatmul.msk.f32.vlgmr.msra.gmra.mxu3 %vm1129_vm3, %v4601_v21 }
 0x28d   : > { %v1196_v24 = vpop.permute.xlu1 %1195 }
 0x28e   : > { %3357 = vmatpush.xpose.msk.msrb.mxu3 %vm1129_vm3, %v1196_v24 }
 0x292   : > { %3358 = vmatmul.msk.f32.vlgmr.msrb.gmra.mxu3 %vm1129_vm3, %v1194_v25 }
 0x295   : > { %v1309_v26 = vpop.permute.xlu1 %1308 }
 0x296   : > { %3362 = vmatpush.xpose.msk.msra.mxu3 %vm1129_vm3, %v1309_v26 }
 0x29d   : > { %v1307_v27 = vpop.permute.xlu1 %1306 }
 0x29e   : > { %3363 = vmatmul.msk.f32.vlgmr.msra.gmra.mxu3 %vm1129_vm3, %v1307_v27 }
 0x2a5   : > { %v1400_v41 = vpop.permute.xlu1 %1399 }
 0x30d   : > { %v1151_v31 = vpop.f32.mrf.mxu3 }
 0x30e   : > { %v1154_v33 = vmul.f32 0.35355338, %v1151_v31 }
 0x310   : > { %v1155_v34 = vsel %vm4624_vm4, -1e+30, %v1154_v33 }
 0x311   : > { %v1156_v35 = vsel %vm1129_vm3, %v1155_v34, -inf }
 0x312   : > { %1157 = vmax.xlane.f32.xlu0 %v1156_v35 }
 0x315   : > { %v1218_v36 = vpop.f32.mrf.mxu3 }
 0x316   : > { %v1221_v37 = vmul.f32 0.35355338, %v1218_v36  ;;  %v3653_v36 = vld [vmem:[#allocation7] ss:$0 sm:$0xff] }
 0x318   : > { %v1222_v38 = vsel %vm4624_vm4, -1e+30, %v1221_v37 }
 0x319   : > { %v1223_v39 = vsel %vm1129_vm3, %v1222_v38, -inf }
 0x31a   : > { %1224 = vmax.xlane.f32.xlu1 %v1223_v39 }
 0x321   : > { %v1331_v53 = vpop.f32.mrf.mxu3 }
 0x322   : > { %v1334_v54 = vmul.f32 0.35355338, %v1331_v53 }
 0x324   : > { %v1335_v55 = vsel %vm4624_vm4, -1e+30, %v1334_v54 }
 0x325   : > { %v1336_v56 = vsel %vm1129_vm3, %v1335_v55, -inf }
 0x326   : > { %1232 = vrot.lane.b32.xlu0 %v4601_v21, %s5072_s7  ;;  %s5139_s7 = smov 88  }
 0x385   : > { %v1158_v42 = vpop.xlane.xlu0 %1157 }
 0x386   : > { %v1159_v43 = vsub.f32 %v1155_v34, %v1158_v42  ;;  %v1076_v42 = vld [vmem:[%s5044_s11 + $0x10] sm:$0xff] }
 0x388   : > { %v1160_v44 = vmul.f32 1.442695, %v1159_v43  ;;  %v1077_v43 = vld [vmem:[%s5044_s11 + $0x18] sm:$0xff] }
 0x38a   : > { %3668 = vpow2.f32 %v1160_v44  ;;  %v3630_v44 = vpack.i.bf16 %v1076_v42, %v1077_v43 }
 0x38d   : > { %v1225_v45 = vpop.xlane.xlu1 %1224 }
 0x38e   : > { %v1226_v46 = vsub.f32 %v1222_v38, %v1225_v45  ;;  %v4225_v45 = vmov 32.0  }
 0x390   : > { %v3669_v47 = vpop.eup %3668  ;;  %v1227_v48 = vmul.f32 1.442695, %v1226_v46  ;;  %v1075_v46 = vld [vmem:[%s5044_s11 + $0x8] sm:$0xff] }
 0x391   : > { %3356 = vmatmul.msk.f32.vlgmr.msra.gmra.mxu0 %vm1129_vm3, %v3669_v47  ;;  %v1162_v49 = vsel %vm1129_vm3, %v3669_v47, 0.0 }
 0x392   : > { %3670 = vpow2.f32 %v1227_v48  ;;  %3366 = vmatpush.xpose.msk.msra.mxu0 %vm1129_vm3, %v1400_v41  ;;  %1163 = vadd.xlane.f32.xlu2 %v1162_v49 }
 0x398   : > { %v3671_v50 = vpop.eup %3670  ;;  %v1233_v51 = vpop.permute.xlu0 %1232 }
 0x399   : > { %1253 = vmatpush.msrb.mxu1 %v1233_v51  ;;  %v1229_v52 = vsel %vm1129_vm3, %v3671_v50, 0.0 }
 0x39a   : > { %1230 = vadd.xlane.f32.xlu1 %v1229_v52  ;;  %3359 = vmatmul.msk.f32.vlgmr.msrb.gmra.mxu1 %vm1129_vm3, %v3671_v50 }
 0x3aa   : > { %1397 = vrot.lane.b32.xlu2 %v4601_v21, %s5082_s19 }
 0x3d3   : > { %1337 = vmax.xlane.f32.xlu2 %v1336_v56 }
 0x3eb   : > { %1436 = vrot.lane.b32.xlu2 %v4601_v21, %s5073_s10  ;;  %s5140_s10 = smov 72  }
 0x405   : > { %v1164_v58 = vpop.xlane.xlu2 %1163 }
 0x406   : > { %3672 = vrcp.f32 %v1164_v58 }
 0x40c   : > { %v3673_v59 = vpop.eup %3672 }
 0x40d   : > { %v1231_v60 = vpop.xlane.xlu1 %1230  ;;  %v1398_v1 = vpop.permute.xlu2 %1397 }
 0x40e   : > { %v1188_v61 = vpop.f32.mrf.mxu0  ;;  %3674 = vrcp.f32 %v1231_v60 }
 0x40f   : > { %v1192_v62 = vmul.f32 %v3673_v59, %v1188_v61 }
 0x411   : > { %3361 = vmatmul.msk.f32.vlgmr.msrb.gmra.mxu0 %vm1129_vm3, %v1192_v62 }
 0x414   : > { %v3675_v63 = vpop.eup %3674 }
 0x417   : > { %v1255_v0 = vpop.f32.mrf.mxu1 }
 0x418   : > { %v1259_v2 = vmul.f32 %v3675_v63, %v1255_v0 }
 0x419   : > { %3367 = vmatmul.msk.f32.vlgmr.msra.gmra.mxu0 %vm1129_vm3, %v1398_v1  ;;  %v4696_v1 = vld [vmem:[%s850_s13] sm:$0xff] }
 0x41a   : > { %3360 = vmatmul.msk.f32.vlgmr.msra.gmra.mxu2 %vm1129_vm3, %v1259_v2  ;;  %v3654_v2 = vld [vmem:[#allocation9] ss:$0 sm:$0xff] }
 0x41b   : > { %1544 = vmatpush.msra.mxu2 %v1077_v43 }
 0x41d   : > { %1545 = vmatpush.msra.mxu2 %v1076_v42 }
 0x41f   : > { %1546 = vmatpush.msra.mxu2 %v1075_v46 }
 0x446   : > { %v1338_v3 = vpop.xlane.xlu2 %1337 }
 0x447   : > { %v1339_v10 = vsub.f32 %v1335_v55, %v1338_v3 }
 0x449   : > { %v1340_v11 = vmul.f32 1.442695, %v1339_v10  ;;  %v4705_v10 = vld [vmem:[%s5137_s3] sm:$0x7] }
 0x44b   : > { %3676 = vpow2.f32 %v1340_v11 }
 0x44e   : > { %v1437_v4 = vpop.permute.xlu2 %1436 }
 0x44f   : > { %1457 = vmatpush.msrb.mxu3 %v1437_v4 }
 0x451   : > { %v3677_v12 = vpop.eup %3676 }
 0x452   : > { %v1342_v13 = vsel %vm1129_vm3, %v3677_v12, 0.0 }
 0x48e   : > { %v1303_v5 = vpop.f32.mrf.mxu0 }
 0x496   : > { %v1422_v6 = vpop.f32.mrf.mxu0 }
 0x497   : > { %v1425_v7 = vmul.f32 0.35355338, %v1422_v6 }
 0x499   : > { %v1426_v8 = vsel %vm4624_vm4, -1e+30, %v1425_v7 }
 0x49a   : > { %v1427_v9 = vsel %vm1129_vm3, %v1426_v8, -inf }
 0x49b   : > { %1428 = vmax.xlane.f32.xlu0 %v1427_v9 }
 0x49d   : > { %v1280_v31 = vpop.f32.mrf.mxu2 }
 0x49e   : > { %v1304_v33 = vadd.f32 %v1303_v5, %v1280_v31 }
 0x4af   : > { %1345 = vrot.lane.b32.xlu0 %v4601_v21, %s5074_s27  ;;  %v1072_v21 = vld [vmem:[%s5136_s23 + $0x18] sm:$0xff]  ;;  %s5141_s27 = smov 80  }
 0x4d9   : > { %1343 = vadd.xlane.f32.xlu0 %v1342_v13  ;;  %v4710_v13 = vld [vmem:[%s5138_s28] sm:$0x7] }
 0x50e   : > { %v1429_v14 = vpop.xlane.xlu0 %1428 }
 0x50f   : > { %v1430_v15 = vsub.f32 %v1426_v8, %v1429_v14  ;;  %v1522_v14 = vperm.slane %v4705_v10, 0 }
 0x511   : > { %v1431_v16 = vmul.f32 1.442695, %v1430_v15 }
 0x513   : > { %3678 = vpow2.f32 %v1431_v16 }
 0x519   : > { %v3679_v17 = vpop.eup %3678 }
 0x51a   : > { %3368 = vmatmul.msk.f32.vlgmr.msrb.gmra.mxu3 %vm1129_vm3, %v3679_v17  ;;  %v1433_v19 = vsel %vm1129_vm3, %v3679_v17, 0.0  ;;  %v1524_v17 = vperm.slane %v4710_v13, 0 }
 0x51b   : > { %1434 = vadd.xlane.f32.xlu1 %v1433_v19 }
 0x521   : > { %v1346_v20 = vpop.permute.xlu0 %1345 }
 0x522   : > { %1366 = vmatpush.msra.mxu1 %v1346_v20 }
 0x523   : > { %3364 = vmatmul.msk.f32.vlgmr.msra.gmra.mxu1 %vm1129_vm3, %v3677_v12 }
 0x524   : > { %1482 = vmatpush.msrb.mxu1 %v1072_v21 }
 0x54c   : > { %v1344_v24 = vpop.xlane.xlu0 %1343 }
 0x58e   : > { %v1435_v23 = vpop.xlane.xlu1 %1434 }
 0x58f   : > { %3680 = vrcp.f32 %v1435_v23 }
 0x590   : > { %3682 = vrcp.f32 %v1344_v24 }
 0x591   : > { %3684 = vrcp.f32 %v4225_v45 }
 0x595   : > { %v3681_v25 = vpop.eup %3680 }
 0x596   : > { %v3683_v28 = vpop.eup %3682 }
 0x597   : > { %v3685_v48 = vpop.eup %3684 }
 0x598   : > { %v1497_v49 = vmul.f32 32.0, %v3685_v48  ;;  %vm1501_vm5 = vweird.f32 %v3685_v48 }
 0x59a   : > { %v1498_v50 = vsub.f32 1.0, %v1497_v49 }
 0x59c   : > { %v1499_v51 = vmul.f32 %v3685_v48, %v1498_v50 }
 0x59d   : > { %v1459_v26 = vpop.f32.mrf.mxu3 }
 0x59e   : > { %v1463_v27 = vmul.f32 %v3681_v25, %v1459_v26  ;;  %v1500_v52 = vadd.f32 %v3685_v48, %v1499_v51 }
 0x5a0   : > { %v1368_v29 = vpop.f32.mrf.mxu1  ;;  %3369 = vmatmul.msk.f32.vlgmr.msrb.gmra.mxu1 %vm1129_vm3, %v1463_v27  ;;  %v4690_v53 = vsel %vm1501_vm5, %v3685_v48, %v1500_v52 }
 0x5a1   : > { %v1372_v30 = vmul.f32 %v3683_v28, %v1368_v29 }
 0x5a3   : > { %3365 = vmatmul.msk.f32.vlgmr.msrb.gmra.mxu2 %vm1129_vm3, %v1372_v30 }
 0x61d   : > { %v1484_v37 = vpop.f32.mrf.mxu1 }
 0x626   : > { %v1393_v34 = vpop.f32.mrf.mxu2 }
 0x627   : > { %v1396_v35 = vadd.f32 %v1393_v34, %v1304_v33  ;;  %v1079_v34 = vld [vmem:[#allocation10] sm:$0xff] }
 0x629   : > { %v1487_v38 = vadd.f32 %v1484_v37, %v1396_v35 }
 0x62b   : > { %v1491_v39 = vadd.f32 %v3653_v36, %v1487_v38 }
 0x62d   : > { %v1492_v40 = vadd.f32 %v1491_v39, %v4594_v18  ;;  %v1074_v18 = vld [vmem:[%s5044_s11] sm:$0xff] }
 0x62e   : > { %v3635_v47 = vpack.i.bf16 %v1074_v18, %v1075_v46  ;;  %1547 = vmatpush.msra.mxu2 %v1074_v18 }
 0x62f   : > { %v1493_v41 = vsel %vm1033_vm2, %v1492_v40, 0.0 }
 0x630   : > { %1494 = vadd.xlane.f32.xlu1 %v1493_v41  ;;  %3636 = vrot.lane.b32.xlu0 %v3635_v47, %s5088_s9 }
 0x649   : > { %3631 = vrot.lane.b32.xlu1 %v3630_v44, %s5088_s9 }
 0x651   : > { %1568 = vrot.lane.b32.xlu1 %v3654_v2, %s5088_s9 }
 0x6a2   : > { %v3637_v62 = vpop.permute.xlu0 %3636 }
 0x6a3   : > { %v1495_v54 = vpop.xlane.xlu1 %1494  ;;  %v3638_v63 = vunpack.i.l.bf16 %v3637_v62  ;;  %v3639_v0 = vunpack.i.h.bf16 %v3637_v62 }
 0x6a4   : > { %v1503_v55 = vmul.f32 %v4690_v53, %v1495_v54 }
 0x6a6   : > { %v1504_v56 = vsub.f32 %v1492_v40, %v1503_v55 }
 0x6a8   : > { %v1505_v57 = vmul.f32 %v1504_v56, %v1504_v56 }
 0x6aa   : > { %v1506_v58 = vsel %vm1033_vm2, %v1505_v57, 0.0 }
 0x6ab   : > { %1507 = vadd.xlane.f32.xlu2 %v1506_v58 }
 0x6bb   : > { %v3632_v59 = vpop.permute.xlu1 %3631 }
 0x6bc   : > { %v3634_v60 = vunpack.i.h.bf16 %v3632_v59  ;;  %v3633_v61 = vunpack.i.l.bf16 %v3632_v59 }
 0x6be   : > { %1586 = vmatpush.msrb.mxu0 %v3633_v61 }
 0x6c0   : > { %1587 = vmatpush.msrb.mxu0 %v3634_v60  ;;  %v1080_v60 = vld [vmem:[#allocation10 + $0x8] sm:$0xff] }
 0x6c2   : > { %1588 = vmatpush.msrb.mxu0 %v3638_v63 }
 0x6c3   : > { %v1569_v21 = vpop.permute.xlu1 %1568 }
 0x6c4   : > { %1589 = vmatpush.msrb.mxu0 %v3639_v0 }
 0x6c5   : > { %3371 = vmatmul.msk.f32.vlgmr.msrb.gmra.mxu0 %vm1033_vm2, %v4696_v1 }
 0x71e   : > { %v1508_v3 = vpop.xlane.xlu2 %1507 }
 0x71f   : > { %v1509_v4 = vmul.f32 %v1508_v3, %v4690_v53 }
 0x721   : > { %v1510_v5 = vadd.f32 1e-05, %v1509_v4 }
 0x723   : > { %3686 = vrsqrt.f32 %v1510_v5  ;;  %vm1517_vm7 = vweird.f32 %v1510_v5 }
 0x729   : > { %v3687_v6 = vpop.eup %3686 }
 0x72a   : > { %v1512_v7 = vmul.f32 %v3687_v6, %v1510_v5  ;;  %vm1518_vm6 = vweird.f32 %v3687_v6 }
 0x72b   : > { %vm1519_vm8 = vmor %vm1517_vm7, %vm1518_vm6 }
 0x72c   : > { %v1513_v8 = vmul.f32 %v3687_v6, %v1512_v7 }
 0x72e   : > { %v1514_v9 = vmul.f32 0.5, %v1513_v8 }
 0x730   : > { %v1515_v11 = vsub.f32 1.5, %v1514_v9 }
 0x732   : > { %v1516_v12 = vmul.f32 %v3687_v6, %v1515_v11 }
 0x734   : > { %v1520_v15 = vsel %vm1519_vm8, %v3687_v6, %v1516_v12 }
 0x735   : > { %v1521_v16 = vmul.f32 %v1520_v15, %v1504_v56 }
 0x737   : > { %v1523_v19 = vmul.f32 %v1522_v14, %v1521_v16 }
 0x739   : > { %v4714_v20 = vadd.f32 %v1524_v17, %v1523_v19 }
 0x73b   : > { %3370 = vmatmul.msk.f32.vlgmr.msra.gmra.mxu2 %vm1033_vm2, %v4714_v20 }
 0x742   : > { %v1591_v22 = vpop.f32.mrf.mxu0 }
 0x743   : > { %v4718_v23 = vadd.f32 %v1591_v22, %v1569_v21  ;;  %v1082_v21 = vld [vmem:[#allocation10 + $0x18] sm:$0xff]  ;;  %v1081_v22 = vld [vmem:[#allocation10 + $0x10] sm:$0xff] }
 0x745   : > { %1660 = vrot.lane.b32.xlu0 %v4718_v23, %s5086_s18  ;;  %1630 = vrot.lane.b32.xlu2 %v4718_v23, %s5088_s9  ;;  %s5144_s9 = smov 96  }
 0x746   : > { %3372 = vmatpush.xpose.msk.msra.mxu3 %vm1129_vm3, %v4718_v23 }
 0x74a   : > { %1742 = vmatpush.msrb.mxu3 %v1080_v60 }
 0x79f   : > { %v1631_v26 = vpop.permute.xlu2 %1630 }
 0x7a0   : > { %1651 = vmatpush.msra.mxu1 %v1631_v26 }
 0x7a2   : > { %1765 = vmatpush.msrb.mxu1 %v1079_v34 }
 0x7b7   : > { %v1661_v27 = vpop.permute.xlu0 %1660 }
 0x7b8   : > { %3375 = vmatpush.xpose.msk.msrb.mxu2 %vm1129_vm3, %v1661_v27 }
 0x7be   : > { %v1549_v24 = vpop.f32.mrf.mxu2 }
 0x7bf   : > { %v1550_v25 = vadd.f32 %v3654_v2, %v1549_v24 }
 0x7c1   : > { %1658 = vrot.lane.b32.xlu2 %v1550_v25, %s5086_s18  ;;  %3373 = vmatmul.msk.f32.vlgmr.msra.gmra.mxu3 %vm1129_vm3, %v1550_v25  ;;  %s5143_s18 = smov 64  }
 0x7c2   : > { %1854 = vmatpush.msra.mxu3 %v1081_v22 }
 0x7c9   : > { %1772 = vrot.lane.b32.xlu2 %v4718_v23, %s5084_s0 }
 0x7d1   : > { %1862 = vrot.lane.b32.xlu2 %v4718_v23, %s5082_s19 }
 0x7d9   : > { %1860 = vrot.lane.b32.xlu2 %v1550_v25, %s5082_s19  ;;  %s5150_s19 = smov 56  }
 0x81b   : > { %v1659_v28 = vpop.permute.xlu2 %1658 }
 0x81c   : > { %3376 = vmatmul.msk.f32.vlgmr.msrb.gmra.mxu2 %vm1129_vm3, %v1659_v28 }
 0x823   : > { %v1773_v29 = vpop.permute.xlu2 %1772 }
 0x824   : > { %3380 = vmatpush.xpose.msk.msra.mxu2 %vm1129_vm3, %v1773_v29 }
 0x82b   : > { %v1863_v39 = vpop.permute.xlu2 %1862 }
 0x833   : > { %v1861_v55 = vpop.permute.xlu2 %1860 }
 0x844   : > { %v1617_v30 = vpop.f32.mrf.mxu3 }
 0x845   : > { %v1620_v31 = vmul.f32 0.35355338, %v1617_v30 }
 0x847   : > { %v1621_v33 = vsel %vm1129_vm3, %v1620_v31, -inf }
 0x848   : > { %1622 = vmax.xlane.f32.xlu1 %v1621_v33 }
 0x861   : > { %1770 = vrot.lane.b32.xlu1 %v1550_v25, %s5084_s0  ;;  %s5145_s0 = smov 120  }
 0x869   : > { %1696 = vrot.lane.b32.xlu1 %v4718_v23, %s5139_s7 }
 0x871   : > { %1898 = vrot.lane.b32.xlu1 %v4718_v23, %s5140_s10 }
 0x89f   : > { %v1683_v41 = vpop.f32.mrf.mxu2 }
 0x8a0   : > { %v1686_v42 = vmul.f32 0.35355338, %v1683_v41 }
 0x8a2   : > { %v1687_v43 = vsel %vm1129_vm3, %v1686_v42, -inf }
 0x8bb   : > { %v1623_v35 = vpop.xlane.xlu1 %1622 }
 0x8bc   : > { %v1624_v36 = vsub.f32 %v1620_v31, %v1623_v35 }
 0x8be   : > { %v1625_v37 = vmul.f32 1.442695, %v1624_v36  ;;  %v3655_v36 = vld [vmem:[#allocation12] ss:$0 sm:$0xff] }
 0x8c0   : > { %3688 = vpow2.f32 %v1625_v37 }
 0x8c6   : > { %v3689_v38 = vpop.eup %3688 }
 0x8c7   : > { %3374 = vmatmul.msk.f32.vlgmr.msra.gmra.mxu1 %vm1129_vm3, %v3689_v38  ;;  %v1627_v40 = vsel %vm1129_vm3, %v3689_v38, 0.0 }
 0x8c8   : > { %3384 = vmatpush.xpose.msk.msra.mxu1 %vm1129_vm3, %v1863_v39  ;;  %1628 = vadd.xlane.f32.xlu0 %v1627_v40 }
 0x8d0   : > { %1688 = vmax.xlane.f32.xlu0 %v1687_v43 }
 0x8d3   : > { %v1771_v44 = vpop.permute.xlu1 %1770 }
 0x8d4   : > { %3381 = vmatmul.msk.f32.vlgmr.msra.gmra.mxu2 %vm1129_vm3, %v1771_v44 }
 0x8db   : > { %v1697_v45 = vpop.permute.xlu1 %1696 }
 0x8dc   : > { %1717 = vmatpush.msra.mxu0 %v1697_v45 }
 0x8e3   : > { %v1899_v18 = vpop.permute.xlu1 %1898 }
 0x8e4   : > { %1919 = vmatpush.msrb.mxu2 %v1899_v18 }
 0x93b   : > { %v1629_v46 = vpop.xlane.xlu0 %1628 }
 0x93c   : > { %3690 = vrcp.f32 %v1629_v46  ;;  %v1087_v46 = vld [vmem:[#allocation13 + $0x18] sm:$0xff] }
 0x942   : > { %v3691_v48 = vpop.eup %3690 }
 0x943   : > { %v1689_v47 = vpop.xlane.xlu0 %1688 }
 0x944   : > { %v1690_v49 = vsub.f32 %v1686_v42, %v1689_v47  ;;  %v1653_v50 = vpop.f32.mrf.mxu1  ;;  %v1086_v47 = vld [vmem:[#allocation13 + $0x10] sm:$0xff] }
 0x945   : > { %v1657_v51 = vmul.f32 %v3691_v48, %v1653_v50  ;;  %v1085_v48 = vld [vmem:[#allocation13 + $0x8] sm:$0xff]  ;;  %v1095_v50 = vld [vmem:[%s5142_s25 + $0x30] sm:$0xff] }
 0x946   : > { %v1691_v52 = vmul.f32 1.442695, %v1690_v49  ;;  %v1084_v49 = vld [vmem:[#allocation13] sm:$0xff] }
 0x947   : > { %3379 = vmatmul.msk.f32.vlgmr.msrb.gmra.mxu1 %vm1129_vm3, %v1657_v51  ;;  %v1094_v51 = vld [vmem:[%s5142_s25 + $0x28] sm:$0xff] }
 0x948   : > { %3692 = vpow2.f32 %v1691_v52 }
 0x94e   : > { %v3693_v54 = vpop.eup %3692 }
 0x94f   : > { %3377 = vmatmul.msk.f32.vlgmr.msra.gmra.mxu0 %vm1129_vm3, %v3693_v54  ;;  %3385 = vmatmul.msk.f32.vlgmr.msra.gmra.mxu1 %vm1129_vm3, %v1861_v55  ;;  %v1693_v56 = vsel %vm1129_vm3, %v3693_v54, 0.0  ;;  %v1093_v55 = vld [vmem:[%s5142_s25 + $0x20] sm:$0xff] }
 0x950   : > { %1694 = vadd.xlane.f32.xlu1 %v1693_v56 }
 0x957   : > { %v1795_v57 = vpop.f32.mrf.mxu2 }
 0x958   : > { %v1798_v58 = vmul.f32 0.35355338, %v1795_v57  ;;  %v1092_v57 = vld [vmem:[%s5142_s25 + $0x18] sm:$0xff] }
 0x95a   : > { %v1799_v59 = vsel %vm1129_vm3, %v1798_v58, -inf }
 0x95b   : > { %1800 = vmax.xlane.f32.xlu2 %v1799_v59 }
 0x9c3   : > { %v1695_v61 = vpop.xlane.xlu1 %1694 }
 0x9c4   : > { %v1767_v62 = vpop.f32.mrf.mxu1  ;;  %3694 = vrcp.f32 %v1695_v61 }
 0x9ca   : > { %v3695_v63 = vpop.eup %3694 }
 0x9cc   : > { %v1719_v0 = vpop.f32.mrf.mxu0  ;;  %v1885_v2 = vpop.f32.mrf.mxu1 }
 0x9cd   : > { %v1723_v3 = vmul.f32 %v3695_v63, %v1719_v0  ;;  %v1888_v4 = vmul.f32 0.35355338, %v1885_v2  ;;  %v1977_v0 = vperm.slane %v4705_v10, 1 }
 0x9ce   : > { %v1801_v6 = vpop.xlane.xlu2 %1800 }
 0x9cf   : > { %3378 = vmatmul.msk.f32.vlgmr.msrb.gmra.mxu3 %vm1129_vm3, %v1723_v3  ;;  %v1889_v5 = vsel %vm1129_vm3, %v1888_v4, -inf  ;;  %v1802_v7 = vsub.f32 %v1798_v58, %v1801_v6 }
 0x9d0   : > { %1890 = vmax.xlane.f32.xlu0 %v1889_v5  ;;  %1999 = vmatpush.msrb.mxu3 %v1087_v46 }
 0x9d1   : > { %v1803_v8 = vmul.f32 1.442695, %v1802_v7  ;;  %v1091_v7 = vld [vmem:[%s5142_s25 + $0x10] sm:$0xff] }
 0x9d2   : > { %2000 = vmatpush.msrb.mxu3 %v1086_v47  ;;  %v3658_v47 = vld [vmem:[%s5133_s15 + $0x1] ss:$0 sm:$0xff] }
 0x9d3   : > { %3696 = vpow2.f32 %v1803_v8  ;;  %v1090_v8 = vld [vmem:[%s5142_s25 + $0x8] sm:$0xff] }
 0x9d4   : > { %2001 = vmatpush.msrb.mxu3 %v1085_v48 }
 0x9d6   : > { %2002 = vmatpush.msrb.mxu3 %v1084_v49 }
 0x9d9   : > { %v3697_v9 = vpop.eup %3696 }
 0x9da   : > { %v1805_v11 = vsel %vm1129_vm3, %v3697_v9, 0.0 }
 0x9e4   : > { %1808 = vrot.lane.b32.xlu0 %v4718_v23, %s5141_s27 }
 0xa0e   : > { %1806 = vadd.xlane.f32.xlu0 %v1805_v11  ;;  %v3656_v11 = vld [vmem:[#allocation15] ss:$0 sm:$0xff] }
 0xa43   : > { %v1891_v12 = vpop.xlane.xlu0 %1890 }
 0xa44   : > { %v1892_v14 = vsub.f32 %v1888_v4, %v1891_v12  ;;  %v1979_v4 = vperm.slane %v4710_v13, 1 }
 0xa46   : > { %v1893_v15 = vmul.f32 1.442695, %v1892_v14 }
 0xa48   : > { %3698 = vpow2.f32 %v1893_v15 }
 0xa4e   : > { %v3699_v16 = vpop.eup %3698 }
 0xa4f   : > { %3386 = vmatmul.msk.f32.vlgmr.msrb.gmra.mxu2 %vm1129_vm3, %v3699_v16  ;;  %v1895_v17 = vsel %vm1129_vm3, %v3699_v16, 0.0  ;;  %v3657_v16 = vld [vmem:[#allocation16] ss:$0 sm:$0xff] }
 0xa50   : > { %1896 = vadd.xlane.f32.xlu2 %v1895_v17 }
 0xa52   : > { %v1744_v31 = vpop.f32.mrf.mxu3 }
 0xa53   : > { %v1768_v33 = vadd.f32 %v1767_v62, %v1744_v31  ;;  %v3390_v31 = vld [vmem:[%s5131_s4 + $0x20] sm:$0xff] }
 0xa56   : > { %v1809_v19 = vpop.permute.xlu0 %1808 }
 0xa57   : > { %1829 = vmatpush.msrb.mxu0 %v1809_v19 }
 0xa58   : > { %3382 = vmatmul.msk.f32.vlgmr.msrb.gmra.mxu0 %vm1129_vm3, %v3697_v9  ;;  %v1089_v9 = vld [vmem:[%s5142_s25] sm:$0xff] }
 0xa59   : > { %1944 = vmatpush.msra.mxu0 %v1082_v21 }
 0xa81   : > { %v1807_v24 = vpop.xlane.xlu0 %1806 }
 0xac3   : > { %v1897_v23 = vpop.xlane.xlu2 %1896 }
 0xac4   : > { %3700 = vrcp.f32 %v1897_v23 }
 0xac5   : > { %3702 = vrcp.f32 %v1807_v24 }
 0xaca   : > { %v3701_v25 = vpop.eup %3700 }
 0xacb   : > { %v3703_v28 = vpop.eup %3702 }
 0xad2   : > { %v1921_v26 = vpop.f32.mrf.mxu2 }
 0xad3   : > { %v1925_v27 = vmul.f32 %v3701_v25, %v1921_v26 }
 0xad5   : > { %v1831_v29 = vpop.f32.mrf.mxu0  ;;  %3387 = vmatmul.msk.f32.vlgmr.msra.gmra.mxu0 %vm1129_vm3, %v1925_v27 }
 0xad6   : > { %v1835_v30 = vmul.f32 %v3703_v28, %v1831_v29  ;;  %v3393_v28 = vld [vmem:[%s5131_s4 + $0x38] sm:$0xff]  ;;  %v3392_v29 = vld [vmem:[%s5131_s4 + $0x30] sm:$0xff] }
 0xad7   : > { %2130 = vmatpush.msra.mxu2 %v3393_v28 }
 0xad8   : > { %3383 = vmatmul.msk.f32.vlgmr.msra.gmra.mxu3 %vm1129_vm3, %v1835_v30  ;;  %v3391_v30 = vld [vmem:[%s5131_s4 + $0x28] sm:$0xff] }
 0xad9   : > { %2131 = vmatpush.msra.mxu2 %v3392_v29 }
 0xadb   : > { %2132 = vmatpush.msra.mxu2 %v3391_v30 }
 0xadd   : > { %2133 = vmatpush.msra.mxu2 %v3390_v31 }
 0xb52   : > { %v1946_v37 = vpop.f32.mrf.mxu0 }
 0xb5b   : > { %v1856_v34 = vpop.f32.mrf.mxu3 }
 0xb5c   : > { %v1859_v35 = vadd.f32 %v1856_v34, %v1768_v33 }
 0xb5e   : > { %v1949_v38 = vadd.f32 %v1946_v37, %v1859_v35 }
 0xb60   : > { %v1953_v39 = vadd.f32 %v3655_v36, %v1949_v38 }
 0xb62   : > { %v1954_v40 = vadd.f32 %v1953_v39, %v4714_v20  ;;  %v1096_v20 = vld [vmem:[%s5142_s25 + $0x38] sm:$0xff] }
 0xb63   : > { %2023 = vmatpush.msrb.mxu1 %v1096_v20 }
 0xb64   : > { %v1955_v41 = vsel %vm1033_vm2, %v1954_v40, 0.0 }
 0xb65   : > { %1956 = vadd.xlane.f32.xlu2 %v1955_v41  ;;  %2024 = vmatpush.msrb.mxu1 %v1095_v50 }
 0xb67   : > { %2025 = vmatpush.msrb.mxu1 %v1094_v51 }
 0xb69   : > { %2026 = vmatpush.msrb.mxu1 %v1093_v55 }
 0xb6b   : > { %2027 = vmatpush.msrb.mxu1 %v1092_v57 }
 0xb6d   : > { %2028 = vmatpush.msrb.mxu1 %v1091_v7 }
 0xb6f   : > { %2029 = vmatpush.msrb.mxu1 %v1090_v8 }
 0xb71   : > { %2030 = vmatpush.msrb.mxu1 %v1089_v9 }
 0xbd8   : > { %v1957_v42 = vpop.xlane.xlu2 %1956 }
 0xbd9   : > { %v1958_v43 = vmul.f32 %v1957_v42, %v4690_v53  ;;  %v2058_v42 = vperm.slane %v4705_v10, 2  ;;  %v3395_v10 = vld [vmem:[%s5136_s23 + $0x20] sm:$0xff] }
 0xbda   : > { %2312 = vmatpush.msra.mxu1 %v3395_v10 }
 0xbdb   : > { %v1959_v44 = vsub.f32 %v1954_v40, %v1958_v43 }
 0xbdd   : > { %v1960_v45 = vmul.f32 %v1959_v44, %v1959_v44 }
 0xbdf   : > { %v1961_v18 = vsel %vm1033_vm2, %v1960_v45, 0.0  ;;  %v2060_v45 = vperm.slane %v4710_v13, 2 }
 0xbe0   : > { %1962 = vadd.xlane.f32.xlu2 %v1961_v18 }
 0xc53   : > { %v1963_v52 = vpop.xlane.xlu2 %1962 }
 0xc54   : > { %v1964_v54 = vmul.f32 %v1963_v52, %v4690_v53 }
 0xc56   : > { %v1965_v56 = vadd.f32 1e-05, %v1964_v54 }
 0xc58   : > { %3704 = vrsqrt.f32 %v1965_v56  ;;  %vm1972_vm10 = vweird.f32 %v1965_v56 }
 0xc5e   : > { %v3705_v58 = vpop.eup %3704 }
 0xc5f   : > { %v1967_v59 = vmul.f32 %v3705_v58, %v1965_v56  ;;  %vm1973_vm9 = vweird.f32 %v3705_v58 }
 0xc60   : > { %vm1974_vm11 = vmor %vm1972_vm10, %vm1973_vm9 }
 0xc61   : > { %v1968_v60 = vmul.f32 %v3705_v58, %v1967_v59 }
 0xc63   : > { %v1969_v61 = vmul.f32 0.5, %v1968_v60 }
 0xc65   : > { %v1970_v62 = vsub.f32 1.5, %v1969_v61 }
 0xc67   : > { %v1971_v63 = vmul.f32 %v3705_v58, %v1970_v62 }
 0xc69   : > { %v1975_v2 = vsel %vm1974_vm11, %v3705_v58, %v1971_v63 }
 0xc6a   : > { %v1976_v3 = vmul.f32 %v1975_v2, %v1959_v44 }
 0xc6c   : > { %v1978_v5 = vmul.f32 %v1977_v0, %v1976_v3 }
 0xc6e   : > { %v1980_v6 = vadd.f32 %v1979_v4, %v1978_v5 }
 0xc70   : > { %3388 = vmatmul.msk.f32.vlgmr.msrb.gmra.mxu3 %vm1033_vm2, %v1980_v6 }
 0xcf3   : > { %v2004_v12 = vpop.f32.mrf.mxu3 }
 0xcf4   : > { %v2005_v14 = vadd.f32 %v3656_v11, %v2004_v12 }
 0xcf6   : > { %v2007_v15 = vmax.f32 %v2005_v14, 0.0 }
 0xcf8   : > { %3389 = vmatmul.msk.f32.vlgmr.msrb.gmra.mxu1 %vm2011_vm12, %v2007_v15 }
 0xd75   : > { %v2032_v17 = vpop.f32.mrf.mxu1 }
 0xd76   : > { %v2033_v19 = vadd.f32 %v3657_v16, %v2032_v17 }
 0xd78   : > { %v2035_v21 = vadd.f32 %v2033_v19, %v1980_v6 }
 0xd7a   : > { %v2036_v22 = vsel %vm1033_vm2, %v2035_v21, 0.0 }
 0xd7b   : > { %2037 = vadd.xlane.f32.xlu1 %v2036_v22 }
 0xdee   : > { %v2038_v23 = vpop.xlane.xlu1 %2037 }
 0xdef   : > { %v2039_v24 = vmul.f32 %v2038_v23, %v4690_v53 }
 0xdf1   : > { %v2040_v25 = vsub.f32 %v2035_v21, %v2039_v24 }
 0xdf3   : > { %v2041_v26 = vmul.f32 %v2040_v25, %v2040_v25 }
 0xdf5   : > { %v2042_v27 = vsel %vm1033_vm2, %v2041_v26, 0.0 }
 0xdf6   : > { %2043 = vadd.xlane.f32.xlu2 %v2042_v27 }
 0xe69   : > { %v2044_v33 = vpop.xlane.xlu2 %2043 }
 0xe6a   : > { %v2045_v34 = vmul.f32 %v2044_v33, %v4690_v53 }
 0xe6c   : > { %v2046_v35 = vadd.f32 1e-05, %v2045_v34 }
 0xe6e   : > { %3706 = vrsqrt.f32 %v2046_v35  ;;  %vm2053_vm14 = vweird.f32 %v2046_v35 }
 0xe74   : > { %v3707_v36 = vpop.eup %3706 }
 0xe75   : > { %v2048_v37 = vmul.f32 %v3707_v36, %v2046_v35  ;;  %vm2054_vm13 = vweird.f32 %v3707_v36 }
 0xe76   : > { %vm2055_vm15 = vmor %vm2053_vm14, %vm2054_vm13 }
 0xe77   : > { %v2049_v38 = vmul.f32 %v3707_v36, %v2048_v37 }
 0xe79   : > { %v2050_v39 = vmul.f32 0.5, %v2049_v38 }
 0xe7b   : > { %v2051_v40 = vsub.f32 1.5, %v2050_v39 }
 0xe7d   : > { %v2052_v41 = vmul.f32 %v3707_v36, %v2051_v40 }
 0xe7f   : > { %v2056_v43 = vsel %vm2055_vm15, %v3707_v36, %v2052_v41 }
 0xe80   : > { %v2057_v44 = vmul.f32 %v2056_v43, %v2040_v25  ;;  %v3396_v43 = vld [vmem:[%s5136_s23 + $0x28] sm:$0xff] }
 0xe82   : > { %v2059_v18 = vmul.f32 %v2058_v42, %v2057_v44  ;;  %v3398_v42 = vld [vmem:[%s5136_s23 + $0x38] sm:$0xff]  ;;  %v3397_v44 = vld [vmem:[%s5136_s23 + $0x30] sm:$0xff] }
 0xe84   : > { %v4813_v46 = vadd.f32 %v2060_v45, %v2059_v18 }
 0xe86   : > { %3413 = vmatmul.msk.f32.vlgmr.msra.gmra.mxu2 %vm1033_vm2, %v4813_v46 }
 0xf09   : > { %v2135_v48 = vpop.f32.mrf.mxu2 }
 0xf0a   : > { %v4820_v49 = vadd.f32 %v3658_v47, %v2135_v48 }
 0xf0c   : > { %2176 = vrot.lane.b32.xlu0 %v4820_v49, %s5143_s18  ;;  %2139 = vrot.lane.b32.xlu1 %v4820_v49, %s5144_s9  ;;  %s5149_s18 = smov 40  }
 0xf14   : > { %2204 = vrot.lane.b32.xlu1 %v4820_v49, %s5145_s0 }
 0xf1c   : > { %2319 = vrot.lane.b32.xlu1 %v4820_v49, %s5141_s27 }
 0xf24   : > { %2410 = vrot.lane.b32.xlu1 %v4820_v49, %s5140_s10 }
 0xf7e   : > { %v2177_v13 = vpop.permute.xlu0 %2176  ;;  %v2140_v20 = vpop.permute.xlu1 %2139 }
 0xf7f   : > { %3414 = vmatpush.xpose.msk.msrb.mxu0 %vm1129_vm3, %v2140_v20  ;;  %2197 = vmatpush.msra.mxu3 %v2177_v13 }
 0xf81   : > { %2289 = vmatpush.msrb.mxu3 %v3396_v43 }
 0xf82   : > { %3415 = vmatmul.msk.f32.vlgmr.msrb.gmra.mxu0 %vm1129_vm3, %v4820_v49 }
 0xf86   : > { %v2205_v50 = vpop.permute.xlu1 %2204 }
 0xf8e   : > { %v2320_v51 = vpop.permute.xlu1 %2319 }
 0xf96   : > { %v2411_v52 = vpop.permute.xlu1 %2410 }
 0xf97   : > { %3426 = vmatpush.xpose.msk.msrb.mxu1 %vm1129_vm3, %v2411_v52 }
 0xfff   : > { %v2162_v54 = vpop.f32.mrf.mxu0 }
0x1000   : > { %v2165_v55 = vmul.f32 0.35355338, %v2162_v54 }
0x1002   : > { %v2166_v56 = vsel %vm4624_vm4, -1e+30, %v2165_v55 }
0x1003   : > { %v2167_v57 = vsel %vm1129_vm3, %v2166_v56, -inf }
0x1004   : > { %2168 = vmax.xlane.f32.xlu2 %v2167_v57 }
0x101c   : > { %2206 = vrot.lane.b32.xlu2 %v4820_v49, %s5139_s7 }
0x1024   : > { %2317 = vrot.lane.b32.xlu2 %v4820_v49, %s5146_s30 }
0x102c   : > { %2408 = vrot.lane.b32.xlu2 %v4820_v49, %s5147_s20 }
0x1077   : > { %v2169_v58 = vpop.xlane.xlu2 %2168 }
0x1078   : > { %v2170_v59 = vsub.f32 %v2166_v56, %v2169_v58 }
0x107a   : > { %v2171_v60 = vmul.f32 1.442695, %v2170_v59  ;;  %v3659_v59 = vld [vmem:[#allocation7 + $0x1] ss:$0 sm:$0xff] }
0x107c   : > { %3708 = vpow2.f32 %v2171_v60 }
0x107f   : > { %v2207_v61 = vpop.permute.xlu2 %2206 }
0x1080   : > { %3417 = vmatpush.xpose.msk.msrb.mxu2 %vm1129_vm3, %v2207_v61 }
0x1082   : > { %v3709_v62 = vpop.eup %3708 }
0x1083   : > { %3416 = vmatmul.msk.f32.vlgmr.msra.gmra.mxu3 %vm1129_vm3, %v3709_v62  ;;  %3418 = vmatmul.msk.f32.vlgmr.msrb.gmra.mxu2 %vm1129_vm3, %v2205_v50  ;;  %v2173_v63 = vsel %vm1129_vm3, %v3709_v62, 0.0 }
0x1084   : > { %3422 = vmatpush.xpose.msk.msra.mxu2 %vm1129_vm3, %v2320_v51  ;;  %2174 = vadd.xlane.f32.xlu0 %v2173_v63 }
0x1085   : > { %2402 = vmatpush.msra.mxu3 %v3397_v44 }
0x1087   : > { %v2318_v0 = vpop.permute.xlu2 %2317 }
0x108b   : > { %3423 = vmatmul.msk.f32.vlgmr.msra.gmra.mxu2 %vm1129_vm3, %v2318_v0 }
0x108f   : > { %v2409_v14 = vpop.permute.xlu2 %2408 }
0x10f7   : > { %v2175_v2 = vpop.xlane.xlu0 %2174 }
0x10f8   : > { %3710 = vrcp.f32 %v2175_v2  ;;  %v3402_v2 = vld [vmem:[%s5044_s11 + $0x38] sm:$0xff] }
0x10fe   : > { %v3711_v3 = vpop.eup %3710 }
0x1106   : > { %v2199_v4 = vpop.f32.mrf.mxu3  ;;  %v2229_v5 = vpop.f32.mrf.mxu2 }
0x1107   : > { %v2203_v6 = vmul.f32 %v3711_v3, %v2199_v4  ;;  %v2232_v7 = vmul.f32 0.35355338, %v2229_v5  ;;  %v3401_v3 = vld [vmem:[%s5044_s11 + $0x30] sm:$0xff]  ;;  %v3399_v4 = vld [vmem:[%s5044_s11 + $0x20] sm:$0xff] }
0x1109   : > { %3421 = vmatmul.msk.f32.vlgmr.msra.gmra.mxu1 %vm1129_vm3, %v2203_v6  ;;  %v2233_v8 = vsel %vm4624_vm4, -1e+30, %v2232_v7 }
0x110a   : > { %v2234_v9 = vsel %vm1129_vm3, %v2233_v8, -inf }
0x110b   : > { %2235 = vmax.xlane.f32.xlu1 %v2234_v9 }
0x110e   : > { %v2342_v11 = vpop.f32.mrf.mxu2 }
0x110f   : > { %v2345_v12 = vmul.f32 0.35355338, %v2342_v11 }
0x1111   : > { %3427 = vmatmul.msk.f32.vlgmr.msrb.gmra.mxu1 %vm1129_vm3, %v2409_v14  ;;  %v2346_v15 = vsel %vm4624_vm4, -1e+30, %v2345_v12  ;;  %v3640_v12 = vpack.i.bf16 %v3401_v3, %v3402_v2  ;;  %v3660_v14 = vld [vmem:[#allocation9 + $0x1] ss:$0 sm:$0xff] }
0x1112   : > { %v2347_v16 = vsel %vm1129_vm3, %v2346_v15, -inf }
0x1113   : > { %2348 = vmax.xlane.f32.xlu2 %v2347_v16 }
0x1124   : > { %2356 = vrot.lane.b32.xlu1 %v4820_v49, %s5148_s29 }
0x112b   : > { %2447 = vrot.lane.b32.xlu2 %v4820_v49, %s5149_s18 }
0x117e   : > { %v2236_v30 = vpop.xlane.xlu1 %2235 }
0x117f   : > { %v2237_v31 = vsub.f32 %v2233_v8, %v2236_v30 }
0x1181   : > { %v2238_v33 = vmul.f32 1.442695, %v2237_v31  ;;  %v4917_v31 = vld [vmem:[%s5138_s28 + $0x4] sm:$0x7] }
0x1186   : > { %v2314_v17 = vpop.f32.mrf.mxu1  ;;  %v2349_v19 = vpop.xlane.xlu2 %2348 }
0x1187   : > { %v2350_v21 = vsub.f32 %v2346_v15, %v2349_v19 }
0x1189   : > { %v2351_v22 = vmul.f32 1.442695, %v2350_v21 }
0x118b   : > { %3712 = vpow2.f32 %v2351_v22 }
0x118c   : > { %3714 = vpow2.f32 %v2238_v33 }
0x118e   : > { %v2448_v23 = vpop.permute.xlu2 %2447  ;;  %v2433_v24 = vpop.f32.mrf.mxu1 }
0x118f   : > { %v2436_v25 = vmul.f32 0.35355338, %v2433_v24  ;;  %2468 = vmatpush.msrb.mxu2 %v2448_v23  ;;  %v4912_v24 = vld [vmem:[%s5137_s3 + $0x4] sm:$0x7] }
0x1190   : > { %v2526_v33 = vperm.slane %v4912_v24, 0 }
0x1191   : > { %v3713_v26 = vpop.eup %3712  ;;  %v2437_v27 = vsel %vm4624_vm4, -1e+30, %v2436_v25 }
0x1192   : > { %v2353_v28 = vsel %vm1129_vm3, %v3713_v26, 0.0  ;;  %v2438_v29 = vsel %vm1129_vm3, %v2437_v27, -inf  ;;  %v3715_v34 = vpop.eup %3714 }
0x1193   : > { %2354 = vadd.xlane.f32.xlu1 %v2353_v28  ;;  %2439 = vmax.xlane.f32.xlu0 %v2438_v29  ;;  %v2240_v35 = vsel %vm1129_vm3, %v3715_v34, 0.0 }
0x1196   : > { %v2357_v41 = vpop.permute.xlu1 %2356 }
0x11a7   : > { %2243 = vrot.lane.b32.xlu0 %v4820_v49, %s5150_s19  ;;  %s5152_s19 = sshll.u32 %s5159_s8, 3 }
0x11a8   : > { %s988_s4 = scalar_lea.vmem %s5153_s12, %s5152_s19 }
0x11ac   : > { %2572 = vrot.lane.b32.xlu1 %v3660_v14, %s5144_s9 }
0x11d1   : > { %2241 = vadd.xlane.f32.xlu0 %v2240_v35 }
0x1206   : > { %v2440_v36 = vpop.xlane.xlu0 %2439  ;;  %v2355_v10 = vpop.xlane.xlu1 %2354 }
0x1207   : > { %v2441_v32 = vsub.f32 %v2437_v27, %v2440_v36 }
0x1209   : > { %v2442_v37 = vmul.f32 1.442695, %v2441_v32  ;;  %v2528_v32 = vperm.slane %v4917_v31, 0 }
0x120b   : > { %3716 = vpow2.f32 %v2442_v37 }
0x1211   : > { %v3717_v38 = vpop.eup %3716 }
0x1212   : > { %3428 = vmatmul.msk.f32.vlgmr.msrb.gmra.mxu2 %vm1129_vm3, %v3717_v38  ;;  %v2444_v39 = vsel %vm1129_vm3, %v3717_v38, 0.0 }
0x1213   : > { %2445 = vadd.xlane.f32.xlu2 %v2444_v39 }
0x1219   : > { %v2244_v40 = vpop.permute.xlu0 %2243 }
0x121a   : > { %2264 = vmatpush.msra.mxu0 %v2244_v40 }
0x121b   : > { %3419 = vmatmul.msk.f32.vlgmr.msra.gmra.mxu0 %vm1129_vm3, %v3715_v34 }
0x121c   : > { %2377 = vmatpush.msrb.mxu0 %v2357_v41 }
0x121e   : > { %2493 = vmatpush.msra.mxu0 %v3398_v42  ;;  %v2573_v40 = vpop.permute.xlu1 %2572 }
0x1223   : > { %3424 = vmatmul.msk.f32.vlgmr.msrb.gmra.mxu0 %vm1129_vm3, %v3713_v26 }
0x1244   : > { %v2242_v18 = vpop.xlane.xlu0 %2241 }
0x1286   : > { %v2446_v45 = vpop.xlane.xlu2 %2445 }
0x1287   : > { %3718 = vrcp.f32 %v2446_v45 }
0x1288   : > { %3720 = vrcp.f32 %v2242_v18 }
0x1289   : > { %3722 = vrcp.f32 %v2355_v10 }
0x128d   : > { %v3719_v47 = vpop.eup %3718 }
0x128e   : > { %v3721_v13 = vpop.eup %3720 }
0x128f   : > { %v3723_v51 = vpop.eup %3722 }
0x1295   : > { %v2470_v48 = vpop.f32.mrf.mxu2 }
0x1296   : > { %v2474_v49 = vmul.f32 %v3719_v47, %v2470_v48 }
0x1298   : > { %v2266_v20 = vpop.f32.mrf.mxu0  ;;  %3429 = vmatmul.msk.f32.vlgmr.msra.gmra.mxu0 %vm1129_vm3, %v2474_v49 }
0x1299   : > { %v2270_v50 = vmul.f32 %v3721_v13, %v2266_v20  ;;  %v2084_v20 = vld [vmem:[#allocation10 + $0x20] sm:$0xff] }
0x129b   : > { %3420 = vmatmul.msk.f32.vlgmr.msrb.gmra.mxu3 %vm1129_vm3, %v2270_v50 }
0x129c   : > { %2548 = vmatpush.msrb.mxu3 %v3402_v2 }
0x129e   : > { %2549 = vmatpush.msrb.mxu3 %v3401_v3 }
0x12a0   : > { %v2379_v52 = vpop.f32.mrf.mxu0 }
0x12a1   : > { %v2383_v54 = vmul.f32 %v3723_v51, %v2379_v52 }
0x12a3   : > { %3425 = vmatmul.msk.f32.vlgmr.msra.gmra.mxu3 %vm1129_vm3, %v2383_v54 }
0x1315   : > { %v2495_v60 = vpop.f32.mrf.mxu0 }
0x131e   : > { %v2291_v55 = vpop.f32.mrf.mxu3 }
0x131f   : > { %v2315_v56 = vadd.f32 %v2314_v17, %v2291_v55 }
0x1326   : > { %v2404_v57 = vpop.f32.mrf.mxu3 }
0x1327   : > { %v2407_v58 = vadd.f32 %v2404_v57, %v2315_v56 }
0x1329   : > { %v2498_v61 = vadd.f32 %v2495_v60, %v2407_v58 }
0x132b   : > { %v2502_v62 = vadd.f32 %v3659_v59, %v2498_v61 }
0x132d   : > { %v2503_v63 = vadd.f32 %v2502_v62, %v4813_v46  ;;  %v3400_v46 = vld [vmem:[%s5044_s11 + $0x28] sm:$0xff] }
0x132e   : > { %v3645_v5 = vpack.i.bf16 %v3399_v4, %v3400_v46  ;;  %2550 = vmatpush.msrb.mxu3 %v3400_v46 }
0x132f   : > { %v2504_v0 = vsel %vm1033_vm2, %v2503_v63, 0.0 }
0x1330   : > { %2505 = vadd.xlane.f32.xlu0 %v2504_v0  ;;  %3646 = vrot.lane.b32.xlu2 %v3645_v5, %s5144_s9 }
0x1331   : > { %2551 = vmatpush.msrb.mxu3 %v3399_v4 }
0x138a   : > { %v3647_v27 = vpop.permute.xlu2 %3646 }
0x138b   : > { %v3648_v35 = vunpack.i.l.bf16 %v3647_v27  ;;  %v3649_v37 = vunpack.i.h.bf16 %v3647_v27 }
0x13a3   : > { %v2506_v6 = vpop.xlane.xlu0 %2505 }
0x13a4   : > { %v2507_v7 = vmul.f32 %v2506_v6, %v4690_v53 }
0x13a6   : > { %v2508_v8 = vsub.f32 %v2503_v63, %v2507_v7 }
0x13a8   : > { %v2509_v9 = vmul.f32 %v2508_v8, %v2508_v8 }
0x13aa   : > { %v2510_v11 = vsel %vm1033_vm2, %v2509_v9, 0.0 }
0x13ab   : > { %2511 = vadd.xlane.f32.xlu0 %v2510_v11 }
0x13bf   : > { %3641 = vrot.lane.b32.xlu0 %v3640_v12, %s5144_s9 }
0x141e   : > { %v2512_v15 = vpop.xlane.xlu0 %2511 }
0x141f   : > { %v2513_v16 = vmul.f32 %v2512_v15, %v4690_v53 }
0x1421   : > { %v2514_v17 = vadd.f32 1e-05, %v2513_v16 }
0x1423   : > { %3724 = vrsqrt.f32 %v2514_v17  ;;  %vm2521_vm4 = vweird.f32 %v2514_v17 }
0x1429   : > { %v3725_v19 = vpop.eup %3724 }
0x142a   : > { %v2516_v21 = vmul.f32 %v3725_v19, %v2514_v17  ;;  %vm2522_vm0 = vweird.f32 %v3725_v19 }
0x142b   : > { %vm2523_vm5 = vmor %vm2521_vm4, %vm2522_vm0 }
0x142c   : > { %v2517_v22 = vmul.f32 %v3725_v19, %v2516_v21 }
0x142e   : > { %v2518_v23 = vmul.f32 0.5, %v2517_v22 }
0x1430   : > { %v2519_v25 = vsub.f32 1.5, %v2518_v23 }
0x1431   : > { %v3642_v26 = vpop.permute.xlu0 %3641 }
0x1432   : > { %v2520_v28 = vmul.f32 %v3725_v19, %v2519_v25  ;;  %v3644_v29 = vunpack.i.h.bf16 %v3642_v26  ;;  %v3643_v30 = vunpack.i.l.bf16 %v3642_v26 }
0x1434   : > { %v2524_v34 = vsel %vm2523_vm5, %v3725_v19, %v2520_v28  ;;  %2587 = vmatpush.msra.mxu1 %v3643_v30  ;;  %v2085_v19 = vld [vmem:[#allocation10 + $0x28] sm:$0xff] }
0x1435   : > { %v2525_v36 = vmul.f32 %v2524_v34, %v2508_v8 }
0x1436   : > { %2588 = vmatpush.msra.mxu1 %v3644_v29 }
0x1437   : > { %v2527_v38 = vmul.f32 %v2526_v33, %v2525_v36  ;;  %v2086_v33 = vld [vmem:[#allocation10 + $0x30] sm:$0xff] }
0x1438   : > { %2589 = vmatpush.msra.mxu1 %v3648_v35 }
0x1439   : > { %v4921_v39 = vadd.f32 %v2528_v32, %v2527_v38 }
0x143a   : > { %2590 = vmatpush.msra.mxu1 %v3649_v37 }
0x143b   : > { %3430 = vmatmul.msk.f32.vlgmr.msrb.gmra.mxu3 %vm1033_vm2, %v4921_v39  ;;  %3431 = vmatmul.msk.f32.vlgmr.msra.gmra.mxu1 %vm1033_vm2, %v4696_v1 }
0x14b8   : > { %v2592_v41 = vpop.f32.mrf.mxu1 }
0x14b9   : > { %v2593_v42 = vadd.f32 %v2592_v41, %v2573_v40 }
0x14bb   : > { %2661 = vrot.lane.b32.xlu1 %v2593_v42, %s5145_s0  ;;  %3432 = vmatpush.xpose.msk.msra.mxu2 %vm1129_vm3, %v2593_v42 }
0x14bc   : > { %2631 = vrot.lane.b32.xlu2 %v2593_v42, %s5144_s9  ;;  %s5151_s9 = sld [smem:[#allocation48_spill]] }
0x14be   : > { %v2553_v43 = vpop.f32.mrf.mxu3 }
0x14bf   : > { %v2554_v44 = vadd.f32 %v3660_v14, %v2553_v43  ;;  %2743 = vmatpush.msrb.mxu2 %v2085_v19  ;;  %v2087_v43 = vld [vmem:[#allocation10 + $0x38] sm:$0xff]  ;;  %v2980_v19 = vperm.slane %v4917_v31, 1 }
0x14c1   : > { %3433 = vmatmul.msk.f32.vlgmr.msra.gmra.mxu2 %vm1129_vm3, %v2554_v44 }
0x14c2   : > { %2855 = vmatpush.msra.mxu2 %v2086_v33  ;;  %v3663_v33 = vld [vmem:[#allocation16 + $0x1] ss:$0 sm:$0xff] }
0x14c3   : > { %2659 = vrot.lane.b32.xlu1 %v2554_v44, %s5145_s0 }
0x14cb   : > { %2773 = vrot.lane.b32.xlu1 %v2593_v42, %s5146_s30 }
0x14d3   : > { %2771 = vrot.lane.b32.xlu1 %v2554_v44, %s5146_s30 }
0x14db   : > { %2861 = vrot.lane.b32.xlu1 %v2554_v44, %s5147_s20 }
0x1516   : > { %v2632_v1 = vpop.permute.xlu2 %2631 }
0x1517   : > { %2652 = vmatpush.msrb.mxu0 %v2632_v1 }
0x1519   : > { %2766 = vmatpush.msra.mxu0 %v2084_v20 }
0x152d   : > { %v2662_v45 = vpop.permute.xlu1 %2661 }
0x152e   : > { %3435 = vmatpush.xpose.msk.msra.mxu3 %vm1129_vm3, %v2662_v45 }
0x1535   : > { %v2660_v18 = vpop.permute.xlu1 %2659 }
0x1536   : > { %3436 = vmatmul.msk.f32.vlgmr.msra.gmra.mxu3 %vm1129_vm3, %v2660_v18 }
0x153d   : > { %v2774_v47 = vpop.permute.xlu1 %2773 }
0x153e   : > { %3440 = vmatpush.xpose.msk.msrb.mxu3 %vm1129_vm3, %v2774_v47 }
0x1544   : > { %v2618_v48 = vpop.f32.mrf.mxu2 }
0x1545   : > { %v2621_v49 = vmul.f32 0.35355338, %v2618_v48  ;;  %v2772_v10 = vpop.permute.xlu1 %2771 }
0x1546   : > { %3441 = vmatmul.msk.f32.vlgmr.msrb.gmra.mxu3 %vm1129_vm3, %v2772_v10 }
0x1547   : > { %v2622_v13 = vsel %vm1129_vm3, %v2621_v49, -inf }
0x1548   : > { %2623 = vmax.xlane.f32.xlu0 %v2622_v13  ;;  %v3661_v13 = vld [vmem:[#allocation12 + $0x1] ss:$0 sm:$0xff] }
0x154d   : > { %v2862_v63 = vpop.permute.xlu1 %2861 }
0x155c   : > { %2863 = vrot.lane.b32.xlu0 %v2593_v42, %s5147_s20 }
0x15b9   : > { %v2684_v50 = vpop.f32.mrf.mxu3 }
0x15ba   : > { %v2687_v51 = vmul.f32 0.35355338, %v2684_v50 }
0x15bb   : > { %v2624_v52 = vpop.xlane.xlu0 %2623 }
0x15bc   : > { %v2625_v54 = vsub.f32 %v2621_v49, %v2624_v52  ;;  %v2688_v55 = vsel %vm1129_vm3, %v2687_v51, -inf }
0x15bd   : > { %2689 = vmax.xlane.f32.xlu1 %v2688_v55 }
0x15be   : > { %v2626_v56 = vmul.f32 1.442695, %v2625_v54 }
0x15c0   : > { %3726 = vpow2.f32 %v2626_v56 }
0x15c6   : > { %v3727_v57 = vpop.eup %3726 }
0x15c7   : > { %3434 = vmatmul.msk.f32.vlgmr.msrb.gmra.mxu0 %vm1129_vm3, %v3727_v57  ;;  %v2628_v58 = vsel %vm1129_vm3, %v3727_v57, 0.0 }
0x15c8   : > { %2629 = vadd.xlane.f32.xlu2 %v2628_v58 }
0x15c9   : > { %v2796_v59 = vpop.f32.mrf.mxu3 }
0x15ca   : > { %v2799_v60 = vmul.f32 0.35355338, %v2796_v59 }
0x15cc   : > { %v2800_v62 = vsel %vm1129_vm3, %v2799_v60, -inf }
0x15ce   : > { %v2864_v61 = vpop.permute.xlu0 %2863 }
0x15cf   : > { %3444 = vmatpush.xpose.msk.msrb.mxu0 %vm1129_vm3, %v2864_v61  ;;  %v2093_v61 = vld [vmem:[#allocation13 + $0x30] sm:$0xff] }
0x15d0   : > { %2801 = vmax.xlane.f32.xlu2 %v2800_v62  ;;  %v2092_v62 = vld [vmem:[#allocation13 + $0x28] sm:$0xff] }
0x15d6   : > { %2899 = vrot.lane.b32.xlu1 %v2593_v42, %s5140_s10 }
0x15e8   : > { %2697 = vrot.lane.b32.xlu2 %v2593_v42, %s5139_s7 }
0x15f0   : > { %2809 = vrot.lane.b32.xlu2 %v2593_v42, %s5141_s27 }
0x1630   : > { %v2690_v0 = vpop.xlane.xlu1 %2689 }
0x1631   : > { %v2691_v2 = vsub.f32 %v2687_v51, %v2690_v0  ;;  %v3409_v0 = vld [vmem:[%s5142_s25 + $0x70] sm:$0xff] }
0x1633   : > { %v2692_v3 = vmul.f32 1.442695, %v2691_v2  ;;  %v3408_v2 = vld [vmem:[%s5142_s25 + $0x68] sm:$0xff] }
0x1635   : > { %3728 = vpow2.f32 %v2692_v3 }
0x163b   : > { %v3729_v4 = vpop.eup %3728  ;;  %v2630_v46 = vpop.xlane.xlu2 %2629 }
0x163c   : > { %v2694_v5 = vsel %vm1129_vm3, %v3729_v4, 0.0  ;;  %3730 = vrcp.f32 %v2630_v46  ;;  %v3407_v46 = vld [vmem:[%s5142_s25 + $0x60] sm:$0xff] }
0x163d   : > { %2695 = vadd.xlane.f32.xlu2 %v2694_v5 }
0x1642   : > { %v3731_v7 = vpop.eup %3730 }
0x1643   : > { %v2802_v6 = vpop.xlane.xlu2 %2801 }
0x1644   : > { %v2654_v8 = vpop.f32.mrf.mxu0  ;;  %v2803_v11 = vsub.f32 %v2799_v60, %v2802_v6  ;;  %v2094_v60 = vld [vmem:[#allocation13 + $0x38] sm:$0xff] }
0x1645   : > { %v2658_v9 = vmul.f32 %v3731_v7, %v2654_v8  ;;  %v3406_v6 = vld [vmem:[%s5142_s25 + $0x58] sm:$0xff] }
0x1646   : > { %v2804_v14 = vmul.f32 1.442695, %v2803_v11 }
0x1647   : > { %3439 = vmatmul.msk.f32.vlgmr.msra.gmra.mxu0 %vm1129_vm3, %v2658_v9 }
0x1648   : > { %v2900_v12 = vpop.permute.xlu1 %2899  ;;  %3732 = vpow2.f32 %v2804_v14 }
0x1649   : > { %2920 = vmatpush.msra.mxu3 %v2900_v12 }
0x164b   : > { %v2698_v15 = vpop.permute.xlu2 %2697 }
0x164c   : > { %2718 = vmatpush.msrb.mxu1 %v2698_v15  ;;  %v2978_v15 = vperm.slane %v4912_v24, 1 }
0x164d   : > { %3437 = vmatmul.msk.f32.vlgmr.msrb.gmra.mxu1 %vm1129_vm3, %v3729_v4 }
0x164e   : > { %v3733_v17 = vpop.eup %3732 }
0x164f   : > { %3445 = vmatmul.msk.f32.vlgmr.msrb.gmra.mxu0 %vm1129_vm3, %v2862_v63  ;;  %v2806_v30 = vsel %vm1129_vm3, %v3733_v17, 0.0  ;;  %v2091_v63 = vld [vmem:[#allocation13 + $0x20] sm:$0xff] }
0x1653   : > { %v2810_v16 = vpop.permute.xlu2 %2809 }
0x1654   : > { %2830 = vmatpush.msra.mxu1 %v2810_v16 }
0x1655   : > { %3442 = vmatmul.msk.f32.vlgmr.msra.gmra.mxu1 %vm1129_vm3, %v3733_v17 }
0x1656   : > { %2945 = vmatpush.msrb.mxu1 %v2087_v43  ;;  %v3065_v43 = vld [vmem:[#allocation18 + $0x18] sm:$0xff] }
0x1657   : > { %3085 = vmatpush.msrb.mxu3 %v3065_v43 }
0x16b0   : > { %v2696_v21 = vpop.xlane.xlu2 %2695 }
0x16b1   : > { %3734 = vrcp.f32 %v2696_v21 }
0x16b7   : > { %v3735_v23 = vpop.eup %3734 }
0x16c4   : > { %v2768_v22 = vpop.f32.mrf.mxu0 }
0x16ca   : > { %v2720_v25 = vpop.f32.mrf.mxu1 }
0x16cb   : > { %v2724_v26 = vmul.f32 %v3735_v23, %v2720_v25  ;;  %v3405_v23 = vld [vmem:[%s5142_s25 + $0x50] sm:$0xff]  ;;  %v3404_v25 = vld [vmem:[%s5142_s25 + $0x48] sm:$0xff] }
0x16cc   : > { %v2886_v27 = vpop.f32.mrf.mxu0 }
0x16cd   : > { %v2889_v28 = vmul.f32 0.35355338, %v2886_v27  ;;  %3438 = vmatmul.msk.f32.vlgmr.msrb.gmra.mxu2 %vm1129_vm3, %v2724_v26  ;;  %v3403_v26 = vld [vmem:[%s5142_s25 + $0x40] sm:$0xff]  ;;  %v3662_v27 = vld [vmem:[#allocation15 + $0x1] ss:$0 sm:$0xff] }
0x16ce   : > { %3000 = vmatpush.msrb.mxu2 %v2094_v60  ;;  %v3664_v60 = vld [vmem:[#allocation19] ss:$0 sm:$0xff] }
0x16cf   : > { %v2890_v29 = vsel %vm1129_vm3, %v2889_v28, -inf }
0x16d0   : > { %2891 = vmax.xlane.f32.xlu0 %v2890_v29  ;;  %3001 = vmatpush.msrb.mxu2 %v2093_v61 }
0x16d2   : > { %v2832_v41 = vpop.f32.mrf.mxu1  ;;  %3002 = vmatpush.msrb.mxu2 %v2092_v62 }
0x16d4   : > { %3003 = vmatpush.msrb.mxu2 %v2091_v63 }
0x16d8   : > { %2807 = vadd.xlane.f32.xlu0 %v2806_v30 }
0x1743   : > { %v2892_v34 = vpop.xlane.xlu0 %2891 }
0x1744   : > { %v2893_v35 = vsub.f32 %v2889_v28, %v2892_v34 }
0x1746   : > { %v2894_v36 = vmul.f32 1.442695, %v2893_v35 }
0x1748   : > { %3736 = vpow2.f32 %v2894_v36 }
0x174b   : > { %v2808_v32 = vpop.xlane.xlu0 %2807 }
0x174c   : > { %3738 = vrcp.f32 %v2808_v32 }
0x174e   : > { %v3737_v37 = vpop.eup %3736 }
0x174f   : > { %3446 = vmatmul.msk.f32.vlgmr.msra.gmra.mxu3 %vm1129_vm3, %v3737_v37  ;;  %v2896_v38 = vsel %vm1129_vm3, %v3737_v37, 0.0 }
0x1750   : > { %2897 = vadd.xlane.f32.xlu0 %v2896_v38  ;;  %v2745_v47 = vpop.f32.mrf.mxu2 }
0x1751   : > { %v2769_v49 = vadd.f32 %v2768_v22, %v2745_v47 }
0x1752   : > { %v3739_v40 = vpop.eup %3738 }
0x1753   : > { %v2836_v42 = vmul.f32 %v3739_v40, %v2832_v41 }
0x1755   : > { %3443 = vmatmul.msk.f32.vlgmr.msra.gmra.mxu2 %vm1129_vm3, %v2836_v42 }
0x17c3   : > { %v2898_v44 = vpop.xlane.xlu0 %2897 }
0x17c4   : > { %3740 = vrcp.f32 %v2898_v44  ;;  %v3064_v44 = vld [vmem:[#allocation18 + $0x10] sm:$0xff] }
0x17c5   : > { %3086 = vmatpush.msrb.mxu3 %v3064_v44 }
0x17ca   : > { %v3741_v1 = vpop.eup %3740 }
0x17d2   : > { %v2922_v45 = vpop.f32.mrf.mxu3 }
0x17d3   : > { %v2926_v18 = vmul.f32 %v3741_v1, %v2922_v45  ;;  %v3063_v1 = vld [vmem:[#allocation18 + $0x8] sm:$0xff]  ;;  %v3062_v45 = vld [vmem:[#allocation18] sm:$0xff] }
0x17d4   : > { %3087 = vmatpush.msrb.mxu3 %v3063_v1 }
0x17d5   : > { %3447 = vmatmul.msk.f32.vlgmr.msrb.gmra.mxu1 %vm1129_vm3, %v2926_v18 }
0x17d6   : > { %3088 = vmatpush.msrb.mxu3 %v3062_v45 }
0x17d8   : > { %v2857_v48 = vpop.f32.mrf.mxu2 }
0x17d9   : > { %v2860_v10 = vadd.f32 %v2857_v48, %v2769_v49 }
0x1852   : > { %v2947_v20 = vpop.f32.mrf.mxu1 }
0x1853   : > { %v2950_v50 = vadd.f32 %v2947_v20, %v2860_v10 }
0x1855   : > { %v2954_v51 = vadd.f32 %v3661_v13, %v2950_v50 }
0x1857   : > { %v2955_v52 = vadd.f32 %v2954_v51, %v4921_v39  ;;  %v3410_v39 = vld [vmem:[%s5142_s25 + $0x78] sm:$0xff] }
0x1858   : > { %3023 = vmatpush.msra.mxu0 %v3410_v39  ;;  %v3665_v39 = vld [vmem:[#allocation21] ss:$0 sm:$0xff] }
0x1859   : > { %v2956_v54 = vsel %vm1033_vm2, %v2955_v52, 0.0 }
0x185a   : > { %2957 = vadd.xlane.f32.xlu1 %v2956_v54  ;;  %3024 = vmatpush.msra.mxu0 %v3409_v0 }
0x185c   : > { %3025 = vmatpush.msra.mxu0 %v3408_v2 }
0x185e   : > { %3026 = vmatpush.msra.mxu0 %v3407_v46 }
0x1860   : > { %3027 = vmatpush.msra.mxu0 %v3406_v6 }
0x1862   : > { %3028 = vmatpush.msra.mxu0 %v3405_v23 }
0x1864   : > { %3029 = vmatpush.msra.mxu0 %v3404_v25 }
0x1866   : > { %3030 = vmatpush.msra.mxu0 %v3403_v26 }
0x18cd   : > { %v2958_v55 = vpop.xlane.xlu1 %2957 }
0x18ce   : > { %v2959_v56 = vmul.f32 %v2958_v55, %v4690_v53 }
0x18d0   : > { %v2960_v57 = vsub.f32 %v2955_v52, %v2959_v56  ;;  %v3058_v52 = vperm.slane %v4912_v24, 2  ;;  %v3060_v56 = vperm.slane %v4917_v31, 2  ;;  %v3095_v24 = vld [vmem:[%s5151_s9 + $0x8] sm:$0xff]  ;;  %v3094_v31 = vld [vmem:[%s5151_s9] sm:$0xff] }
0x18d2   : > { %v2961_v58 = vmul.f32 %v2960_v57, %v2960_v57 }
0x18d4   : > { %v2962_v59 = vsel %vm1033_vm2, %v2961_v58, 0.0 }
0x18d5   : > { %2963 = vadd.xlane.f32.xlu0 %v2962_v59  ;;  %v3096_v59 = vld [vmem:[%s5151_s9 + $0x10] sm:$0xff] }
0x1948   : > { %v2964_v3 = vpop.xlane.xlu0 %2963 }
0x1949   : > { %v2965_v4 = vmul.f32 %v2964_v3, %v4690_v53 }
0x194b   : > { %v2966_v5 = vadd.f32 1e-05, %v2965_v4 }
0x194d   : > { %3742 = vrsqrt.f32 %v2966_v5  ;;  %vm2973_vm6 = vweird.f32 %v2966_v5 }
0x1953   : > { %v3743_v7 = vpop.eup %3742 }
0x1954   : > { %v2968_v8 = vmul.f32 %v3743_v7, %v2966_v5  ;;  %vm2974_vm3 = vweird.f32 %v3743_v7 }
0x1955   : > { %vm2975_vm7 = vmor %vm2973_vm6, %vm2974_vm3 }
0x1956   : > { %v2969_v9 = vmul.f32 %v3743_v7, %v2968_v8 }
0x1958   : > { %v2970_v11 = vmul.f32 0.5, %v2969_v9 }
0x195a   : > { %v2971_v12 = vsub.f32 1.5, %v2970_v11 }
0x195c   : > { %v2972_v14 = vmul.f32 %v3743_v7, %v2971_v12 }
0x195e   : > { %v2976_v16 = vsel %vm2975_vm7, %v3743_v7, %v2972_v14 }
0x195f   : > { %v2977_v17 = vmul.f32 %v2976_v16, %v2960_v57 }
0x1961   : > { %v2979_v21 = vmul.f32 %v2978_v15, %v2977_v17 }
0x1963   : > { %v2981_v22 = vadd.f32 %v2980_v19, %v2979_v21 }
0x1965   : > { %3448 = vmatmul.msk.f32.vlgmr.msrb.gmra.mxu2 %vm1033_vm2, %v2981_v22 }
0x19e8   : > { %v3005_v28 = vpop.f32.mrf.mxu2 }
0x19e9   : > { %v3006_v29 = vadd.f32 %v3662_v27, %v3005_v28 }
0x19eb   : > { %v3008_v30 = vmax.f32 %v3006_v29, 0.0 }
0x19ed   : > { %3449 = vmatmul.msk.f32.vlgmr.msra.gmra.mxu0 %vm2011_vm12, %v3008_v30 }
0x1a6a   : > { %v3032_v34 = vpop.f32.mrf.mxu0 }
0x1a6b   : > { %v3033_v35 = vadd.f32 %v3663_v33, %v3032_v34 }
0x1a6d   : > { %v3035_v36 = vadd.f32 %v3033_v35, %v2981_v22 }
0x1a6f   : > { %v3036_v32 = vsel %vm1033_vm2, %v3035_v36, 0.0 }
0x1a70   : > { %3037 = vadd.xlane.f32.xlu0 %v3036_v32 }
0x1ae3   : > { %v3038_v37 = vpop.xlane.xlu0 %3037 }
0x1ae4   : > { %v3039_v38 = vmul.f32 %v3038_v37, %v4690_v53 }
0x1ae6   : > { %v3040_v40 = vsub.f32 %v3035_v36, %v3039_v38 }
0x1ae8   : > { %v3041_v41 = vmul.f32 %v3040_v40, %v3040_v40 }
0x1aea   : > { %v3042_v42 = vsel %vm1033_vm2, %v3041_v41, 0.0 }
0x1aeb   : > { %3043 = vadd.xlane.f32.xlu0 %v3042_v42 }
0x1b5e   : > { %v3044_v18 = vpop.xlane.xlu0 %3043 }
0x1b5f   : > { %v3045_v47 = vmul.f32 %v3044_v18, %v4690_v53  ;;  %v3097_v53 = vld [vmem:[%s5151_s9 + $0x18] sm:$0xff] }
0x1b60   : > { %3117 = vmatpush.msra.mxu1 %v3097_v53 }
0x1b61   : > { %v3046_v48 = vadd.f32 1e-05, %v3045_v47 }
0x1b62   : > { %3118 = vmatpush.msra.mxu1 %v3096_v59 }
0x1b63   : > { %3744 = vrsqrt.f32 %v3046_v48  ;;  %vm3053_vm9 = vweird.f32 %v3046_v48 }
0x1b64   : > { %3119 = vmatpush.msra.mxu1 %v3095_v24 }
0x1b66   : > { %3120 = vmatpush.msra.mxu1 %v3094_v31 }
0x1b69   : > { %v3745_v49 = vpop.eup %3744 }
0x1b6a   : > { %v3048_v10 = vmul.f32 %v3745_v49, %v3046_v48  ;;  %vm3054_vm8 = vweird.f32 %v3745_v49 }
0x1b6b   : > { %vm3055_vm10 = vmor %vm3053_vm9, %vm3054_vm8 }
0x1b6c   : > { %v3049_v13 = vmul.f32 %v3745_v49, %v3048_v10 }
0x1b6e   : > { %v3050_v20 = vmul.f32 0.5, %v3049_v13 }
0x1b70   : > { %v3051_v50 = vsub.f32 1.5, %v3050_v20 }
0x1b72   : > { %v3052_v51 = vmul.f32 %v3745_v49, %v3051_v50 }
0x1b74   : > { %v3056_v54 = vsel %vm3055_vm10, %v3745_v49, %v3052_v51 }
0x1b75   : > { %v3057_v55 = vmul.f32 %v3056_v54, %v3040_v40 }
0x1b77   : > { %v3059_v57 = vmul.f32 %v3058_v52, %v3057_v55 }
0x1b79   : > { %v3061_v58 = vadd.f32 %v3060_v56, %v3059_v57 }
0x1b7b   : > { %3450 = vmatmul.msk.f32.vlgmr.msrb.gmra.mxu3 %vm1033_vm2, %v3061_v58 }
0x1bfe   : > { %v3090_v61 = vpop.f32.mrf.mxu3 }
0x1bff   : > { %v3091_v62 = vadd.f32 %v3664_v60, %v3090_v61 }
0x1c01   : > { %3746 = vtanh.f32 %v3091_v62 }
0x1c07   : > { %v3747_v63 = vpop.eup %3746 }
0x1c08   : > { %3451 = vmatmul.msk.f32.vlgmr.msra.gmra.mxu1 %vm1033_vm2, %v3747_v63 }
0x1c85   : > { %v3122_v0 = vpop.f32.mrf.mxu1 }
0x1c86   : > { %v3123_v2 = vadd.f32 %v3665_v39, %v3122_v0 }
0x1c88   : > { %3125 = vst.msk [vmem:[%s988_s4] sm:$0xff] %vm996_vm1, %v3123_v2 }
0x1c89 PF: > { %p41_p1 = scmp.ge.s32.totalorder %s4479_s5, 4   ;;  %s5154_s29 = smov %s4188_s2 }
0x1c8a   : > { %s5155_s2 = smov %s4192_s6  ;;  %s5156_s6 = smov %s4490_s1 }
0x1c8b   : > { %s5157_s30 = smov %s4479_s5  ;;  %43 = sbr.rel (!%p41_p1) target bundleno = 31 (0x1f), region = 225 }
0x1c90   :  { %3145 = vsyncpa [#allocation3], 1 }
0x1c91   :  { %3147 = vsyncpa [#allocation3 + $0x1], 1 }
0x1c92   :  { %3148 = vsyncpa [#allocation5], 1 }
0x1c93   :  { %3149 = vsyncpa [#allocation8], 1 }
0x1c94   :  { %3150 = vsyncpa [#allocation11], 1 }
0x1c95   :  { %3151 = vsyncpa [#allocation14], 1 }
0x1c96   :  { %3152 = vsyncpa [#allocation17], 1 }
0x1c97   :  { %3153 = vsyncpa [#allocation20], 1 }

</bundles_post_ra>
